<compile_context>
chip_gen: v7x
topology: tpu7x:2x2x1
jax: 0.10.0
libtpu: 0.0.40
codegen_flags: <defaults>
</compile_context>

<pallas_src>
import functools
import math

import jax
import jax.numpy as jnp
from jax.experimental import pallas as pl
from jax.experimental.pallas import tpu as pltpu


# Most-accurate MXU pass configuration for f32 operands (parity with the f32
# PyTorch reference).  For production speed, switch to bf16 operands + DEFAULT.
_MATMUL_PRECISION = jax.lax.Precision.HIGHEST


# ----------------------------------------------------------------------------
# helpers
# ----------------------------------------------------------------------------
def _round_up(x: int, m: int) -> int:
    return (x + m - 1) // m * m


def _scoped_vmem_default_bytes() -> int:
    """Generation-aware scoped-VMEM default (conservative fallback = v5e)."""
    try:
        kind = jax.devices()[0].device_kind.lower()
    except Exception:
        return 16 * 1024 * 1024
    if "v5e" in kind or "v5 lite" in kind or "v5lite" in kind:
        return 16 * 1024 * 1024
    # v6e / v7x scoped-VMEM default is 32 MiB (v7x physical VMEM is 64 MiB).
    return 32 * 1024 * 1024


def _pick_tm(M: int, k_resident: int, n_resident: int, n_row_streams: int) -> int:
    """Largest row tile (multiple of 8, <= 512) whose double-buffered row
    streams (x plus `n_row_streams` N-wide streams) fit in half the scoped
    VMEM default, leaving headroom for weight/bias blocks and the pipeline."""
    budget = _scoped_vmem_default_bytes() // 2
    bytes_per_row = 4 * 2 * (k_resident + n_row_streams * n_resident)  # f32, dbl-buf
    cap = max(8, (budget // max(bytes_per_row, 1)) // 8 * 8)
    return int(min(512, cap, _round_up(M, 8)))


def _pick_tk(K: int) -> int:
    # Reduction dim must tile exactly (padded K blocks would pollute the sum).
    if K <= 512:
        return K
    for t in (512, 256, 128):          # prefer 256-multiples (v6e/v7x 2x256 MXU)
        if K % t == 0:
            return t
    return K


def _pick_tn(N: int) -> int:
    if N <= 512:
        return N
    for t in (512, 256, 128):
        if N % t == 0:
            return t
    return N


# ----------------------------------------------------------------------------
# Linear kernels: out = [residual +] [relu]( [LayerNorm](x) @ w [+ bias] )
# ----------------------------------------------------------------------------
def _linear_nk1_kernel(*refs, fuse_ln, has_bias, has_res, apply_relu, eps,
                       k_features):
    """nk == 1 specialization: full reduction dim resident, no accumulator."""
    idx = 0
    x_ref = refs[idx]; idx += 1
    ln_a_ref = ln_b_ref = None
    if fuse_ln:
        ln_a_ref, ln_b_ref = refs[idx], refs[idx + 1]; idx += 2
    w_ref = refs[idx]; idx += 1
    b_ref = None
    if has_bias:
        b_ref = refs[idx]; idx += 1
    r_ref = None
    if has_res:
        r_ref = refs[idx]; idx += 1
    o_ref = refs[idx]

    x = x_ref[...].astype(jnp.float32)                       # (tm, K)
    if fuse_ln:
        # Custom torch LayerNormalization: UNBIASED std, eps added to std.
        mean = jnp.mean(x, axis=-1, keepdims=True)
        diff = x - mean
        var = jnp.sum(diff * diff, axis=-1, keepdims=True) * (1.0 / (k_features - 1))
        inv = 1.0 / (jnp.sqrt(var) + jnp.float32(eps))       # exact divide
        x = ln_a_ref[...].astype(jnp.float32) * (diff * inv) \
            + ln_b_ref[...].astype(jnp.float32)

    acc = jnp.dot(x, w_ref[...].astype(jnp.float32),
                  preferred_element_type=jnp.float32,
                  precision=_MATMUL_PRECISION)
    if has_bias:
        acc = acc + b_ref[...].astype(jnp.float32)
    if apply_relu:
        acc = jnp.maximum(acc, jnp.float32(0.0))
    if has_res:
        acc = acc + r_ref[...].astype(jnp.float32)
    o_ref[...] = acc.astype(o_ref.dtype)


def _linear_acc_kernel(*refs, nk, has_bias, has_res, apply_relu):
    """Generic nk > 1 path with an f32 accumulator (reduction axis last)."""
    x_ref, w_ref = refs[0], refs[1]
    idx = 2
    b_ref = None
    if has_bias:
        b_ref = refs[idx]; idx += 1
    r_ref = None
    if has_res:
        r_ref = refs[idx]; idx += 1
    o_ref, acc_ref = refs[idx], refs[idx + 1]

    k = pl.program_id(2)

    @pl.when(k == 0)
    def _():
        acc_ref[...] = jnp.zeros_like(acc_ref)

    acc_ref[...] += jnp.dot(x_ref[...], w_ref[...],
                            preferred_element_type=jnp.float32,
                            precision=_MATMUL_PRECISION)

    @pl.when(k == nk - 1)
    def _():
        acc = acc_ref[...]
        if has_bias:
            acc = acc + b_ref[...].astype(jnp.float32)
        if apply_relu:
            acc = jnp.maximum(acc, jnp.float32(0.0))
        if has_res:
            acc = acc + r_ref[...].astype(jnp.float32)
        o_ref[...] = acc.astype(o_ref.dtype)


def linear(x, w, *, ln=None, bias=None, residual=None, apply_relu=False, eps=1e-6):
    """out = [residual +] [relu]( [layernorm](x) @ w [+ bias] ).

    `ln=(alpha, beta)` fuses the pre-norm LayerNorm into the matmul prologue
    (requires the full reduction dim resident, i.e. nk == 1).
    """
    M, K = x.shape
    K2, N = w.shape
    assert K == K2
    tk = _pick_tk(K)
    assert K % tk == 0, "reduction dim must tile exactly"
    nk = K // tk
    tn = _pick_tn(N)
    tm = _pick_tm(M, tk, tn, 1 + int(residual is not None))

    if nk == 1:
        grid = (pl.cdiv(M, tm), pl.cdiv(N, tn))
        in_specs = [pl.BlockSpec((tm, K), lambda i, j: (i, 0))]
        args = [x]
        if ln is not None:
            in_specs += [pl.BlockSpec((1, K), lambda i, j: (0, 0)),   # resident scale
                         pl.BlockSpec((1, K), lambda i, j: (0, 0))]   # resident shift
            args += [ln[0].reshape(1, K), ln[1].reshape(1, K)]
        in_specs.append(pl.BlockSpec((K, tn), lambda i, j: (0, j)))
        args.append(w)
        if bias is not None:
            in_specs.append(pl.BlockSpec((1, tn), lambda i, j: (0, j)))
            args.append(bias.reshape(1, N))
        if residual is not None:
            in_specs.append(pl.BlockSpec((tm, tn), lambda i, j: (i, j)))
            args.append(residual)

        kernel = functools.partial(
            _linear_nk1_kernel, fuse_ln=ln is not None, has_bias=bias is not None,
            has_res=residual is not None, apply_relu=apply_relu, eps=eps,
            k_features=K)

        return pl.pallas_call(
            kernel,
            out_shape=jax.ShapeDtypeStruct((M, N), x.dtype),
            grid_spec=pltpu.PrefetchScalarGridSpec(
                num_scalar_prefetch=0,
                grid=grid,
                in_specs=in_specs,
                out_specs=pl.BlockSpec((tm, tn), lambda i, j: (i, j)),
            ),
            compiler_params=pltpu.CompilerParams(
                dimension_semantics=("parallel", "parallel")),
        )(*args)

    # --- nk > 1: generic accumulator path -----------------------------------
    # TODO(synk): fuse LN here too by staging the full row once per k-sweep.
    assert ln is None, "fused LayerNorm requires the full reduction dim in one block"
    grid = (pl.cdiv(M, tm), pl.cdiv(N, tn), nk)
    in_specs = [
        pl.BlockSpec((tm, tk), lambda i, j, k: (i, k)),
        pl.BlockSpec((tk, tn), lambda i, j, k: (k, j),
                     pipeline_mode=pl.Buffered(3)),          # hide weight stream
    ]
    args = [x, w]
    if bias is not None:
        in_specs.append(pl.BlockSpec((1, tn), lambda i, j, k: (0, j)))
        args.append(bias.reshape(1, N))
    if residual is not None:
        in_specs.append(pl.BlockSpec((tm, tn), lambda i, j, k: (i, j)))
        args.append(residual)

    kernel = functools.partial(
        _linear_acc_kernel, nk=nk, has_bias=bias is not None,
        has_res=residual is not None, apply_relu=apply_relu)

    return pl.pallas_call(
        kernel,
        out_shape=jax.ShapeDtypeStruct((M, N), x.dtype),
        grid_spec=pltpu.PrefetchScalarGridSpec(
            num_scalar_prefetch=0,
            grid=grid,
            in_specs=in_specs,
            out_specs=pl.BlockSpec((tm, tn), lambda i, j, k: (i, j)),
            scratch_shapes=[pltpu.VMEM((tm, tn), jnp.float32)],
        ),
        compiler_params=pltpu.CompilerParams(
            dimension_semantics=("parallel", "parallel", "arbitrary")),
    )(*args)


# ----------------------------------------------------------------------------
# Multi-head attention kernel
#   * consumes the fused (B*S, 3D) QKV buffer directly (q/k/v column slices
#     and head split done in-kernel),
#   * folds 1/sqrt(dk) into q,
#   * exact numerically-stable softmax,
#   * writes a lane-dense (B*S, D) head-concat output (no JAX transposes).
# ----------------------------------------------------------------------------
def _mha_kernel(qkv_ref, mask_ref, o_ref, *, h, dk, scale):
    d = h * dk
    qkv = qkv_ref[...].astype(jnp.float32)                   # (S, 3D) lane-dense
    q = qkv[:, :d] * jnp.float32(scale)                      # scale folded into q
    k = qkv[:, d:2 * d]
    v = qkv[:, 2 * d:3 * d]
    m = mask_ref[0, 0]                                       # (S, S)

    outs = []
    for head in range(h):                                    # static unroll over heads
        lo = head * dk
        qh = q[:, lo:lo + dk]
        kh = k[:, lo:lo + dk]
        vh = v[:, lo:lo + dk]
        # s = q @ k^T  (contraction on the shared dk axis)
        s = jax.lax.dot_general(qh, kh, (((1,), (1,)), ((), ())),
                                preferred_element_type=jnp.float32,
                                precision=_MATMUL_PRECISION)          # (S, S)
        s = jnp.where(m == 0, jnp.float32(-1e9), s)
        s = s - jnp.max(s, axis=-1, keepdims=True)
        p = jnp.exp(s)
        p = p / jnp.sum(p, axis=-1, keepdims=True)                    # exact softmax
        outs.append(jax.lax.dot_general(p, vh, (((1,), (0,)), ((), ())),
                                        preferred_element_type=jnp.float32,
                                        precision=_MATMUL_PRECISION)) # (S, dk)
    o_ref[...] = jnp.concatenate(outs, axis=-1).astype(o_ref.dtype)   # (S, D)


def multi_head_attention(qkv2d, mask, *, B, S, h):
    rows, three_d = qkv2d.shape
    assert rows == B * S and three_d % 3 == 0
    D = three_d // 3
    dk = D // h
    assert mask.shape == (B, 1, S, S)
    assert S % 8 == 0, "sequence length must be a multiple of 8 (sublane tiling)"

    kernel = functools.partial(_mha_kernel, h=h, dk=dk, scale=1.0 / math.sqrt(dk))
    return pl.pallas_call(
        kernel,
        out_shape=jax.ShapeDtypeStruct((B * S, D), qkv2d.dtype),
        grid_spec=pltpu.PrefetchScalarGridSpec(
            num_scalar_prefetch=0,
            grid=(B,),
            in_specs=[
                pl.BlockSpec((S, three_d), lambda b: (b, 0)),
                pl.BlockSpec((1, 1, S, S), lambda b: (b, 0, 0, 0)),
            ],
            out_specs=pl.BlockSpec((S, D), lambda b: (b, 0)),
        ),
        compiler_params=pltpu.CompilerParams(
            dimension_semantics=("parallel",)),
    )(qkv2d, mask)


# ----------------------------------------------------------------------------
# EncoderBlock forward (inference: dropout = identity)
# ----------------------------------------------------------------------------
def encoder_block_forward(x, src_mask, params, *, h, eps=1e-6):
    """x: (B, S, D); src_mask: (B, 1, S, S); weights use (in, out) layout."""
    B, S, D = x.shape
    x2d = x.reshape(B * S, D)

    # --- residual connection 0: x + W_o( MHA( LN1(x) ) ) ---
    qkv = linear(x2d, params["w_qkv"],
                 ln=(params["ln1_alpha"], params["ln1_bias"]), eps=eps)   # (B*S, 3D)
    attn2d = multi_head_attention(qkv, src_mask, B=B, S=S, h=h)           # (B*S, D)
    x1 = linear(attn2d, params["w_o"], residual=x2d)                      # fused residual

    # --- residual connection 1: x + Linear2( ReLU( Linear1( LN2(x) ) ) ) ---
    hidden = linear(x1, params["w_ff1"], bias=params["b_ff1"], apply_relu=True,
                    ln=(params["ln2_alpha"], params["ln2_bias"]), eps=eps)
    x2 = linear(hidden, params["w_ff2"], bias=params["b_ff2"], residual=x1)

    return x2.reshape(B, S, D)


# ----------------------------------------------------------------------------
# Pure-JAX reference (HIGHEST matmul precision) for the self-check
# ----------------------------------------------------------------------------
def _reference(x, mask, params, *, h, eps=1e-6):
    hp = jax.lax.Precision.HIGHEST
    B, S, D = x.shape
    dk = D // h

    def ln(t, a, b):
        mean = jnp.mean(t, axis=-1, keepdims=True)
        std = jnp.sqrt(jnp.sum((t - mean) ** 2, axis=-1, keepdims=True) / (D - 1))
        return a * (t - mean) / (std + eps) + b

    xn = ln(x, params["ln1_alpha"], params["ln1_bias"])
    qkv = jnp.einsum("bsd,de->bse", xn, params["w_qkv"], precision=hp)
    q, k, v = jnp.split(qkv, 3, axis=-1)

    def heads(t):
        return t.reshape(B, S, h, dk).transpose(0, 2, 1, 3)

    qh, kh, vh = heads(q), heads(k), heads(v)
    s = jnp.einsum("bhqd,bhkd->bhqk", qh, kh, precision=hp) / math.sqrt(dk)
    s = jnp.where(mask == 0, -1e9, s)
    a = jax.nn.softmax(s, axis=-1)
    o = jnp.einsum("bhqk,bhkd->bhqd", a, vh, precision=hp)
    o = o.transpose(0, 2, 1, 3).reshape(B, S, D)
    x1 = x + jnp.einsum("bsd,de->bse", o, params["w_o"], precision=hp)

    xn2 = ln(x1, params["ln2_alpha"], params["ln2_bias"])
    hid = jax.nn.relu(
        jnp.einsum("bsd,df->bsf", xn2, params["w_ff1"], precision=hp) + params["b_ff1"])
    x2 = x1 + jnp.einsum("bsf,fd->bsd", hid, params["w_ff2"], precision=hp) + params["b_ff2"]
    return x2


def init_params(key, d_model, d_ff):
    ks = jax.random.split(key, 8)

    def w(k, fan_in, shape):
        return jax.random.normal(k, shape, jnp.float32) / jnp.sqrt(fan_in)

    wq = w(ks[0], d_model, (d_model, d_model))
    wk = w(ks[1], d_model, (d_model, d_model))
    wv = w(ks[2], d_model, (d_model, d_model))
    return dict(
        w_qkv=jnp.concatenate([wq, wk, wv], axis=1),          # (D, 3D)
        w_o=w(ks[3], d_model, (d_model, d_model)),
        w_ff1=w(ks[4], d_model, (d_model, d_ff)),
        b_ff1=0.1 * jax.random.normal(ks[5], (d_ff,), jnp.float32),
        w_ff2=w(ks[6], d_ff, (d_ff, d_model)),
        b_ff2=0.1 * jax.random.normal(ks[7], (d_model,), jnp.float32),
        # LayerNormalization.__init__: alpha = ones, bias = zeros
        ln1_alpha=jnp.ones((d_model,), jnp.float32),
        ln1_bias=jnp.zeros((d_model,), jnp.float32),
        ln2_alpha=jnp.ones((d_model,), jnp.float32),
        ln2_bias=jnp.zeros((d_model,), jnp.float32),
    )


if __name__ == "__main__":
    key = jax.random.PRNGKey(0)
    # Small but lane-dense demo dims (d_model / d_ff multiples of 128).
    B, S, D, H, D_FF = 2, 8, 128, 4, 256

    kx, kp = jax.random.split(key)
    x = jax.random.normal(kx, (B, S, D), dtype=jnp.float32)

    # src padding mask: batch 0 attends to all 8 keys, batch 1 only to first 6.
    valid = jnp.array([8, 6])
    key_pos = jnp.arange(S)
    mask2d = (key_pos[None, :] < valid[:, None]).astype(jnp.float32)   # (B, S)
    src_mask = jnp.broadcast_to(mask2d[:, None, None, :], (B, 1, S, S))

    params = init_params(kp, D, D_FF)

    fwd = jax.jit(functools.partial(encoder_block_forward, h=H, eps=1e-6))
    out = jax.block_until_ready(fwd(x, src_mask, params))

    ref = _reference(x, src_mask, params, h=H, eps=1e-6)
    assert out.shape == (B, S, D)
    assert bool(jnp.all(jnp.isfinite(out)))
    max_err = float(jnp.max(jnp.abs(out - ref)))
    # With exact reciprocals and HIGHEST-precision MXU passes the observed
    # error is ~1e-5; the 2e-2 tolerance is a backstop for compiler versions
    # that ignore the precision request and run f32 matmuls as bf16 passes.
    assert jnp.allclose(out, ref, atol=2e-2, rtol=2e-2), f"max abs err {max_err}"

    print("KERNEL_OK")
</pallas_src>

<mosaic_0001>
module attributes {stable_mosaic.version = 11 : i64} {
  func.func @_linear_nk1_kernel(%arg0: i32, %arg1: i32, %arg2: memref<16x128xf32, #tpu.memory_space<vmem>>, %arg3: memref<1x128xf32, #tpu.memory_space<vmem>>, %arg4: memref<1x128xf32, #tpu.memory_space<vmem>>, %arg5: memref<128x384xf32, #tpu.memory_space<vmem>>, %arg6: memref<16x384xf32, #tpu.memory_space<vmem>>) attributes {dimension_semantics = [#tpu.dimension_semantics<parallel>, #tpu.dimension_semantics<parallel>], iteration_bounds = array<i64: 1, 1>, scalar_prefetch = 0 : i64, scratch_operands = 0 : i64, tpu.core_type = #tpu.core_type<tc>, window_params = [{transform_indices = @transform_0, window_bounds = array<i64: 16, 128>}, {pipeline_mode = #tpu.pipeline_mode<synchronous>, transform_indices = @transform_1, window_bounds = array<i64: 1, 128>}, {pipeline_mode = #tpu.pipeline_mode<synchronous>, transform_indices = @transform_2, window_bounds = array<i64: 1, 128>}, {transform_indices = @transform_3, window_bounds = array<i64: 128, 384>}, {transform_indices = @transform_4, window_bounds = array<i64: 16, 384>}]} {
    %c0 = arith.constant 0 : index
    %c0_0 = arith.constant 0 : index
    %0 = vector.load %arg2[%c0, %c0_0] : memref<16x128xf32, #tpu.memory_space<vmem>>, vector<16x128xf32>
    %cst = arith.constant dense<0.000000e+00> : vector<16xf32>
    %1 = vector.multi_reduction <add>, %0, %cst [1] : vector<16x128xf32> to vector<16xf32>
    %2 = vector.shape_cast %1 : vector<16xf32> to vector<16x1xf32>
    %cst_1 = arith.constant 1.280000e+02 : f32
    %3 = vector.broadcast %cst_1 : f32 to vector<16x1xf32>
    %4 = arith.divf %2, %3 : vector<16x1xf32>
    %5 = vector.broadcast %4 : vector<16x1xf32> to vector<16x128xf32>
    %6 = arith.subf %0, %5 : vector<16x128xf32>
    %7 = arith.mulf %6, %6 : vector<16x128xf32>
    %cst_2 = arith.constant dense<0.000000e+00> : vector<16xf32>
    %8 = vector.multi_reduction <add>, %7, %cst_2 [1] : vector<16x128xf32> to vector<16xf32>
    %9 = vector.shape_cast %8 : vector<16xf32> to vector<16x1xf32>
    %cst_3 = arith.constant 0.00787401571 : f32
    %10 = vector.broadcast %cst_3 : f32 to vector<16x1xf32>
    %11 = arith.mulf %9, %10 : vector<16x1xf32>
    %12 = math.sqrt %11 : vector<16x1xf32>
    %cst_4 = arith.constant 9.99999997E-7 : f32
    %13 = vector.broadcast %cst_4 : f32 to vector<16x1xf32>
    %14 = arith.addf %12, %13 : vector<16x1xf32>
    %cst_5 = arith.constant 1.000000e+00 : f32
    %15 = vector.broadcast %cst_5 : f32 to vector<16x1xf32>
    %16 = arith.divf %15, %14 : vector<16x1xf32>
    %c0_6 = arith.constant 0 : index
    %c0_7 = arith.constant 0 : index
    %17 = vector.load %arg3[%c0_6, %c0_7] : memref<1x128xf32, #tpu.memory_space<vmem>>, vector<1x128xf32>
    %18 = vector.broadcast %16 : vector<16x1xf32> to vector<16x128xf32>
    %19 = arith.mulf %6, %18 : vector<16x128xf32>
    %20 = vector.broadcast %17 : vector<1x128xf32> to vector<16x128xf32>
    %21 = arith.mulf %20, %19 : vector<16x128xf32>
    %c0_8 = arith.constant 0 : index
    %c0_9 = arith.constant 0 : index
    %22 = vector.load %arg4[%c0_8, %c0_9] : memref<1x128xf32, #tpu.memory_space<vmem>>, vector<1x128xf32>
    %23 = vector.broadcast %22 : vector<1x128xf32> to vector<16x128xf32>
    %24 = arith.addf %21, %23 : vector<16x128xf32>
    %c0_10 = arith.constant 0 : index
    %c0_11 = arith.constant 0 : index
    %25 = vector.load %arg5[%c0_10, %c0_11] : memref<128x384xf32, #tpu.memory_space<vmem>>, vector<128x384xf32>
    %cst_12 = arith.constant dense<0.000000e+00> : vector<16x384xf32>
    %26 = tpu.matmul %24, %25, %cst_12 {dimension_numbers = #tpu.dot_dimension_numbers<[1], [0], [0], [1], [0, 0, 1, 1], [], []>, precision = #tpu.contract_precision<fp32>} : vector<16x128xf32>, vector<128x384xf32>, vector<16x384xf32> -> vector<16x384xf32>
    %c0_13 = arith.constant 0 : index
    %c0_14 = arith.constant 0 : index
    %27 = vector.load %arg6[%c0_13, %c0_14] : memref<16x384xf32, #tpu.memory_space<vmem>>, vector<16x384xf32>
    tpu.vector_store %arg6[%c0_13, %c0_14], %26 {strides = array<i32>} : memref<16x384xf32, #tpu.memory_space<vmem>>, vector<16x384xf32>,
    return
  }
  func.func @transform_0(%arg0: i32, %arg1: i32) -> (i32, i32) {
    %c0_i32 = arith.constant 0 : i32
    %c0_i32_0 = arith.constant 0 : i32
    return %arg0, %c0_i32 : i32, i32
  }
  func.func @transform_1(%arg0: i32, %arg1: i32) -> (i32, i32) {
    %c0_i32 = arith.constant 0 : i32
    %c0_i32_0 = arith.constant 0 : i32
    %c0_i32_1 = arith.constant 0 : i32
    return %c0_i32, %c0_i32_0 : i32, i32
  }
  func.func @transform_2(%arg0: i32, %arg1: i32) -> (i32, i32) {
    %c0_i32 = arith.constant 0 : i32
    %c0_i32_0 = arith.constant 0 : i32
    %c0_i32_1 = arith.constant 0 : i32
    return %c0_i32, %c0_i32_0 : i32, i32
  }
  func.func @transform_3(%arg0: i32, %arg1: i32) -> (i32, i32) {
    %c0_i32 = arith.constant 0 : i32
    %c0_i32_0 = arith.constant 0 : i32
    return %c0_i32, %arg1 : i32, i32
  }
  func.func @transform_4(%arg0: i32, %arg1: i32) -> (i32, i32) {
    %c0_i32 = arith.constant 0 : i32
    return %arg0, %arg1 : i32, i32
  }
}

module attributes {stable_mosaic.version = 11 : i64} {
  func.func @_linear_nk1_kernel(%arg0: i32, %arg1: i32, %arg2: memref<16x128xf32, #tpu.memory_space<vmem>>, %arg3: memref<128x128xf32, #tpu.memory_space<vmem>>, %arg4: memref<16x128xf32, #tpu.memory_space<vmem>>, %arg5: memref<16x128xf32, #tpu.memory_space<vmem>>) attributes {dimension_semantics = [#tpu.dimension_semantics<parallel>, #tpu.dimension_semantics<parallel>], iteration_bounds = array<i64: 1, 1>, scalar_prefetch = 0 : i64, scratch_operands = 0 : i64, tpu.core_type = #tpu.core_type<tc>, window_params = [{transform_indices = @transform_0, window_bounds = array<i64: 16, 128>}, {transform_indices = @transform_1, window_bounds = array<i64: 128, 128>}, {transform_indices = @transform_2, window_bounds = array<i64: 16, 128>}, {transform_indices = @transform_3, window_bounds = array<i64: 16, 128>}]} {
    %c0 = arith.constant 0 : index
    %c0_0 = arith.constant 0 : index
    %0 = vector.load %arg2[%c0, %c0_0] : memref<16x128xf32, #tpu.memory_space<vmem>>, vector<16x128xf32>
    %c0_1 = arith.constant 0 : index
    %c0_2 = arith.constant 0 : index
    %1 = vector.load %arg3[%c0_1, %c0_2] : memref<128x128xf32, #tpu.memory_space<vmem>>, vector<128x128xf32>
    %cst = arith.constant dense<0.000000e+00> : vector<16x128xf32>
    %2 = tpu.matmul %0, %1, %cst {dimension_numbers = #tpu.dot_dimension_numbers<[1], [0], [0], [1], [0, 0, 1, 1], [], []>, precision = #tpu.contract_precision<fp32>} : vector<16x128xf32>, vector<128x128xf32>, vector<16x128xf32> -> vector<16x128xf32>
    %c0_3 = arith.constant 0 : index
    %c0_4 = arith.constant 0 : index
    %3 = vector.load %arg4[%c0_3, %c0_4] : memref<16x128xf32, #tpu.memory_space<vmem>>, vector<16x128xf32>
    %4 = arith.addf %2, %3 : vector<16x128xf32>
    %c0_5 = arith.constant 0 : index
    %c0_6 = arith.constant 0 : index
    %5 = vector.load %arg5[%c0_5, %c0_6] : memref<16x128xf32, #tpu.memory_space<vmem>>, vector<16x128xf32>
    tpu.vector_store %arg5[%c0_5, %c0_6], %4 {strides = array<i32>} : memref<16x128xf32, #tpu.memory_space<vmem>>, vector<16x128xf32>,
    return
  }
  func.func @transform_0(%arg0: i32, %arg1: i32) -> (i32, i32) {
    %c0_i32 = arith.constant 0 : i32
    %c0_i32_0 = arith.constant 0 : i32
    return %arg0, %c0_i32 : i32, i32
  }
  func.func @transform_1(%arg0: i32, %arg1: i32) -> (i32, i32) {
    %c0_i32 = arith.constant 0 : i32
    %c0_i32_0 = arith.constant 0 : i32
    return %c0_i32, %arg1 : i32, i32
  }
  func.func @transform_2(%arg0: i32, %arg1: i32) -> (i32, i32) {
    %c0_i32 = arith.constant 0 : i32
    return %arg0, %arg1 : i32, i32
  }
  func.func @transform_3(%arg0: i32, %arg1: i32) -> (i32, i32) {
    %c0_i32 = arith.constant 0 : i32
    return %arg0, %arg1 : i32, i32
  }
}

module attributes {stable_mosaic.version = 11 : i64} {
  func.func @_linear_nk1_kernel(%arg0: i32, %arg1: i32, %arg2: memref<16x128xf32, #tpu.memory_space<vmem>>, %arg3: memref<1x128xf32, #tpu.memory_space<vmem>>, %arg4: memref<1x128xf32, #tpu.memory_space<vmem>>, %arg5: memref<128x256xf32, #tpu.memory_space<vmem>>, %arg6: memref<1x256xf32, #tpu.memory_space<vmem>>, %arg7: memref<16x256xf32, #tpu.memory_space<vmem>>) attributes {dimension_semantics = [#tpu.dimension_semantics<parallel>, #tpu.dimension_semantics<parallel>], iteration_bounds = array<i64: 1, 1>, scalar_prefetch = 0 : i64, scratch_operands = 0 : i64, tpu.core_type = #tpu.core_type<tc>, window_params = [{transform_indices = @transform_0, window_bounds = array<i64: 16, 128>}, {pipeline_mode = #tpu.pipeline_mode<synchronous>, transform_indices = @transform_1, window_bounds = array<i64: 1, 128>}, {pipeline_mode = #tpu.pipeline_mode<synchronous>, transform_indices = @transform_2, window_bounds = array<i64: 1, 128>}, {transform_indices = @transform_3, window_bounds = array<i64: 128, 256>}, {transform_indices = @transform_4, window_bounds = array<i64: 1, 256>}, {transform_indices = @transform_5, window_bounds = array<i64: 16, 256>}]} {
    %c0 = arith.constant 0 : index
    %c0_0 = arith.constant 0 : index
    %0 = vector.load %arg2[%c0, %c0_0] : memref<16x128xf32, #tpu.memory_space<vmem>>, vector<16x128xf32>
    %cst = arith.constant dense<0.000000e+00> : vector<16xf32>
    %1 = vector.multi_reduction <add>, %0, %cst [1] : vector<16x128xf32> to vector<16xf32>
    %2 = vector.shape_cast %1 : vector<16xf32> to vector<16x1xf32>
    %cst_1 = arith.constant 1.280000e+02 : f32
    %3 = vector.broadcast %cst_1 : f32 to vector<16x1xf32>
    %4 = arith.divf %2, %3 : vector<16x1xf32>
    %5 = vector.broadcast %4 : vector<16x1xf32> to vector<16x128xf32>
    %6 = arith.subf %0, %5 : vector<16x128xf32>
    %7 = arith.mulf %6, %6 : vector<16x128xf32>
    %cst_2 = arith.constant dense<0.000000e+00> : vector<16xf32>
    %8 = vector.multi_reduction <add>, %7, %cst_2 [1] : vector<16x128xf32> to vector<16xf32>
    %9 = vector.shape_cast %8 : vector<16xf32> to vector<16x1xf32>
    %cst_3 = arith.constant 0.00787401571 : f32
    %10 = vector.broadcast %cst_3 : f32 to vector<16x1xf32>
    %11 = arith.mulf %9, %10 : vector<16x1xf32>
    %12 = math.sqrt %11 : vector<16x1xf32>
    %cst_4 = arith.constant 9.99999997E-7 : f32
    %13 = vector.broadcast %cst_4 : f32 to vector<16x1xf32>
    %14 = arith.addf %12, %13 : vector<16x1xf32>
    %cst_5 = arith.constant 1.000000e+00 : f32
    %15 = vector.broadcast %cst_5 : f32 to vector<16x1xf32>
    %16 = arith.divf %15, %14 : vector<16x1xf32>
    %c0_6 = arith.constant 0 : index
    %c0_7 = arith.constant 0 : index
    %17 = vector.load %arg3[%c0_6, %c0_7] : memref<1x128xf32, #tpu.memory_space<vmem>>, vector<1x128xf32>
    %18 = vector.broadcast %16 : vector<16x1xf32> to vector<16x128xf32>
    %19 = arith.mulf %6, %18 : vector<16x128xf32>
    %20 = vector.broadcast %17 : vector<1x128xf32> to vector<16x128xf32>
    %21 = arith.mulf %20, %19 : vector<16x128xf32>
    %c0_8 = arith.constant 0 : index
    %c0_9 = arith.constant 0 : index
    %22 = vector.load %arg4[%c0_8, %c0_9] : memref<1x128xf32, #tpu.memory_space<vmem>>, vector<1x128xf32>
    %23 = vector.broadcast %22 : vector<1x128xf32> to vector<16x128xf32>
    %24 = arith.addf %21, %23 : vector<16x128xf32>
    %c0_10 = arith.constant 0 : index
    %c0_11 = arith.constant 0 : index
    %25 = vector.load %arg5[%c0_10, %c0_11] : memref<128x256xf32, #tpu.memory_space<vmem>>, vector<128x256xf32>
    %cst_12 = arith.constant dense<0.000000e+00> : vector<16x256xf32>
    %26 = tpu.matmul %24, %25, %cst_12 {dimension_numbers = #tpu.dot_dimension_numbers<[1], [0], [0], [1], [0, 0, 1, 1], [], []>, precision = #tpu.contract_precision<fp32>} : vector<16x128xf32>, vector<128x256xf32>, vector<16x256xf32> -> vector<16x256xf32>
    %c0_13 = arith.constant 0 : index
    %c0_14 = arith.constant 0 : index
    %27 = vector.load %arg6[%c0_13, %c0_14] : memref<1x256xf32, #tpu.memory_space<vmem>>, vector<1x256xf32>
    %28 = vector.broadcast %27 : vector<1x256xf32> to vector<16x256xf32>
    %29 = arith.addf %26, %28 : vector<16x256xf32>
    %cst_15 = arith.constant 0.000000e+00 : f32
    %30 = vector.broadcast %cst_15 : f32 to vector<16x256xf32>
    %31 = arith.maximumf %29, %30 : vector<16x256xf32>
    %c0_16 = arith.constant 0 : index
    %c0_17 = arith.constant 0 : index
    %32 = vector.load %arg7[%c0_16, %c0_17] : memref<16x256xf32, #tpu.memory_space<vmem>>, vector<16x256xf32>
    tpu.vector_store %arg7[%c0_16, %c0_17], %31 {strides = array<i32>} : memref<16x256xf32, #tpu.memory_space<vmem>>, vector<16x256xf32>,
    return
  }
  func.func @transform_0(%arg0: i32, %arg1: i32) -> (i32, i32) {
    %c0_i32 = arith.constant 0 : i32
    %c0_i32_0 = arith.constant 0 : i32
    return %arg0, %c0_i32 : i32, i32
  }
  func.func @transform_1(%arg0: i32, %arg1: i32) -> (i32, i32) {
    %c0_i32 = arith.constant 0 : i32
    %c0_i32_0 = arith.constant 0 : i32
    %c0_i32_1 = arith.constant 0 : i32
    return %c0_i32, %c0_i32_0 : i32, i32
  }
  func.func @transform_2(%arg0: i32, %arg1: i32) -> (i32, i32) {
    %c0_i32 = arith.constant 0 : i32
    %c0_i32_0 = arith.constant 0 : i32
    %c0_i32_1 = arith.constant 0 : i32
    return %c0_i32, %c0_i32_0 : i32, i32
  }
  func.func @transform_3(%arg0: i32, %arg1: i32) -> (i32, i32) {
    %c0_i32 = arith.constant 0 : i32
    %c0_i32_0 = arith.constant 0 : i32
    return %c0_i32, %arg1 : i32, i32
  }
  func.func @transform_4(%arg0: i32, %arg1: i32) -> (i32, i32) {
    %c0_i32 = arith.constant 0 : i32
    %c0_i32_0 = arith.constant 0 : i32
    return %c0_i32, %arg1 : i32, i32
  }
  func.func @transform_5(%arg0: i32, %arg1: i32) -> (i32, i32) {
    %c0_i32 = arith.constant 0 : i32
    return %arg0, %arg1 : i32, i32
  }
}

module attributes {stable_mosaic.version = 11 : i64} {
  func.func @_mha_kernel(%arg0: i32, %arg1: memref<8x384xf32, #tpu.memory_space<vmem>>, %arg2: memref<1x1x8x8xf32, #tpu.memory_space<vmem>>, %arg3: memref<8x128xf32, #tpu.memory_space<vmem>>) attributes {dimension_semantics = [#tpu.dimension_semantics<parallel>], iteration_bounds = array<i64: 2>, scalar_prefetch = 0 : i64, scratch_operands = 0 : i64, tpu.core_type = #tpu.core_type<tc>, window_params = [{transform_indices = @transform_0, window_bounds = array<i64: 8, 384>}, {transform_indices = @transform_1, window_bounds = array<i64: 1, 1, 8, 8>}, {transform_indices = @transform_2, window_bounds = array<i64: 8, 128>}]} {
    %c0 = arith.constant 0 : index
    %c0_0 = arith.constant 0 : index
    %0 = vector.load %arg1[%c0, %c0_0] : memref<8x384xf32, #tpu.memory_space<vmem>>, vector<8x384xf32>
    %1 = vector.extract_strided_slice %0 {offsets = [0, 0], sizes = [8, 128], strides = [1, 1]} : vector<8x384xf32> to vector<8x128xf32>
    %cst = arith.constant 0.176776692 : f32
    %2 = vector.broadcast %cst : f32 to vector<8x128xf32>
    %3 = arith.mulf %1, %2 : vector<8x128xf32>
    %4 = vector.extract_strided_slice %0 {offsets = [0, 128], sizes = [8, 128], strides = [1, 1]} : vector<8x384xf32> to vector<8x128xf32>
    %5 = vector.extract_strided_slice %0 {offsets = [0, 256], sizes = [8, 128], strides = [1, 1]} : vector<8x384xf32> to vector<8x128xf32>
    %c0_1 = arith.constant 0 : index
    %c0_2 = arith.constant 0 : index
    %c0_3 = arith.constant 0 : index
    %c0_4 = arith.constant 0 : index
    %6 = vector.load %arg2[%c0_1, %c0_2, %c0_3, %c0_4] : memref<1x1x8x8xf32, #tpu.memory_space<vmem>>, vector<1x1x8x8xf32>
    %7 = vector.shape_cast %6 : vector<1x1x8x8xf32> to vector<8x8xf32>
    %8 = vector.extract_strided_slice %3 {offsets = [0, 0], sizes = [8, 32], strides = [1, 1]} : vector<8x128xf32> to vector<8x32xf32>
    %9 = vector.extract_strided_slice %4 {offsets = [0, 0], sizes = [8, 32], strides = [1, 1]} : vector<8x128xf32> to vector<8x32xf32>
    %10 = vector.extract_strided_slice %5 {offsets = [0, 0], sizes = [8, 32], strides = [1, 1]} : vector<8x128xf32> to vector<8x32xf32>
    %cst_5 = arith.constant dense<0.000000e+00> : vector<8x8xf32>
    %11 = tpu.matmul %8, %9, %cst_5 {dimension_numbers = #tpu.dot_dimension_numbers<[1], [1], [0], [0], [0, 0, 1, 0], [], []>, precision = #tpu.contract_precision<fp32>} : vector<8x32xf32>, vector<8x32xf32>, vector<8x8xf32> -> vector<8x8xf32>
    %cst_6 = arith.constant 0.000000e+00 : f32
    %12 = vector.broadcast %cst_6 : f32 to vector<8x8xf32>
    %13 = arith.cmpf oeq, %7, %12 : vector<8x8xf32>
    %cst_7 = arith.constant -1.000000e+09 : f32
    %14 = vector.broadcast %cst_7 : f32 to vector<8x8xf32>
    %15 = arith.select %13, %14, %11 : vector<8x8xi1>, vector<8x8xf32>
    %cst_8 = arith.constant dense<0xFF800000> : vector<8xf32>
    %16 = vector.multi_reduction <maximumf>, %15, %cst_8 [1] : vector<8x8xf32> to vector<8xf32>
    %17 = vector.shape_cast %16 : vector<8xf32> to vector<8x1xf32>
    %18 = vector.broadcast %17 : vector<8x1xf32> to vector<8x8xf32>
    %19 = arith.subf %15, %18 : vector<8x8xf32>
    %20 = math.exp %19 : vector<8x8xf32>
    %cst_9 = arith.constant dense<0.000000e+00> : vector<8xf32>
    %21 = vector.multi_reduction <add>, %20, %cst_9 [1] : vector<8x8xf32> to vector<8xf32>
    %22 = vector.shape_cast %21 : vector<8xf32> to vector<8x1xf32>
    %23 = vector.broadcast %22 : vector<8x1xf32> to vector<8x8xf32>
    %24 = arith.divf %20, %23 : vector<8x8xf32>
    %cst_10 = arith.constant dense<0.000000e+00> : vector<8x32xf32>
    %25 = tpu.matmul %24, %10, %cst_10 {dimension_numbers = #tpu.dot_dimension_numbers<[1], [0], [0], [1], [0, 0, 1, 1], [], []>, precision = #tpu.contract_precision<fp32>} : vector<8x8xf32>, vector<8x32xf32>, vector<8x32xf32> -> vector<8x32xf32>
    %26 = vector.extract_strided_slice %3 {offsets = [0, 32], sizes = [8, 32], strides = [1, 1]} : vector<8x128xf32> to vector<8x32xf32>
    %27 = vector.extract_strided_slice %4 {offsets = [0, 32], sizes = [8, 32], strides = [1, 1]} : vector<8x128xf32> to vector<8x32xf32>
    %28 = vector.extract_strided_slice %5 {offsets = [0, 32], sizes = [8, 32], strides = [1, 1]} : vector<8x128xf32> to vector<8x32xf32>
    %cst_11 = arith.constant dense<0.000000e+00> : vector<8x8xf32>
    %29 = tpu.matmul %26, %27, %cst_11 {dimension_numbers = #tpu.dot_dimension_numbers<[1], [1], [0], [0], [0, 0, 1, 0], [], []>, precision = #tpu.contract_precision<fp32>} : vector<8x32xf32>, vector<8x32xf32>, vector<8x8xf32> -> vector<8x8xf32>
    %cst_12 = arith.constant 0.000000e+00 : f32
    %30 = vector.broadcast %cst_12 : f32 to vector<8x8xf32>
    %31 = arith.cmpf oeq, %7, %30 : vector<8x8xf32>
    %cst_13 = arith.constant -1.000000e+09 : f32
    %32 = vector.broadcast %cst_13 : f32 to vector<8x8xf32>
    %33 = arith.select %31, %32, %29 : vector<8x8xi1>, vector<8x8xf32>
    %cst_14 = arith.constant dense<0xFF800000> : vector<8xf32>
    %34 = vector.multi_reduction <maximumf>, %33, %cst_14 [1] : vector<8x8xf32> to vector<8xf32>
    %35 = vector.shape_cast %34 : vector<8xf32> to vector<8x1xf32>
    %36 = vector.broadcast %35 : vector<8x1xf32> to vector<8x8xf32>
    %37 = arith.subf %33, %36 : vector<8x8xf32>
    %38 = math.exp %37 : vector<8x8xf32>
    %cst_15 = arith.constant dense<0.000000e+00> : vector<8xf32>
    %39 = vector.multi_reduction <add>, %38, %cst_15 [1] : vector<8x8xf32> to vector<8xf32>
    %40 = vector.shape_cast %39 : vector<8xf32> to vector<8x1xf32>
    %41 = vector.broadcast %40 : vector<8x1xf32> to vector<8x8xf32>
    %42 = arith.divf %38, %41 : vector<8x8xf32>
    %cst_16 = arith.constant dense<0.000000e+00> : vector<8x32xf32>
    %43 = tpu.matmul %42, %28, %cst_16 {dimension_numbers = #tpu.dot_dimension_numbers<[1], [0], [0], [1], [0, 0, 1, 1], [], []>, precision = #tpu.contract_precision<fp32>} : vector<8x8xf32>, vector<8x32xf32>, vector<8x32xf32> -> vector<8x32xf32>
    %44 = vector.extract_strided_slice %3 {offsets = [0, 64], sizes = [8, 32], strides = [1, 1]} : vector<8x128xf32> to vector<8x32xf32>
    %45 = vector.extract_strided_slice %4 {offsets = [0, 64], sizes = [8, 32], strides = [1, 1]} : vector<8x128xf32> to vector<8x32xf32>
    %46 = vector.extract_strided_slice %5 {offsets = [0, 64], sizes = [8, 32], strides = [1, 1]} : vector<8x128xf32> to vector<8x32xf32>
    %cst_17 = arith.constant dense<0.000000e+00> : vector<8x8xf32>
    %47 = tpu.matmul %44, %45, %cst_17 {dimension_numbers = #tpu.dot_dimension_numbers<[1], [1], [0], [0], [0, 0, 1, 0], [], []>, precision = #tpu.contract_precision<fp32>} : vector<8x32xf32>, vector<8x32xf32>, vector<8x8xf32> -> vector<8x8xf32>
    %cst_18 = arith.constant 0.000000e+00 : f32
    %48 = vector.broadcast %cst_18 : f32 to vector<8x8xf32>
    %49 = arith.cmpf oeq, %7, %48 : vector<8x8xf32>
    %cst_19 = arith.constant -1.000000e+09 : f32
    %50 = vector.broadcast %cst_19 : f32 to vector<8x8xf32>
    %51 = arith.select %49, %50, %47 : vector<8x8xi1>, vector<8x8xf32>
    %cst_20 = arith.constant dense<0xFF800000> : vector<8xf32>
    %52 = vector.multi_reduction <maximumf>, %51, %cst_20 [1] : vector<8x8xf32> to vector<8xf32>
    %53 = vector.shape_cast %52 : vector<8xf32> to vector<8x1xf32>
    %54 = vector.broadcast %53 : vector<8x1xf32> to vector<8x8xf32>
    %55 = arith.subf %51, %54 : vector<8x8xf32>
    %56 = math.exp %55 : vector<8x8xf32>
    %cst_21 = arith.constant dense<0.000000e+00> : vector<8xf32>
    %57 = vector.multi_reduction <add>, %56, %cst_21 [1] : vector<8x8xf32> to vector<8xf32>
    %58 = vector.shape_cast %57 : vector<8xf32> to vector<8x1xf32>
    %59 = vector.broadcast %58 : vector<8x1xf32> to vector<8x8xf32>
    %60 = arith.divf %56, %59 : vector<8x8xf32>
    %cst_22 = arith.constant dense<0.000000e+00> : vector<8x32xf32>
    %61 = tpu.matmul %60, %46, %cst_22 {dimension_numbers = #tpu.dot_dimension_numbers<[1], [0], [0], [1], [0, 0, 1, 1], [], []>, precision = #tpu.contract_precision<fp32>} : vector<8x8xf32>, vector<8x32xf32>, vector<8x32xf32> -> vector<8x32xf32>
    %62 = vector.extract_strided_slice %3 {offsets = [0, 96], sizes = [8, 32], strides = [1, 1]} : vector<8x128xf32> to vector<8x32xf32>
    %63 = vector.extract_strided_slice %4 {offsets = [0, 96], sizes = [8, 32], strides = [1, 1]} : vector<8x128xf32> to vector<8x32xf32>
    %64 = vector.extract_strided_slice %5 {offsets = [0, 96], sizes = [8, 32], strides = [1, 1]} : vector<8x128xf32> to vector<8x32xf32>
    %cst_23 = arith.constant dense<0.000000e+00> : vector<8x8xf32>
    %65 = tpu.matmul %62, %63, %cst_23 {dimension_numbers = #tpu.dot_dimension_numbers<[1], [1], [0], [0], [0, 0, 1, 0], [], []>, precision = #tpu.contract_precision<fp32>} : vector<8x32xf32>, vector<8x32xf32>, vector<8x8xf32> -> vector<8x8xf32>
    %cst_24 = arith.constant 0.000000e+00 : f32
    %66 = vector.broadcast %cst_24 : f32 to vector<8x8xf32>
    %67 = arith.cmpf oeq, %7, %66 : vector<8x8xf32>
    %cst_25 = arith.constant -1.000000e+09 : f32
    %68 = vector.broadcast %cst_25 : f32 to vector<8x8xf32>
    %69 = arith.select %67, %68, %65 : vector<8x8xi1>, vector<8x8xf32>
    %cst_26 = arith.constant dense<0xFF800000> : vector<8xf32>
    %70 = vector.multi_reduction <maximumf>, %69, %cst_26 [1] : vector<8x8xf32> to vector<8xf32>
    %71 = vector.shape_cast %70 : vector<8xf32> to vector<8x1xf32>
    %72 = vector.broadcast %71 : vector<8x1xf32> to vector<8x8xf32>
    %73 = arith.subf %69, %72 : vector<8x8xf32>
    %74 = math.exp %73 : vector<8x8xf32>
    %cst_27 = arith.constant dense<0.000000e+00> : vector<8xf32>
    %75 = vector.multi_reduction <add>, %74, %cst_27 [1] : vector<8x8xf32> to vector<8xf32>
    %76 = vector.shape_cast %75 : vector<8xf32> to vector<8x1xf32>
    %77 = vector.broadcast %76 : vector<8x1xf32> to vector<8x8xf32>
    %78 = arith.divf %74, %77 : vector<8x8xf32>
    %cst_28 = arith.constant dense<0.000000e+00> : vector<8x32xf32>
    %79 = tpu.matmul %78, %64, %cst_28 {dimension_numbers = #tpu.dot_dimension_numbers<[1], [0], [0], [1], [0, 0, 1, 1], [], []>, precision = #tpu.contract_precision<fp32>} : vector<8x8xf32>, vector<8x32xf32>, vector<8x32xf32> -> vector<8x32xf32>
    %80 = tpu.concatenate %25, %43, %61, %79 in 1 : vector<8x32xf32>, vector<8x32xf32>, vector<8x32xf32>, vector<8x32xf32> -> vector<8x128xf32>
    %c0_29 = arith.constant 0 : index
    %c0_30 = arith.constant 0 : index
    %81 = vector.load %arg3[%c0_29, %c0_30] : memref<8x128xf32, #tpu.memory_space<vmem>>, vector<8x128xf32>
    tpu.vector_store %arg3[%c0_29, %c0_30], %80 {strides = array<i32>} : memref<8x128xf32, #tpu.memory_space<vmem>>, vector<8x128xf32>,
    return
  }
  func.func @transform_0(%arg0: i32) -> (i32, i32) {
    %c0_i32 = arith.constant 0 : i32
    %c0_i32_0 = arith.constant 0 : i32
    return %arg0, %c0_i32 : i32, i32
  }
  func.func @transform_1(%arg0: i32) -> (i32, i32, i32, i32) {
    %c0_i32 = arith.constant 0 : i32
    %c0_i32_0 = arith.constant 0 : i32
    %c0_i32_1 = arith.constant 0 : i32
    %c0_i32_2 = arith.constant 0 : i32
    return %arg0, %c0_i32, %c0_i32_0, %c0_i32_1 : i32, i32, i32, i32
  }
  func.func @transform_2(%arg0: i32) -> (i32, i32) {
    %c0_i32 = arith.constant 0 : i32
    %c0_i32_0 = arith.constant 0 : i32
    return %arg0, %c0_i32 : i32, i32
  }
}

module attributes {stable_mosaic.version = 11 : i64} {
  func.func @_linear_nk1_kernel(%arg0: i32, %arg1: i32, %arg2: memref<16x256xf32, #tpu.memory_space<vmem>>, %arg3: memref<256x128xf32, #tpu.memory_space<vmem>>, %arg4: memref<1x128xf32, #tpu.memory_space<vmem>>, %arg5: memref<16x128xf32, #tpu.memory_space<vmem>>, %arg6: memref<16x128xf32, #tpu.memory_space<vmem>>) attributes {dimension_semantics = [#tpu.dimension_semantics<parallel>, #tpu.dimension_semantics<parallel>], iteration_bounds = array<i64: 1, 1>, scalar_prefetch = 0 : i64, scratch_operands = 0 : i64, tpu.core_type = #tpu.core_type<tc>, window_params = [{transform_indices = @transform_0, window_bounds = array<i64: 16, 256>}, {transform_indices = @transform_1, window_bounds = array<i64: 256, 128>}, {transform_indices = @transform_2, window_bounds = array<i64: 1, 128>}, {transform_indices = @transform_3, window_bounds = array<i64: 16, 128>}, {transform_indices = @transform_4, window_bounds = array<i64: 16, 128>}]} {
    %c0 = arith.constant 0 : index
    %c0_0 = arith.constant 0 : index
    %0 = vector.load %arg2[%c0, %c0_0] : memref<16x256xf32, #tpu.memory_space<vmem>>, vector<16x256xf32>
    %c0_1 = arith.constant 0 : index
    %c0_2 = arith.constant 0 : index
    %1 = vector.load %arg3[%c0_1, %c0_2] : memref<256x128xf32, #tpu.memory_space<vmem>>, vector<256x128xf32>
    %cst = arith.constant dense<0.000000e+00> : vector<16x128xf32>
    %2 = tpu.matmul %0, %1, %cst {dimension_numbers = #tpu.dot_dimension_numbers<[1], [0], [0], [1], [0, 0, 1, 1], [], []>, precision = #tpu.contract_precision<fp32>} : vector<16x256xf32>, vector<256x128xf32>, vector<16x128xf32> -> vector<16x128xf32>
    %c0_3 = arith.constant 0 : index
    %c0_4 = arith.constant 0 : index
    %3 = vector.load %arg4[%c0_3, %c0_4] : memref<1x128xf32, #tpu.memory_space<vmem>>, vector<1x128xf32>
    %4 = vector.broadcast %3 : vector<1x128xf32> to vector<16x128xf32>
    %5 = arith.addf %2, %4 : vector<16x128xf32>
    %c0_5 = arith.constant 0 : index
    %c0_6 = arith.constant 0 : index
    %6 = vector.load %arg5[%c0_5, %c0_6] : memref<16x128xf32, #tpu.memory_space<vmem>>, vector<16x128xf32>
    %7 = arith.addf %5, %6 : vector<16x128xf32>
    %c0_7 = arith.constant 0 : index
    %c0_8 = arith.constant 0 : index
    %8 = vector.load %arg6[%c0_7, %c0_8] : memref<16x128xf32, #tpu.memory_space<vmem>>, vector<16x128xf32>
    tpu.vector_store %arg6[%c0_7, %c0_8], %7 {strides = array<i32>} : memref<16x128xf32, #tpu.memory_space<vmem>>, vector<16x128xf32>,
    return
  }
  func.func @transform_0(%arg0: i32, %arg1: i32) -> (i32, i32) {
    %c0_i32 = arith.constant 0 : i32
    %c0_i32_0 = arith.constant 0 : i32
    return %arg0, %c0_i32 : i32, i32
  }
  func.func @transform_1(%arg0: i32, %arg1: i32) -> (i32, i32) {
    %c0_i32 = arith.constant 0 : i32
    %c0_i32_0 = arith.constant 0 : i32
    return %c0_i32, %arg1 : i32, i32
  }
  func.func @transform_2(%arg0: i32, %arg1: i32) -> (i32, i32) {
    %c0_i32 = arith.constant 0 : i32
    %c0_i32_0 = arith.constant 0 : i32
    return %c0_i32, %arg1 : i32, i32
  }
  func.func @transform_3(%arg0: i32, %arg1: i32) -> (i32, i32) {
    %c0_i32 = arith.constant 0 : i32
    return %arg0, %arg1 : i32, i32
  }
  func.func @transform_4(%arg0: i32, %arg1: i32) -> (i32, i32) {
    %c0_i32 = arith.constant 0 : i32
    return %arg0, %arg1 : i32, i32
  }
}

</mosaic_0001>

<bundles_post_ra>
// kernel: encoder_block_forward.7
= control target key start
LH: loop header
LB: loop body
LE: loop exit
PB: predicated region body
PF: predicated region fallthrough
CT: control target
= control target key end

     0   :  { %s1598_s1 = inlined_call_operand.vmem [shape: f32[128,128], index: 1, kind: input, shape index: {}]   ;;  %s1599_s0 = inlined_call_operand.vmem [shape: f32[16,128], index: 0, kind: input, shape index: {}]   ;;  %s1600_s2 = inlined_call_operand.vmem [shape: f32[16,128], index: 2, kind: input, shape index: {}]   ;;  %s1601_s3 = inlined_call_operand.vmem [shape: f32[16,128], index: 3, kind: output, shape index: {}]  }
   0x1   :  { %v16_v0 = vld [vmem:[%s1598_s1] sm:$0xff]  ;;  %v17_v1 = vld [vmem:[%s1598_s1 + $0x8] sm:$0xff]  ;;  %v18_v2 = vld [vmem:[%s1598_s1 + $0x10] sm:$0xff] }
   0x2   :  { %v35_v3 = vand.u32 4294901760, %v16_v0  ;;  %v38_v4 = vand.u32 4294901760, %v17_v1  ;;  %v1278_v5 = vld [vmem:[%s1598_s1 + $0x18] sm:$0xff]  ;;  %v41_v6 = vand.u32 4294901760, %v18_v2  ;;  %v1283_v7 = vld [vmem:[%s1598_s1 + $0x20] sm:$0xff]  ;;  %v1288_v8 = vld [vmem:[%s1598_s1 + $0x28] sm:$0xff] }
   0x3   :  { %v44_v9 = vand.u32 4294901760, %v1278_v5  ;;  %v47_v11 = vand.u32 4294901760, %v1283_v7  ;;  %v50_v12 = vand.u32 4294901760, %v1288_v8  ;;  %v1300_v14 = vld [vmem:[%s1598_s1 + $0x30] sm:$0xff]  ;;  %v1305_v15 = vld [vmem:[%s1598_s1 + $0x38] sm:$0xff]  ;;  %v14_v16 = vld [vmem:[%s1599_s0] sm:$0xff] }
   0x4   :  { %v1291_v10 = vpack.c.bf16 %v38_v4, %v35_v3  ;;  %v1314_v17 = vand.u32 4294901760, %v14_v16  ;;  %v53_v19 = vand.u32 4294901760, %v1300_v14  ;;  %v56_v20 = vand.u32 4294901760, %v1305_v15  ;;  %v1329_v21 = vld [vmem:[%s1598_s1 + $0x40] sm:$0xff]  ;;  %v1334_v22 = vld [vmem:[%s1598_s1 + $0x48] sm:$0xff]  ;;  %v1355_v28 = vld [vmem:[%s1598_s1 + $0x50] sm:$0xff] }
   0x5   :  { %v1295_v13 = vpack.c.bf16 %v44_v9, %v41_v6  ;;  %v1322_v18 = vpack.c.bf16 %v50_v12, %v47_v11  ;;  %v59_v26 = vand.u32 4294901760, %v1329_v21  ;;  %v62_v27 = vand.u32 4294901760, %v1334_v22  ;;  %v1360_v29 = vld [vmem:[%s1598_s1 + $0x58] sm:$0xff]  ;;  %v15_v32 = vld [vmem:[%s1599_s0 + $0x8] sm:$0xff]  ;;  %v1381_v36 = vld [vmem:[%s1598_s1 + $0x60] sm:$0xff] }
   0x6   :  { %1043 = vmatprep.subr.bf16.mxu1 %v1291_v10  ;;  %1139 = vmatprep.subr.bf16.mxu0 %v1291_v10  ;;  %v1337_v23 = vsub.f32 %v14_v16, %v1314_v17  ;;  %v1348_v25 = vpack.c.bf16 %v56_v20, %v53_v19  ;;  %v65_v31 = vand.u32 4294901760, %v1355_v28  ;;  %v68_v35 = vand.u32 4294901760, %v1360_v29  ;;  %v1386_v37 = vld [vmem:[%s1598_s1 + $0x68] sm:$0xff]  ;;  %v1401_v43 = vld [vmem:[%s1598_s1 + $0x70] sm:$0xff]  ;;  %v1406_v44 = vld [vmem:[%s1598_s1 + $0x78] sm:$0xff] }
   0x7   :  { %1045 = vmatpush3.bf16.msra.mxu1 %v1291_v10  ;;  %1141 = vmatpush3.bf16.msra.mxu0 %v1291_v10  ;;  %v1375_v34 = vpack.c.bf16 %v62_v27, %v59_v26  ;;  %v1388_v38 = vsub.f32 %v16_v0, %v35_v3  ;;  %v1390_v39 = vsub.f32 %v17_v1, %v38_v4  ;;  %v1392_v40 = vand.u32 4294901760, %v15_v32 }
   0x8   :  { %1047 = vmatprep.subr.bf16.mxu1 %v1295_v13  ;;  %1143 = vmatprep.subr.bf16.mxu0 %v1295_v13  ;;  %v117_v24 = vand.u32 4294901760, %v1337_v23  ;;  %v71_v41 = vand.u32 4294901760, %v1381_v36  ;;  %v74_v42 = vand.u32 4294901760, %v1386_v37  ;;  %v1408_v45 = vsub.f32 %v18_v2, %v41_v6 }
   0x9   :  { %v1416_v46 = vpack.c.bf16 %v68_v35, %v65_v31  ;;  %v138_v47 = vand.u32 4294901760, %v1388_v38  ;;  %v145_v48 = vand.u32 4294901760, %v1390_v39  ;;  %v1421_v49 = vsub.f32 %v1278_v5, %v44_v9 }
   0xa   :  { %v118_v30 = vsub.f32 %v1337_v23, %v117_v24  ;;  %969 = vmatprep.mubr.f32.mxu0 %v117_v24  ;;  %v77_v50 = vand.u32 4294901760, %v1401_v43  ;;  %v80_v51 = vand.u32 4294901760, %v1406_v44  ;;  %v1426_v52 = vsub.f32 %v15_v32, %v1392_v40 }
   0xb   :  { %1049 = vmatpush3.bf16.msra.mxu1 %v1295_v13  ;;  %1145 = vmatpush3.bf16.msra.mxu0 %v1295_v13  ;;  %v1434_v53 = vpack.c.bf16 %v74_v42, %v71_v41  ;;  %v152_v54 = vand.u32 4294901760, %v1408_v45  ;;  %v1440_v55 = vsub.f32 %v1283_v7, %v47_v11  ;;  %v139_v56 = vsub.f32 %v1388_v38, %v138_v47 }
   0xc   :  { %1051 = vmatprep.subr.bf16.mxu1 %v1322_v18  ;;  %1147 = vmatprep.subr.bf16.mxu0 %v1322_v18  ;;  %v119_v33 = vand.u32 4294901760, %v118_v30  ;;  %v146_v57 = vsub.f32 %v1390_v39, %v145_v48  ;;  %v159_v58 = vand.u32 4294901760, %v1421_v49  ;;  %v1450_v59 = vsub.f32 %v1288_v8, %v50_v12 }
   0xd   :  { %v1456_v60 = vpack.c.bf16 %v80_v51, %v77_v50  ;;  %v127_v61 = vand.u32 4294901760, %v1426_v52  ;;  %v153_v62 = vsub.f32 %v1408_v45, %v152_v54  ;;  %v166_v63 = vand.u32 4294901760, %v1440_v55 }
   0xe   :  { %864 = vmatprep.mubr.f32.mxu1 %v119_v33  ;;  %v1466_v0 = vsub.f32 %v1300_v14, %v53_v19  ;;  %v1471_v1 = vsub.f32 %v1305_v15, %v56_v20  ;;  %v140_v2 = vand.u32 4294901760, %v139_v56  ;;  %v147_v3 = vand.u32 4294901760, %v146_v57 }
   0xf   :  { %1053 = vmatpush3.bf16.msra.mxu1 %v1322_v18  ;;  %1149 = vmatpush3.bf16.msra.mxu0 %v1322_v18  ;;  %v160_v4 = vsub.f32 %v1421_v49, %v159_v58  ;;  %v173_v5 = vand.u32 4294901760, %v1450_v59  ;;  %v1170_v6 = vpack.c.bf16 %v145_v48, %v138_v47  ;;  %v128_v7 = vsub.f32 %v1426_v52, %v127_v61 }
  0x10   :  { %1055 = vmatprep.subr.bf16.mxu1 %v1348_v25  ;;  %1151 = vmatprep.subr.bf16.mxu0 %v1348_v25  ;;  %v1481_v8 = vsub.f32 %v1329_v21, %v59_v26  ;;  %v154_v9 = vand.u32 4294901760, %v153_v62  ;;  %v167_v11 = vsub.f32 %v1440_v55, %v166_v63  ;;  %v180_v12 = vand.u32 4294901760, %v1466_v0 }
  0x11   :  { %v187_v14 = vand.u32 4294901760, %v1471_v1  ;;  %v1074_v15 = vpack.c.bf16 %v147_v3, %v140_v2  ;;  %v161_v16 = vand.u32 4294901760, %v160_v4  ;;  %v174_v19 = vsub.f32 %v1450_v59, %v173_v5 }
  0x12   :  { %v1494_v20 = vsub.f32 %v1334_v22, %v62_v27  ;;  %v129_v21 = vand.u32 4294901760, %v128_v7  ;;  %v1174_v24 = vpack.c.bf16 %v159_v58, %v152_v54  ;;  %v194_v26 = vand.u32 4294901760, %v1481_v8 }
  0x13   :  { %1057 = vmatpush3.bf16.msra.mxu1 %v1348_v25  ;;  %1153 = vmatpush3.bf16.msra.mxu0 %v1348_v25  ;;  %v1500_v30 = vsub.f32 %v1355_v28, %v65_v31  ;;  %v181_v32 = vsub.f32 %v1466_v0, %v180_v12  ;;  %v188_v33 = vsub.f32 %v1471_v1, %v187_v14  ;;  %v168_v47 = vand.u32 4294901760, %v167_v11 }
  0x14   :  { %1059 = vmatprep.subr.bf16.mxu1 %v1375_v34  ;;  %1155 = vmatprep.subr.bf16.mxu0 %v1375_v34  ;;  %v1509_v22 = vsub.f32 %v1360_v29, %v68_v35  ;;  %v1078_v27 = vpack.c.bf16 %v161_v16, %v154_v9  ;;  %v175_v48 = vand.u32 4294901760, %v174_v19  ;;  %v201_v28 = vand.u32 4294901760, %v1494_v20 }
  0x15   :  { %v1178_v31 = vpack.c.bf16 %v173_v5, %v166_v63  ;;  %v195_v54 = vsub.f32 %v1481_v8, %v194_v26  ;;  %v1516_v56 = vsub.f32 %v1381_v36, %v71_v41  ;;  %v182_v29 = vand.u32 4294901760, %v181_v32 }
  0x16   :  { %v189_v35 = vand.u32 4294901760, %v188_v33  ;;  %v208_v57 = vand.u32 4294901760, %v1500_v30  ;;  %v215_v58 = vand.u32 4294901760, %v1509_v22  ;;  %v1082_v62 = vpack.c.bf16 %v175_v48, %v168_v47 }
  0x17   :  { %1061 = vmatpush3.bf16.msra.mxu1 %v1375_v34  ;;  %1157 = vmatpush3.bf16.msra.mxu0 %v1375_v34  ;;  %v1524_v63 = vsub.f32 %v1386_v37, %v74_v42  ;;  %v1182_v36 = vpack.c.bf16 %v187_v14, %v180_v12  ;;  %v196_v41 = vand.u32 4294901760, %v195_v54  ;;  %v222_v5 = vand.u32 4294901760, %v1516_v56 }
  0x18   :  { %1063 = vmatprep.subr.bf16.mxu1 %v1416_v46  ;;  %1159 = vmatprep.subr.bf16.mxu0 %v1416_v46  ;;  %v1086_v2 = vpack.c.bf16 %v189_v35, %v182_v29  ;;  %v209_v3 = vsub.f32 %v1500_v30, %v208_v57  ;;  %v216_v4 = vsub.f32 %v1509_v22, %v215_v58 }
  0x19   :  { %v229_v37 = vand.u32 4294901760, %v1524_v63  ;;  %v1535_v42 = vsub.f32 %v1401_v43, %v77_v50  ;;  %v1540_v7 = vsub.f32 %v1406_v44, %v80_v51  ;;  %v1186_v9 = vpack.c.bf16 %v201_v28, %v194_v26 }
  0x1a   :  { %v210_v11 = vand.u32 4294901760, %v209_v3  ;;  %v217_v12 = vand.u32 4294901760, %v216_v4  ;;  %v223_v14 = vsub.f32 %v1516_v56, %v222_v5  ;;  %v1190_v51 = vpack.c.bf16 %v215_v58, %v208_v57 }
  0x1b   :  { %1065 = vmatpush3.bf16.msra.mxu1 %v1416_v46  ;;  %1161 = vmatpush3.bf16.msra.mxu0 %v1416_v46  ;;  %v230_v16 = vsub.f32 %v1524_v63, %v229_v37  ;;  %v236_v43 = vand.u32 4294901760, %v1535_v42  ;;  %v243_v50 = vand.u32 4294901760, %v1540_v7  ;;  %v1194_v33 = vpack.c.bf16 %v229_v37, %v222_v5 }
  0x1c   :  { %1067 = vmatprep.subr.bf16.mxu1 %v1434_v53  ;;  %1163 = vmatprep.subr.bf16.mxu0 %v1434_v53  ;;  %v1094_v44 = vpack.c.bf16 %v217_v12, %v210_v11  ;;  %v224_v19 = vand.u32 4294901760, %v223_v14  ;;  %v1110_v54 = vpack.c.bf16 %v1421_v49, %v1408_v45 }
  0x1d   :  { %v244_v26 = vsub.f32 %v1540_v7, %v243_v50 }
  0x1f   :  { %1069 = vmatpush3.bf16.msra.mxu1 %v1434_v53  ;;  %1165 = vmatpush3.bf16.msra.mxu0 %v1434_v53  ;;  %v245_v47 = vand.u32 4294901760, %v244_v26 }
  0x20   :  { %1071 = vmatprep.subr.bf16.mxu1 %v1456_v60  ;;  %1167 = vmatprep.subr.bf16.mxu0 %v1456_v60 }
  0x23   :  { %1073 = vmatpush3.bf16.msra.mxu1 %v1456_v60  ;;  %1169 = vmatpush3.bf16.msra.mxu0 %v1456_v60 }
  0x24   :  { %1075 = vmatprep.subr.bf16.mxu1 %v1074_v15  ;;  %1171 = vmatprep.subr.bf16.mxu0 %v1170_v6 }
  0x26   :  { %865 = vmatmul.mubr.f32.vlgmr.msra.gmra.mrb[0].mxu1 %v129_v21  ;;  %970 = vmatmul.mubr.f32.vlgmr.msra.gmra.mrb[0].mxu0 %v127_v61  ;;  %v202_v61 = vsub.f32 %v1494_v20, %v201_v28  ;;  %v231_v21 = vand.u32 4294901760, %v230_v16  ;;  %v1198_v28 = vpack.c.bf16 %v243_v50, %v236_v43 }
  0x27   :  { %1077 = vmatpush3.bf16.msra.mxu1 %v1074_v15  ;;  %1173 = vmatpush3.bf16.msra.mxu0 %v1170_v6 }
  0x28   :  { %1079 = vmatprep.subr.bf16.mxu1 %v1078_v27  ;;  %1175 = vmatprep.subr.bf16.mxu0 %v1174_v24  ;;  %v203_v6 = vand.u32 4294901760, %v202_v61  ;;  %v1098_v32 = vpack.c.bf16 %v231_v21, %v224_v19 }
  0x29   :  { %899 = vmatprep.mubr.f32.mxu1 %v1314_v17  ;;  %1004 = vmatprep.mubr.f32.mxu0 %v1314_v17 }
  0x2a   :  { %v1090_v15 = vpack.c.bf16 %v203_v6, %v196_v41 }
  0x2b   :  { %1081 = vmatpush3.bf16.msra.mxu1 %v1078_v27  ;;  %1177 = vmatpush3.bf16.msra.mxu0 %v1174_v24  ;;  %v237_v24 = vsub.f32 %v1535_v42, %v236_v43 }
  0x2c   :  { %1083 = vmatprep.subr.bf16.mxu1 %v1082_v62  ;;  %1179 = vmatprep.subr.bf16.mxu0 %v1178_v31 }
  0x2d   :  { %v238_v27 = vand.u32 4294901760, %v237_v24 }
  0x2f   :  { %1085 = vmatpush3.bf16.msra.mxu1 %v1082_v62  ;;  %1181 = vmatpush3.bf16.msra.mxu0 %v1178_v31  ;;  %v1102_v48 = vpack.c.bf16 %v245_v47, %v238_v27  ;;  %v1106_v31 = vpack.c.bf16 %v1390_v39, %v1388_v38  ;;  %v1114_v38 = vpack.c.bf16 %v1450_v59, %v1440_v55 }
  0x30   :  { %1087 = vmatprep.subr.bf16.mxu1 %v1086_v2  ;;  %1183 = vmatprep.subr.bf16.mxu0 %v1182_v36  ;;  %v1118_v39 = vpack.c.bf16 %v1471_v1, %v1466_v0 }
  0x33   :  { %1089 = vmatpush3.bf16.msra.mxu1 %v1086_v2  ;;  %1185 = vmatpush3.bf16.msra.mxu0 %v1182_v36 }
  0x34   :  { %1091 = vmatprep.subr.bf16.mxu1 %v1090_v15  ;;  %1187 = vmatprep.subr.bf16.mxu0 %v1186_v9 }
  0x37   :  { %1093 = vmatpush3.bf16.msra.mxu1 %v1090_v15  ;;  %1189 = vmatpush3.bf16.msra.mxu0 %v1186_v9 }
  0x38   :  { %1095 = vmatprep.subr.bf16.mxu1 %v1094_v44  ;;  %1191 = vmatprep.subr.bf16.mxu0 %v1190_v51 }
  0x3b   :  { %1097 = vmatpush3.bf16.msra.mxu1 %v1094_v44  ;;  %1193 = vmatpush3.bf16.msra.mxu0 %v1190_v51 }
  0x3c   :  { %1099 = vmatprep.subr.bf16.mxu1 %v1098_v32  ;;  %1195 = vmatprep.subr.bf16.mxu0 %v1194_v33 }
  0x3f   :  { %1101 = vmatpush3.bf16.msra.mxu1 %v1098_v32  ;;  %1197 = vmatpush3.bf16.msra.mxu0 %v1194_v33 }
  0x40   :  { %1103 = vmatprep.subr.bf16.mxu1 %v1102_v48  ;;  %1199 = vmatprep.subr.bf16.mxu0 %v1198_v28 }
  0x43   :  { %1105 = vmatpush3.bf16.msra.mxu1 %v1102_v48  ;;  %1201 = vmatpush3.bf16.msra.mxu0 %v1198_v28 }
  0x44   :  { %1107 = vmatprep.subr.bf16.mxu1 %v1106_v31  ;;  %1203 = vmatprep.subr.bf16.mxu0 %v1291_v10 }
  0x46   :  { %900 = vmatmul.mubr.f32.vlgmr.msra.gmra.mrb[0].mxu1 %v1392_v40  ;;  %1005 = vmatmul.mubr.f32.vlgmr.msra.gmra.mrb[0].mxu0 %v1392_v40 }
  0x47   :  { %1109 = vmatpush3.bf16.msra.mxu1 %v1106_v31  ;;  %1205 = vmatpush3.bf16.msra.mxu0 %v1291_v10  ;;  %v1122_v10 = vpack.c.bf16 %v1494_v20, %v1481_v8 }
  0x48   :  { %1111 = vmatprep.subr.bf16.mxu1 %v1110_v54  ;;  %1207 = vmatprep.subr.bf16.mxu0 %v1295_v13 }
  0x49   :  { %934 = vmatprep.mubr.f32.mxu1 %v1337_v23  ;;  %1039 = vmatprep.mubr.f32.mxu0 %v1314_v17  ;;  %v1130_v17 = vpack.c.bf16 %v1524_v63, %v1516_v56  ;;  %v33_v23 = vld [vmem:[%s1600_s2 + $0x8] sm:$0xff] }
  0x4b   :  { %1113 = vmatpush3.bf16.msra.mxu1 %v1110_v54  ;;  %1209 = vmatpush3.bf16.msra.mxu0 %v1295_v13  ;;  %v1126_v13 = vpack.c.bf16 %v1509_v22, %v1500_v30 }
  0x4c   :  { %1115 = vmatprep.subr.bf16.mxu1 %v1114_v38  ;;  %1211 = vmatprep.subr.bf16.mxu0 %v1322_v18 }
  0x4f   :  { %1117 = vmatpush3.bf16.msra.mxu1 %v1114_v38  ;;  %1213 = vmatpush3.bf16.msra.mxu0 %v1322_v18  ;;  %v1134_v18 = vpack.c.bf16 %v1540_v7, %v1535_v42 }
  0x50   :  { %1119 = vmatprep.subr.bf16.mxu1 %v1118_v39  ;;  %1215 = vmatprep.subr.bf16.mxu0 %v1348_v25 }
  0x53   :  { %1121 = vmatpush3.bf16.msra.mxu1 %v1118_v39  ;;  %1217 = vmatpush3.bf16.msra.mxu0 %v1348_v25  ;;  %v32_v25 = vld [vmem:[%s1600_s2] sm:$0xff] }
  0x54   :  { %1123 = vmatprep.subr.bf16.mxu1 %v1122_v10  ;;  %1219 = vmatprep.subr.bf16.mxu0 %v1375_v34 }
  0x57   :  { %1125 = vmatpush3.bf16.msra.mxu1 %v1122_v10  ;;  %1221 = vmatpush3.bf16.msra.mxu0 %v1375_v34 }
  0x58   :  { %1127 = vmatprep.subr.bf16.mxu1 %v1126_v13  ;;  %1223 = vmatprep.subr.bf16.mxu0 %v1416_v46 }
  0x5b   :  { %1129 = vmatpush3.bf16.msra.mxu1 %v1126_v13  ;;  %1225 = vmatpush3.bf16.msra.mxu0 %v1416_v46 }
  0x5c   :  { %1131 = vmatprep.subr.bf16.mxu1 %v1130_v17  ;;  %1227 = vmatprep.subr.bf16.mxu0 %v1434_v53 }
  0x5f   :  { %1133 = vmatpush3.bf16.msra.mxu1 %v1130_v17  ;;  %1229 = vmatpush3.bf16.msra.mxu0 %v1434_v53 }
  0x60   :  { %1135 = vmatprep.subr.bf16.mxu1 %v1134_v18  ;;  %1231 = vmatprep.subr.bf16.mxu0 %v1456_v60 }
  0x63   :  { %1137 = vmatpush3.bf16.msra.mxu1 %v1134_v18  ;;  %1233 = vmatpush3.bf16.msra.mxu0 %v1456_v60 }
  0x66   :  { %935 = vmatmul.mubr.f32.vlgmr.msra.gmra.mrb[0].mxu1 %v1426_v52  ;;  %1040 = vmatmul.mubr.f32.vlgmr.msra.gmra.mrb[0].mxu0 %v1392_v40 }
 0x139   :  { %v936_v34 = vpop.f32.mrb[0].mxu1  ;;  %v1041_v45 = vpop.f32.mrb[0].mxu0 }
 0x13a   :  { %v1234_v46 = vadd.f32 %v936_v34, %v33_v23  ;;  %v392_v49 = vpop.f32.mrb[1].mxu1  ;;  %v708_v53 = vpop.f32.mrb[1].mxu0 }
 0x13b   :  { %v1236_v55 = vadd.f32 %v392_v49, %v32_v25 }
 0x13c   :  { %v1235_v59 = vadd.f32 %v1234_v46, %v1041_v45 }
 0x13d   :  { %v1237_v60 = vadd.f32 %v1236_v55, %v708_v53 }
 0x13e   :  { %719 = vst [vmem:[%s1601_s3 + $0x8] sm:$0xff] %v1235_v59 }
 0x13f   :  { %718 = vst [vmem:[%s1601_s3] sm:$0xff] %v1237_v60 }

// kernel: encoder_block_forward.8
= control target key start
LH: loop header
LB: loop body
LE: loop exit
PB: predicated region body
PF: predicated region fallthrough
CT: control target
= control target key end

     0   :  { %s1850_s0 = inlined_call_operand.vmem [shape: f32[16,128], index: 0, kind: input, shape index: {}]   ;;  %s1851_s3 = inlined_call_operand.vmem [shape: f32[128,256], index: 3, kind: input, shape index: {}]   ;;  %s1852_s1 = inlined_call_operand.vmem [shape: f32[1,128], index: 1, kind: input, shape index: {}]   ;;  %s1853_s2 = inlined_call_operand.vmem [shape: f32[1,128], index: 2, kind: input, shape index: {}]   ;;  %s1854_s4 = inlined_call_operand.vmem [shape: f32[1,256], index: 4, kind: input, shape index: {}]   ;;  %s1855_s5 = inlined_call_operand.vmem [shape: f32[16,256], index: 5, kind: output, shape index: {}]  }
   0x1   :  { %v20_v0 = vld [vmem:[%s1850_s0] sm:$0xff]  ;;  %v21_v1 = vld [vmem:[%s1850_s0 + $0x8] sm:$0xff]  ;;  %v1319_v11 = vld [vmem:[%s1851_s3 + $0x18] sm:$0xff] }
   0x2   :  { %22 = vadd.xlane.f32.xlu0 %v20_v0  ;;  %v1314_v10 = vld [vmem:[%s1851_s3 + $0x8] sm:$0xff]  ;;  %v127_v13 = vand.u32 4294901760, %v1319_v11  ;;  %v79_v14 = vld [vmem:[%s1851_s3] sm:$0xff]  ;;  %v81_v15 = vld [vmem:[%s1851_s3 + $0x10] sm:$0xff] }
   0x3   :  { %v123_v12 = vand.u32 4294901760, %v1314_v10  ;;  %v125_v16 = vand.u32 4294901760, %v79_v14  ;;  %v129_v17 = vand.u32 4294901760, %v81_v15  ;;  %v84_v20 = vld [vmem:[%s1851_s3 + $0x28] sm:$0xff]  ;;  %v86_v21 = vld [vmem:[%s1851_s3 + $0x38] sm:$0xff]  ;;  %v83_v24 = vld [vmem:[%s1851_s3 + $0x20] sm:$0xff] }
   0x4   :  { %v131_v22 = vand.u32 4294901760, %v84_v20  ;;  %v135_v23 = vand.u32 4294901760, %v86_v21  ;;  %v85_v25 = vld [vmem:[%s1851_s3 + $0x30] sm:$0xff]  ;;  %v133_v26 = vand.u32 4294901760, %v83_v24  ;;  %v88_v30 = vld [vmem:[%s1851_s3 + $0x48] sm:$0xff]  ;;  %v90_v31 = vld [vmem:[%s1851_s3 + $0x58] sm:$0xff]  ;;  %v1413_v59 = vsub.f32 %v1319_v11, %v127_v13 }
   0x5   :  { %v1329_v18 = vpack.c.bf16 %v127_v13, %v123_v12  ;;  %v1331_v19 = vpack.c.bf16 %v129_v17, %v125_v16  ;;  %v137_v27 = vand.u32 4294901760, %v85_v25  ;;  %v139_v32 = vand.u32 4294901760, %v88_v30  ;;  %v87_v34 = vld [vmem:[%s1851_s3 + $0x40] sm:$0xff]  ;;  %v89_v35 = vld [vmem:[%s1851_s3 + $0x50] sm:$0xff]  ;;  %v92_v40 = vld [vmem:[%s1851_s3 + $0x68] sm:$0xff] }
   0x6   :  { %24 = vadd.xlane.f32.xlu0 %v21_v1  ;;  %v1349_v28 = vpack.c.bf16 %v135_v23, %v131_v22  ;;  %v143_v33 = vand.u32 4294901760, %v90_v31  ;;  %v141_v36 = vand.u32 4294901760, %v87_v34  ;;  %v145_v37 = vand.u32 4294901760, %v89_v35  ;;  %v94_v41 = vld [vmem:[%s1851_s3 + $0x78] sm:$0xff]  ;;  %v91_v44 = vld [vmem:[%s1851_s3 + $0x60] sm:$0xff]  ;;  %v93_v45 = vld [vmem:[%s1851_s3 + $0x70] sm:$0xff] }
   0x7   :  { %1875 = vst [vmem:[#allocation2_spill] sm:$0xff] %v1329_v18  ;;  %1876 = vst [vmem:[#allocation3_spill] sm:$0xff] %v1331_v19  ;;  %1138 = vmatprep.subr.bf16.mxu0 %v1329_v18  ;;  %1042 = vmatprep.subr.bf16.mxu1 %v1329_v18  ;;  %v1351_v29 = vpack.c.bf16 %v137_v27, %v133_v26  ;;  %v147_v42 = vand.u32 4294901760, %v92_v40  ;;  %v151_v43 = vand.u32 4294901760, %v94_v41  ;;  %v149_v46 = vand.u32 4294901760, %v91_v44  ;;  %v96_v50 = vld [vmem:[%s1851_s3 + $0x88] sm:$0xff] }
   0x8   :  { %1140 = vmatpush1.bf16.msra.mxu0 %v1331_v19  ;;  %1044 = vmatpush1.bf16.msra.mxu1 %v1331_v19  ;;  %1877 = vst [vmem:[#allocation4_spill] sm:$0xff] %v1349_v28  ;;  %v1369_v38 = vpack.c.bf16 %v143_v33, %v139_v32  ;;  %v1371_v39 = vpack.c.bf16 %v145_v37, %v141_v36  ;;  %v153_v47 = vand.u32 4294901760, %v93_v45  ;;  %v98_v51 = vld [vmem:[%s1851_s3 + $0x98] sm:$0xff]  ;;  %v95_v52 = vld [vmem:[%s1851_s3 + $0x80] sm:$0xff]  ;;  %v97_v53 = vld [vmem:[%s1851_s3 + $0x90] sm:$0xff]  ;;  %v155_v54 = vand.u32 4294901760, %v96_v50 }
   0x9   :  { %1878 = vst [vmem:[#allocation5_spill] sm:$0xff] %v1351_v29  ;;  %1142 = vmatprep.subr.bf16.mxu0 %v1349_v28  ;;  %1046 = vmatprep.subr.bf16.mxu1 %v1349_v28  ;;  %v1389_v48 = vpack.c.bf16 %v151_v43, %v147_v42  ;;  %v159_v55 = vand.u32 4294901760, %v98_v51  ;;  %v157_v56 = vand.u32 4294901760, %v95_v52  ;;  %v161_v57 = vand.u32 4294901760, %v97_v53 }
   0xa   :  { %1879 = vst [vmem:[#allocation6_spill] sm:$0xff] %v1369_v38  ;;  %1880 = vst [vmem:[#allocation7_spill] sm:$0xff] %v1371_v39  ;;  %v1391_v49 = vpack.c.bf16 %v153_v47, %v149_v46  ;;  %v1410_v58 = vsub.f32 %v1314_v10, %v123_v12  ;;  %v1415_v60 = vsub.f32 %v79_v14, %v125_v16  ;;  %v99_v10 = vld [vmem:[%s1851_s3 + $0xa0] sm:$0xff]  ;;  %v104_v16 = vld [vmem:[%s1851_s3 + $0xc8] sm:$0xff] }
   0xb   :  { %1881 = vst [vmem:[#allocation8_spill] sm:$0xff] %v1389_v48  ;;  %v1417_v61 = vsub.f32 %v81_v15, %v129_v17  ;;  %v1419_v62 = vsub.f32 %v84_v20, %v131_v22  ;;  %v1421_v63 = vsub.f32 %v86_v21, %v135_v23  ;;  %v1444_v11 = vsub.f32 %v92_v40, %v147_v42  ;;  %v101_v15 = vld [vmem:[%s1851_s3 + $0xb0] sm:$0xff]  ;;  %v106_v17 = vld [vmem:[%s1851_s3 + $0xd8] sm:$0xff] }
   0xc   :  { %1144 = vmatpush1.bf16.msra.mxu0 %v1351_v29  ;;  %1048 = vmatpush1.bf16.msra.mxu1 %v1351_v29  ;;  %1882 = vst [vmem:[#allocation9_spill] sm:$0xff] %v1391_v49  ;;  %v1446_v12 = vsub.f32 %v94_v41, %v151_v43  ;;  %v1448_v13 = vsub.f32 %v91_v44, %v149_v46  ;;  %v110_v43 = vld [vmem:[%s1851_s3 + $0xf8] sm:$0xff]  ;;  %v107_v44 = vld [vmem:[%s1851_s3 + $0xe0] sm:$0xff] }
   0xd   :  { %1146 = vmatprep.subr.bf16.mxu0 %v1369_v38  ;;  %1050 = vmatprep.subr.bf16.mxu1 %v1369_v38  ;;  %v1450_v14 = vsub.f32 %v93_v45, %v153_v47  ;;  %v1461_v20 = vpack.c.bf16 %v159_v55, %v155_v54  ;;  %v1463_v21 = vsub.f32 %v96_v50, %v155_v54  ;;  %v109_v45 = vld [vmem:[%s1851_s3 + $0xf0] sm:$0xff] }
   0xe   :  { %v1465_v22 = vsub.f32 %v98_v51, %v159_v55  ;;  %v1467_v23 = vpack.c.bf16 %v161_v57, %v157_v56 }
   0xf   :  { %1883 = vst [vmem:[#allocation10_spill] sm:$0xff] %v1461_v20  ;;  %v340_v29 = vand.u32 4294901760, %v1463_v21 }
  0x10   :  { %1148 = vmatpush1.bf16.msra.mxu0 %v1371_v39  ;;  %1052 = vmatpush1.bf16.msra.mxu1 %v1371_v39  ;;  %1884 = vst [vmem:[#allocation11_spill] sm:$0xff] %v1467_v23 }
  0x11   :  { %1150 = vmatprep.subr.bf16.mxu0 %v1389_v48  ;;  %1054 = vmatprep.subr.bf16.mxu1 %v1389_v48 }
  0x14   :  { %1152 = vmatpush1.bf16.msra.mxu0 %v1391_v49  ;;  %1056 = vmatpush1.bf16.msra.mxu1 %v1391_v49  ;;  %v316_v49 = vand.u32 4294901760, %v1444_v11 }
  0x15   :  { %1154 = vmatprep.subr.bf16.mxu0 %v1461_v20  ;;  %1058 = vmatprep.subr.bf16.mxu1 %v1461_v20 }
  0x18   :  { %1156 = vmatpush1.bf16.msra.mxu0 %v1467_v23  ;;  %1060 = vmatpush1.bf16.msra.mxu1 %v1467_v23 }
  0x8f   :  { %v23_v2 = vpop.xlane.xlu0 %22 }
  0x90   :  { %v27_v3 = vmul.f32 0.0078125, %v23_v2  ;;  %v1427_v2 = vsub.f32 %v88_v30, %v139_v32  ;;  %v169_v32 = vand.u32 4294901760, %v101_v15 }
  0x92   :  { %v1303_v4 = vsub.f32 %v20_v0, %v27_v3  ;;  %v1423_v0 = vsub.f32 %v83_v24, %v133_v26  ;;  %v1429_v3 = vsub.f32 %v90_v31, %v143_v33  ;;  %v103_v24 = vld [vmem:[%s1851_s3 + $0xc0] sm:$0xff]  ;;  %v1474_v26 = vsub.f32 %v97_v53, %v161_v57 }
  0x93   :  { %v25_v5 = vpop.xlane.xlu0 %24  ;;  %v165_v31 = vand.u32 4294901760, %v99_v10  ;;  %v171_v33 = vand.u32 4294901760, %v104_v16  ;;  %v173_v42 = vand.u32 4294901760, %v103_v24  ;;  %v1505_v50 = vsub.f32 %v101_v15, %v169_v32 }
  0x94   :  { %v28_v6 = vmul.f32 0.0078125, %v25_v5  ;;  %v31_v7 = vmul.f32 %v1303_v4, %v1303_v4  ;;  %v1431_v5 = vsub.f32 %v87_v34, %v141_v36  ;;  %v175_v34 = vand.u32 4294901760, %v106_v17  ;;  %v108_v36 = vld [vmem:[%s1851_s3 + $0xe8] sm:$0xff] }
  0x95   :  { %v1501_v46 = vpack.c.bf16 %v169_v32, %v165_v31  ;;  %v1503_v47 = vsub.f32 %v99_v10, %v165_v31  ;;  %v1515_v55 = vsub.f32 %v103_v24, %v173_v42  ;;  %v183_v57 = vand.u32 4294901760, %v110_v43 }
  0x96   :  { %v1307_v8 = vsub.f32 %v21_v1, %v28_v6  ;;  %33 = vadd.xlane.f32.xlu1 %v31_v7  ;;  %v1425_v1 = vsub.f32 %v85_v25, %v137_v27  ;;  %v1433_v6 = vsub.f32 %v89_v35, %v145_v37  ;;  %v100_v7 = vld [vmem:[%s1851_s3 + $0xa8] sm:$0xff]  ;;  %v1472_v25 = vsub.f32 %v95_v52, %v157_v56  ;;  %v105_v35 = vld [vmem:[%s1851_s3 + $0xd0] sm:$0xff] }
  0x97   :  { %v163_v27 = vand.u32 4294901760, %v100_v7  ;;  %1886 = vst [vmem:[#allocation13_spill] sm:$0xff] %v1501_v46  ;;  %v1507_v51 = vpack.c.bf16 %v175_v34, %v171_v33  ;;  %v1511_v52 = vsub.f32 %v104_v16, %v171_v33  ;;  %v1513_v53 = vsub.f32 %v106_v17, %v175_v34 }
  0x98   :  { %v32_v9 = vmul.f32 %v1307_v8, %v1307_v8  ;;  %v177_v54 = vand.u32 4294901760, %v105_v35  ;;  %v179_v56 = vand.u32 4294901760, %v108_v36  ;;  %v244_v16 = vand.u32 4294901760, %v1410_v58 }
  0x99   :  { %v1487_v40 = vsub.f32 %v100_v7, %v163_v27  ;;  %1887 = vst [vmem:[#allocation14_spill] sm:$0xff] %v1507_v51  ;;  %v181_v7 = vand.u32 4294901760, %v107_v44  ;;  %v1856_v33 = vmov 0.0  }
  0x9a   :  { %35 = vadd.xlane.f32.xlu1 %v32_v9  ;;  %v102_v9 = vld [vmem:[%s1851_s3 + $0xb8] sm:$0xff]  ;;  %v1519_v10 = vpack.c.bf16 %v177_v54, %v173_v42  ;;  %v1521_v15 = vsub.f32 %v105_v35, %v177_v54  ;;  %v1526_v17 = vpack.c.bf16 %v183_v57, %v179_v56  ;;  %v1528_v24 = vsub.f32 %v108_v36, %v179_v56 }
  0x9b   :  { %v167_v30 = vand.u32 4294901760, %v102_v9  ;;  %v1533_v31 = vsub.f32 %v107_v44, %v181_v7  ;;  %722 = vmatprep.mubr.f32.mxu0 %v1856_v33  ;;  %219 = vmatprep.mubr.f32.mxu1 %v1856_v33  ;;  %v250_v35 = vand.u32 4294901760, %v1415_v60  ;;  %v262_v36 = vand.u32 4294901760, %v1417_v61 }
  0x9c   :  { %1888 = vst [vmem:[#allocation15_spill] sm:$0xff] %v1519_v10  ;;  %1889 = vst [vmem:[#allocation16_spill] sm:$0xff] %v1526_v17  ;;  %v245_v44 = vsub.f32 %v1410_v58, %v244_v16  ;;  %v280_v33 = vand.u32 4294901760, %v1421_v63 }
  0x9d   :  { %v1485_v37 = vpack.c.bf16 %v167_v30, %v163_v27  ;;  %v1489_v41 = vsub.f32 %v102_v9, %v167_v30  ;;  %v185_v9 = vand.u32 4294901760, %v109_v45  ;;  %v1530_v27 = vsub.f32 %v110_v43, %v183_v57  ;;  %1890 = vst [vmem:[#allocation17_spill] sm:$0xff] %v1533_v31 }
  0x9e   :  { %v256_v30 = vand.u32 4294901760, %v1413_v59  ;;  %v1547_v43 = vpack.c.bf16 %v262_v36, %v250_v35  ;;  %v251_v54 = vsub.f32 %v1415_v60, %v250_v35  ;;  %v263_v56 = vsub.f32 %v1417_v61, %v262_v36 }
  0x9f   :  { %1885 = vst [vmem:[#allocation12_spill] sm:$0xff] %v1485_v37  ;;  %1158 = vmatprep.subr.bf16.mxu0 %v1485_v37  ;;  %1062 = vmatprep.subr.bf16.mxu1 %v1485_v37  ;;  %v1535_v32 = vsub.f32 %v109_v45, %v185_v9  ;;  %v1541_v34 = vpack.c.bf16 %v185_v9, %v181_v7  ;;  %v246_v57 = vand.u32 4294901760, %v245_v44  ;;  %v268_v9 = vand.u32 4294901760, %v1419_v62 }
  0xa0   :  { %1160 = vmatpush1.bf16.msra.mxu0 %v1501_v46  ;;  %1064 = vmatpush1.bf16.msra.mxu1 %v1501_v46  ;;  %v1169_v42 = vpack.c.bf16 %v256_v30, %v244_v16  ;;  %v257_v45 = vsub.f32 %v1413_v59, %v256_v30  ;;  %v274_v16 = vand.u32 4294901760, %v1423_v0  ;;  %v286_v30 = vand.u32 4294901760, %v1425_v1 }
  0xa1   :  { %1162 = vmatprep.subr.bf16.mxu0 %v1507_v51  ;;  %1066 = vmatprep.subr.bf16.mxu1 %v1507_v51  ;;  %1891 = vst [vmem:[#allocation18_spill] sm:$0xff] %v1541_v34  ;;  %v1559_v51 = vpack.c.bf16 %v280_v33, %v268_v9  ;;  %v269_v36 = vsub.f32 %v1419_v62, %v268_v9  ;;  %v292_v37 = vand.u32 4294901760, %v1427_v2  ;;  %v298_v9 = vand.u32 4294901760, %v1431_v5 }
  0xa2   :  { %v258_v7 = vand.u32 4294901760, %v257_v45  ;;  %v1565_v45 = vpack.c.bf16 %v286_v30, %v274_v16  ;;  %v275_v46 = vsub.f32 %v1423_v0, %v274_v16 }
  0xa3   :  { %v293_v16 = vsub.f32 %v1427_v2, %v292_v37 }
  0xa4   :  { %1164 = vmatpush1.bf16.msra.mxu0 %v1519_v10  ;;  %1068 = vmatpush1.bf16.msra.mxu1 %v1519_v10  ;;  %v264_v10 = vand.u32 4294901760, %v263_v56  ;;  %v1073_v35 = vpack.c.bf16 %v258_v7, %v246_v57  ;;  %v304_v57 = vand.u32 4294901760, %v1429_v3  ;;  %v276_v7 = vand.u32 4294901760, %v275_v46 }
  0xa5   :  { %1166 = vmatprep.subr.bf16.mxu0 %v1526_v17  ;;  %1070 = vmatprep.subr.bf16.mxu1 %v1526_v17  ;;  %v252_v17 = vand.u32 4294901760, %v251_v54  ;;  %v270_v54 = vand.u32 4294901760, %v269_v36  ;;  %v299_v36 = vsub.f32 %v1431_v5, %v298_v9 }
  0xa7   :  { %v1563_v44 = vpack.c.bf16 %v264_v10, %v252_v17  ;;  %v310_v10 = vand.u32 4294901760, %v1433_v6 }
  0xa8   :  { %1168 = vmatpush1.bf16.msra.mxu0 %v1541_v34  ;;  %1072 = vmatpush1.bf16.msra.mxu1 %v1541_v34  ;;  %v281_v34 = vsub.f32 %v1421_v63, %v280_v33  ;;  %v1575_v33 = vpack.c.bf16 %v304_v57, %v292_v37  ;;  %v322_v37 = vand.u32 4294901760, %v1448_v13 }
  0xa9   :  { %1170 = vmatprep.subr.bf16.mxu0 %v1169_v42  ;;  %v287_v42 = vsub.f32 %v1425_v1, %v286_v30  ;;  %1074 = vmatprep.subr.bf16.mxu1 %v1073_v35  ;;  %v305_v30 = vsub.f32 %v1429_v3, %v304_v57  ;;  %v311_v46 = vsub.f32 %v1433_v6, %v310_v10  ;;  %v334_v57 = vand.u32 4294901760, %v1450_v14 }
  0xaa   :  { %v282_v56 = vand.u32 4294901760, %v281_v34  ;;  %v1581_v34 = vpack.c.bf16 %v310_v10, %v298_v9  ;;  %v317_v9 = vsub.f32 %v1444_v11, %v316_v49  ;;  %v323_v39 = vsub.f32 %v1448_v13, %v322_v37 }
  0xab   :  { %v288_v23 = vand.u32 4294901760, %v287_v42  ;;  %v294_v42 = vand.u32 4294901760, %v293_v16  ;;  %v306_v20 = vand.u32 4294901760, %v305_v30  ;;  %v312_v48 = vand.u32 4294901760, %v311_v46 }
  0xac   :  { %v1573_v17 = vpack.c.bf16 %v282_v56, %v270_v54  ;;  %v328_v54 = vand.u32 4294901760, %v1446_v12  ;;  %v300_v56 = vand.u32 4294901760, %v299_v36  ;;  %v1597_v30 = vpack.c.bf16 %v334_v57, %v322_v37 }
  0xad   :  { %v1579_v35 = vpack.c.bf16 %v288_v23, %v276_v7  ;;  %v1589_v23 = vpack.c.bf16 %v306_v20, %v294_v42  ;;  %v335_v36 = vsub.f32 %v1450_v14, %v334_v57  ;;  %v318_v46 = vand.u32 4294901760, %v317_v9 }
  0xae   :  { %v1591_v7 = vpack.c.bf16 %v328_v54, %v316_v49  ;;  %v329_v10 = vsub.f32 %v1446_v12, %v328_v54  ;;  %v1595_v16 = vpack.c.bf16 %v312_v48, %v300_v56  ;;  %1893 = vst [vmem:[#allocation20_spill] sm:$0xff] %v1597_v30  ;;  %v352_v20 = vand.u32 4294901760, %v1465_v22 }
  0xaf   :  { %v324_v42 = vand.u32 4294901760, %v323_v39  ;;  %v336_v28 = vand.u32 4294901760, %v335_v36  ;;  %v346_v49 = vand.u32 4294901760, %v1472_v25  ;;  %v358_v54 = vand.u32 4294901760, %v1474_v26 }
  0xb0   :  { %1892 = vst [vmem:[#allocation19_spill] sm:$0xff] %v1595_v16  ;;  %v330_v38 = vand.u32 4294901760, %v329_v10  ;;  %v1607_v56 = vpack.c.bf16 %v352_v20, %v340_v29  ;;  %v341_v37 = vsub.f32 %v1463_v21, %v340_v29  ;;  %v353_v57 = vsub.f32 %v1465_v22, %v352_v20 }
  0xb1   :  { %v1611_v9 = vpack.c.bf16 %v336_v28, %v324_v42  ;;  %v1613_v10 = vpack.c.bf16 %v358_v54, %v346_v49  ;;  %v347_v19 = vsub.f32 %v1472_v25, %v346_v49  ;;  %v359_v39 = vsub.f32 %v1474_v26, %v358_v54 }
  0xb2   :  { %v1605_v48 = vpack.c.bf16 %v330_v38, %v318_v46  ;;  %1895 = vst [vmem:[#allocation22_spill] sm:$0xff] %v1607_v56  ;;  %v342_v36 = vand.u32 4294901760, %v341_v37  ;;  %v354_v18 = vand.u32 4294901760, %v353_v57  ;;  %v364_v30 = vand.u32 4294901760, %v1487_v40 }
  0xb3   :  { %1896 = vst [vmem:[#allocation23_spill] sm:$0xff] %v1611_v9  ;;  %1897 = vst [vmem:[#allocation24_spill] sm:$0xff] %v1613_v10  ;;  %v376_v38 = vand.u32 4294901760, %v1489_v41  ;;  %v348_v46 = vand.u32 4294901760, %v347_v19  ;;  %v360_v56 = vand.u32 4294901760, %v359_v39  ;;  %v370_v29 = vand.u32 4294901760, %v1503_v47 }
  0xb4   :  { %1894 = vst [vmem:[#allocation21_spill] sm:$0xff] %v1605_v48  ;;  %v382_v20 = vand.u32 4294901760, %v1505_v50  ;;  %v1621_v28 = vpack.c.bf16 %v354_v18, %v342_v36  ;;  %v365_v49 = vsub.f32 %v1487_v40, %v364_v30  ;;  %v388_v48 = vand.u32 4294901760, %v1511_v52 }
  0xb5   :  { %v1623_v42 = vpack.c.bf16 %v376_v38, %v364_v30  ;;  %v377_v54 = vsub.f32 %v1489_v41, %v376_v38  ;;  %v1627_v37 = vpack.c.bf16 %v360_v56, %v348_v46  ;;  %v371_v10 = vsub.f32 %v1503_v47, %v370_v29 }
  0xb6   :  { %1898 = vst [vmem:[#allocation25_spill] sm:$0xff] %v1621_v28  ;;  %v1629_v57 = vpack.c.bf16 %v382_v20, %v370_v29  ;;  %v383_v19 = vsub.f32 %v1505_v50, %v382_v20  ;;  %v366_v39 = vand.u32 4294901760, %v365_v49  ;;  %v400_v18 = vand.u32 4294901760, %v1513_v53 }
  0xb7   :  { %1899 = vst [vmem:[#allocation26_spill] sm:$0xff] %v1623_v42  ;;  %1900 = vst [vmem:[#allocation27_spill] sm:$0xff] %v1627_v37  ;;  %v378_v9 = vand.u32 4294901760, %v377_v54  ;;  %v372_v36 = vand.u32 4294901760, %v371_v10  ;;  %v394_v30 = vand.u32 4294901760, %v1515_v55  ;;  %v406_v38 = vand.u32 4294901760, %v1521_v15 }
  0xb8   :  { %1901 = vst [vmem:[#allocation28_spill] sm:$0xff] %v1629_v57  ;;  %v384_v42 = vand.u32 4294901760, %v383_v19  ;;  %v1639_v46 = vpack.c.bf16 %v400_v18, %v388_v48  ;;  %v389_v29 = vsub.f32 %v1511_v52, %v388_v48  ;;  %v401_v20 = vsub.f32 %v1513_v53, %v400_v18 }
  0xb9   :  { %v1637_v56 = vpack.c.bf16 %v378_v9, %v366_v39  ;;  %v1645_v54 = vpack.c.bf16 %v406_v38, %v394_v30  ;;  %v395_v57 = vsub.f32 %v1515_v55, %v394_v30  ;;  %v407_v10 = vsub.f32 %v1521_v15, %v406_v38 }
  0xba   :  { %1903 = vst [vmem:[#allocation30_spill] sm:$0xff] %v1639_v46  ;;  %v1643_v49 = vpack.c.bf16 %v384_v42, %v372_v36  ;;  %v390_v19 = vand.u32 4294901760, %v389_v29  ;;  %v402_v37 = vand.u32 4294901760, %v401_v20  ;;  %v412_v28 = vand.u32 4294901760, %v1528_v24 }
  0xbb   :  { %1902 = vst [vmem:[#allocation29_spill] sm:$0xff] %v1637_v56  ;;  %1905 = vst [vmem:[#allocation32_spill] sm:$0xff] %v1645_v54  ;;  %v424_v9 = vand.u32 4294901760, %v1530_v27  ;;  %v396_v39 = vand.u32 4294901760, %v395_v57  ;;  %v408_v46 = vand.u32 4294901760, %v407_v10  ;;  %v418_v48 = vand.u32 4294901760, %v1533_v31 }
  0xbc   :  { %1904 = vst [vmem:[#allocation31_spill] sm:$0xff] %v1643_v49  ;;  %v430_v18 = vand.u32 4294901760, %v1535_v32  ;;  %v1653_v42 = vpack.c.bf16 %v402_v37, %v390_v19  ;;  %v413_v30 = vsub.f32 %v1528_v24, %v412_v28 }
  0xbd   :  { %v1655_v36 = vpack.c.bf16 %v424_v9, %v412_v28  ;;  %v425_v38 = vsub.f32 %v1530_v27, %v424_v9  ;;  %v1659_v29 = vpack.c.bf16 %v408_v46, %v396_v39  ;;  %v419_v54 = vsub.f32 %v1533_v31, %v418_v48 }
  0xbe   :  { %v1661_v20 = vpack.c.bf16 %v430_v18, %v418_v48  ;;  %v431_v57 = vsub.f32 %v1535_v32, %v430_v18  ;;  %v414_v10 = vand.u32 4294901760, %v413_v30 }
  0xbf   :  { %v426_v49 = vand.u32 4294901760, %v425_v38  ;;  %v420_v56 = vand.u32 4294901760, %v419_v54 }
  0xc0   :  { %v432_v16 = vand.u32 4294901760, %v431_v57 }
  0xc1   :  { %v1665_v37 = vpack.c.bf16 %v426_v49, %v414_v10 }
  0xc2   :  { %v1667_v19 = vpack.c.bf16 %v432_v16, %v420_v56 }
 0x123   :  { %v34_v16 = vpop.xlane.xlu1 %33 }
 0x124   :  { %v37_v18 = vmul.f32 0.007874016, %v34_v16 }
 0x126   :  { %1258 = vrsqrt.f32 %v37_v18  ;;  %vm41_vm0 = vcmp.eq.f32.partialorder %v37_v18, inf  ;;  %v44_v39 = vand.u32 2147483648, %v37_v18  ;;  %vm43_vm1 = vcmp.eq.f32.partialorder %v37_v18, 0.0 }
 0x127   :  { %v36_v49 = vpop.xlane.xlu1 %35 }
 0x128   :  { %v38_v30 = vmul.f32 0.007874016, %v36_v49 }
 0x12a   :  { %1260 = vrsqrt.f32 %v38_v30  ;;  %vm48_vm2 = vcmp.eq.f32.partialorder %v38_v30, inf  ;;  %v51_v46 = vand.u32 2147483648, %v38_v30  ;;  %vm50_vm3 = vcmp.eq.f32.partialorder %v38_v30, 0.0 }
 0x130   :  { %v1259_v54 = vpop.eup %1258 }
 0x131   :  { %v40_v38 = vmul.f32 %v1259_v54, %v37_v18  ;;  %v1039_v54 = vld [vmem:[%s1852_s1] ss:$0 sm:$0xff] }
 0x133   :  { %v42_v57 = vsel %vm41_vm0, %v37_v18, %v40_v38 }
 0x134   :  { %v1261_v9 = vpop.eup %1260  ;;  %v45_v10 = vsel %vm43_vm1, %v44_v39, %v42_v57  ;;  %v1040_v39 = vld [vmem:[%s1853_s2] ss:$0 sm:$0xff] }
 0x135   :  { %v53_v56 = vadd.f32 1e-06, %v45_v10  ;;  %v47_v28 = vmul.f32 %v1261_v9, %v38_v30 }
 0x137   :  { %1262 = vrcp.f32 %v53_v56  ;;  %v49_v48 = vsel %vm48_vm2, %v38_v30, %v47_v28 }
 0x138   :  { %v52_v16 = vsel %vm50_vm3, %v51_v46, %v49_v48 }
 0x139   :  { %v54_v31 = vadd.f32 1e-06, %v52_v16 }
 0x13b   :  { %1264 = vrcp.f32 %v54_v31 }
 0x141   :  { %v1263_v49 = vpop.eup %1262 }
 0x142   :  { %v60_v38 = vmul.f32 %v1263_v49, %v1303_v4 }
 0x144   :  { %v68_v18 = vmul.f32 %v1039_v54, %v60_v38 }
 0x145   :  { %v1265_v57 = vpop.eup %1264 }
 0x146   :  { %v77_v9 = vadd.f32 %v1040_v39, %v68_v18  ;;  %v61_v56 = vmul.f32 %v1265_v57, %v1307_v8  ;;  %v1906_v8 = vmov 0.0   ;;  %v1917_v18 = vld [vmem:[#allocation29_spill] sm:$0xff]  ;;  %v1918_v57 = vld [vmem:[#allocation30_spill] sm:$0xff] }
 0x148   :  { %v1709_v28 = vand.u32 4294901760, %v77_v9  ;;  %v69_v46 = vmul.f32 %v1039_v54, %v61_v56  ;;  %v1920_v56 = vld [vmem:[#allocation32_spill] sm:$0xff] }
 0x14a   :  { %v1712_v31 = vsub.f32 %v77_v9, %v1709_v28  ;;  %v78_v48 = vadd.f32 %v1040_v39, %v69_v46  ;;  %v1912_v39 = vld [vmem:[#allocation24_spill] sm:$0xff]  ;;  %v1919_v9 = vld [vmem:[#allocation31_spill] sm:$0xff]  ;;  %v1921_v46 = vld [vmem:[#allocation2_spill] sm:$0xff] }
 0x14c   :  { %v222_v30 = vand.u32 4294901760, %v1712_v31  ;;  %v1715_v10 = vand.u32 4294901760, %v78_v48 }
 0x14e   :  { %726 = vmatmul.mubr.f32.vlgmr.msra.gmra.mrb[0].mxu0 %v222_v30  ;;  %v223_v4 = vsub.f32 %v1712_v31, %v222_v30  ;;  %v1719_v16 = vsub.f32 %v78_v48, %v1715_v10  ;;  %v1922_v48 = vld [vmem:[#allocation3_spill] sm:$0xff]  ;;  %v1939_v30 = vpack.c.bf16 %v1465_v22, %v1463_v21  ;;  %v1947_v22 = vpack.c.bf16 %v1513_v53, %v1511_v52 }
 0x14f   :  { %1172 = vmatpush1.bf16.msra.mxu0 %v1547_v43  ;;  %731 = vmatprep.mubr.f32.mxu0 %v1906_v8  ;;  %v1946_v21 = vld [vmem:[#allocation15_spill] sm:$0xff]  ;;  %v113_v52 = vlaneseq }
 0x150   :  { %1174 = vmatprep.subr.bf16.mxu0 %v1559_v51  ;;  %v224_v49 = vand.u32 4294901760, %v223_v4  ;;  %v233_v54 = vand.u32 4294901760, %v1719_v16  ;;  %v1907_v51 = vld [vmem:[#allocation19_spill] sm:$0xff] }
 0x151   :  { %v114_v53 = vshrl.u32 %v113_v52, 7 }
 0x152   :  { %225 = vmatmul.mubr.f32.vlgmr.msra.gmra.mrb[0].mxu1 %v224_v49  ;;  %735 = vmatmul.mubr.f32.gmra.mrb[2].mxu0 %v233_v54  ;;  %v234_v38 = vsub.f32 %v1719_v16, %v233_v54 }
 0x153   :  { %1076 = vmatpush1.bf16.msra.mxu1 %v1563_v44  ;;  %1176 = vmatpush1.bf16.msra.mxu0 %v1565_v45  ;;  %v1908_v44 = vld [vmem:[#allocation20_spill] sm:$0xff]  ;;  %v1909_v45 = vld [vmem:[#allocation21_spill] sm:$0xff] }
 0x154   :  { %230 = vmatprep.mubr.f32.mxu1 %v1906_v8  ;;  %1078 = vmatprep.subr.bf16.mxu1 %v1573_v17  ;;  %v235_v43 = vand.u32 4294901760, %v234_v38  ;;  %v1910_v17 = vld [vmem:[#allocation22_spill] sm:$0xff] }
 0x155   :  { %1178 = vmatprep.subr.bf16.mxu0 %v1575_v33  ;;  %901 = vmatprep.mubr.f32.mxu0 %v1906_v8  ;;  %v1911_v33 = vld [vmem:[#allocation23_spill] sm:$0xff] }
 0x156   :  { %236 = vmatmul.mubr.f32.gmra.mrb[2].mxu1 %v235_v43 }
 0x157   :  { %1080 = vmatpush1.bf16.msra.mxu1 %v1579_v35  ;;  %1180 = vmatpush1.bf16.msra.mxu0 %v1581_v34  ;;  %v1913_v35 = vld [vmem:[#allocation25_spill] sm:$0xff]  ;;  %v1914_v34 = vld [vmem:[#allocation26_spill] sm:$0xff] }
 0x158   :  { %1082 = vmatprep.subr.bf16.mxu1 %v1589_v23  ;;  %1182 = vmatprep.subr.bf16.mxu0 %v1591_v7  ;;  %v1915_v23 = vld [vmem:[#allocation27_spill] sm:$0xff]  ;;  %v1916_v7 = vld [vmem:[#allocation28_spill] sm:$0xff] }
 0x159   :  { %466 = vmatprep.mubr.f32.mxu1 %v1906_v8 }
 0x15b   :  { %1084 = vmatpush1.bf16.msra.mxu1 %v1907_v51  ;;  %1184 = vmatpush1.bf16.msra.mxu0 %v1908_v44 }
 0x15c   :  { %1086 = vmatprep.subr.bf16.mxu1 %v1909_v45  ;;  %1186 = vmatprep.subr.bf16.mxu0 %v1910_v17 }
 0x15f   :  { %1088 = vmatpush1.bf16.msra.mxu1 %v1911_v33  ;;  %1188 = vmatpush1.bf16.msra.mxu0 %v1912_v39 }
 0x160   :  { %1090 = vmatprep.subr.bf16.mxu1 %v1913_v35  ;;  %1190 = vmatprep.subr.bf16.mxu0 %v1914_v34 }
 0x163   :  { %1092 = vmatpush1.bf16.msra.mxu1 %v1915_v23  ;;  %1192 = vmatpush1.bf16.msra.mxu0 %v1916_v7 }
 0x164   :  { %1094 = vmatprep.subr.bf16.mxu1 %v1917_v18  ;;  %1194 = vmatprep.subr.bf16.mxu0 %v1918_v57 }
 0x167   :  { %1096 = vmatpush1.bf16.msra.mxu1 %v1919_v9  ;;  %1196 = vmatpush1.bf16.msra.mxu0 %v1920_v56 }
 0x168   :  { %1098 = vmatprep.subr.bf16.mxu1 %v1653_v42  ;;  %1198 = vmatprep.subr.bf16.mxu0 %v1655_v36  ;;  %v1923_v42 = vpack.c.bf16 %v1413_v59, %v1410_v58  ;;  %v1924_v36 = vld [vmem:[#allocation4_spill] sm:$0xff]  ;;  %v1928_v58 = vld [vmem:[#allocation6_spill] sm:$0xff]  ;;  %v1929_v59 = vpack.c.bf16 %v1425_v1, %v1423_v0  ;;  %v1935_v0 = vpack.c.bf16 %v1446_v12, %v1444_v11  ;;  %v1942_v11 = vld [vmem:[#allocation13_spill] sm:$0xff] }
 0x169   :  { %v1936_v1 = vld [vmem:[#allocation10_spill] sm:$0xff]  ;;  %v1943_v12 = vpack.c.bf16 %v1489_v41, %v1487_v40  ;;  %v1951_v41 = vpack.c.bf16 %v1530_v27, %v1528_v24  ;;  %v119_v24 = vsub.s32 1, %v114_v53 }
 0x16a   :  { %v1950_v40 = vld [vmem:[#allocation18_spill] sm:$0xff] }
 0x16b   :  { %1100 = vmatpush1.bf16.msra.mxu1 %v1659_v29  ;;  %1200 = vmatpush1.bf16.msra.mxu0 %v1661_v20  ;;  %v1925_v29 = vpack.c.bf16 %v1417_v61, %v1415_v60  ;;  %v1926_v20 = vld [vmem:[#allocation5_spill] sm:$0xff]  ;;  %v1930_v60 = vld [vmem:[#allocation7_spill] sm:$0xff]  ;;  %v1931_v61 = vpack.c.bf16 %v1429_v3, %v1427_v2  ;;  %v1937_v2 = vpack.c.bf16 %v1450_v14, %v1448_v13  ;;  %v1944_v13 = vld [vmem:[#allocation14_spill] sm:$0xff] }
 0x16c   :  { %1102 = vmatprep.subr.bf16.mxu1 %v1665_v37  ;;  %1202 = vmatprep.subr.bf16.mxu0 %v1921_v46  ;;  %v1927_v37 = vpack.c.bf16 %v1421_v63, %v1419_v62  ;;  %v1933_v62 = vpack.c.bf16 %v1433_v6, %v1431_v5  ;;  %v1934_v63 = vld [vmem:[#allocation9_spill] sm:$0xff]  ;;  %v1938_v3 = vld [vmem:[#allocation11_spill] sm:$0xff]  ;;  %v1940_v5 = vld [vmem:[#allocation12_spill] sm:$0xff]  ;;  %v1941_v6 = vpack.c.bf16 %v1474_v26, %v1472_v25 }
 0x16d   :  { %v1945_v14 = vpack.c.bf16 %v1505_v50, %v1503_v47  ;;  %v1948_v25 = vld [vmem:[#allocation16_spill] sm:$0xff]  ;;  %v1949_v26 = vpack.c.bf16 %v1521_v15, %v1515_v55  ;;  %v1952_v47 = vld [vmem:[#allocation17_spill] sm:$0xff]  ;;  %v115_v55 = vsub.s32 0, %v114_v53  ;;  %v111_v15 = vld [vmem:[%s1854_s4] sm:$0x3] }
 0x16e   :  { %903 = vmatmul.mubr.f32.vlgmr.msra.gmra.mrb[0].mxu0 %v1709_v28  ;;  %v1953_v50 = vpack.c.bf16 %v1535_v32, %v1952_v47  ;;  %v120_v4 = vrot.slane %v111_v15, %v119_v24 }
 0x16f   :  { %1104 = vmatpush1.bf16.msra.mxu1 %v1667_v19  ;;  %1204 = vmatpush1.bf16.msra.mxu0 %v1922_v48  ;;  %v1932_v19 = vld [vmem:[#allocation8_spill] sm:$0xff] }
 0x170   :  { %908 = vmatprep.mubr.f32.mxu0 %v1906_v8  ;;  %1106 = vmatprep.subr.bf16.mxu1 %v1923_v42 }
 0x171   :  { %1206 = vmatprep.subr.bf16.mxu0 %v1924_v36 }
 0x172   :  { %468 = vmatmul.mubr.f32.vlgmr.msra.gmra.mrb[0].mxu1 %v1709_v28  ;;  %910 = vmatmul.mubr.f32.gmra.mrb[2].mxu0 %v1715_v10 }
 0x173   :  { %1108 = vmatpush1.bf16.msra.mxu1 %v1925_v29  ;;  %1208 = vmatpush1.bf16.msra.mxu0 %v1926_v20 }
 0x174   :  { %473 = vmatprep.mubr.f32.mxu1 %v1906_v8  ;;  %1110 = vmatprep.subr.bf16.mxu1 %v1927_v37 }
 0x175   :  { %1210 = vmatprep.subr.bf16.mxu0 %v1928_v58  ;;  %1012 = vmatprep.mubr.f32.mxu0 %v1906_v8 }
 0x176   :  { %475 = vmatmul.mubr.f32.gmra.mrb[2].mxu1 %v1715_v10 }
 0x177   :  { %1112 = vmatpush1.bf16.msra.mxu1 %v1929_v59  ;;  %1212 = vmatpush1.bf16.msra.mxu0 %v1930_v60 }
 0x178   :  { %1114 = vmatprep.subr.bf16.mxu1 %v1931_v61  ;;  %1214 = vmatprep.subr.bf16.mxu0 %v1932_v19 }
 0x179   :  { %609 = vmatprep.mubr.f32.mxu1 %v1906_v8 }
 0x17b   :  { %1116 = vmatpush1.bf16.msra.mxu1 %v1933_v62  ;;  %1216 = vmatpush1.bf16.msra.mxu0 %v1934_v63 }
 0x17c   :  { %1118 = vmatprep.subr.bf16.mxu1 %v1935_v0  ;;  %1218 = vmatprep.subr.bf16.mxu0 %v1936_v1 }
 0x17f   :  { %1120 = vmatpush1.bf16.msra.mxu1 %v1937_v2  ;;  %1220 = vmatpush1.bf16.msra.mxu0 %v1938_v3 }
 0x180   :  { %1122 = vmatprep.subr.bf16.mxu1 %v1939_v30  ;;  %1222 = vmatprep.subr.bf16.mxu0 %v1940_v5 }
 0x183   :  { %1124 = vmatpush1.bf16.msra.mxu1 %v1941_v6  ;;  %1224 = vmatpush1.bf16.msra.mxu0 %v1942_v11 }
 0x184   :  { %1126 = vmatprep.subr.bf16.mxu1 %v1943_v12  ;;  %1226 = vmatprep.subr.bf16.mxu0 %v1944_v13 }
 0x187   :  { %1128 = vmatpush1.bf16.msra.mxu1 %v1945_v14  ;;  %1228 = vmatpush1.bf16.msra.mxu0 %v1946_v21 }
 0x188   :  { %1130 = vmatprep.subr.bf16.mxu1 %v1947_v22  ;;  %1230 = vmatprep.subr.bf16.mxu0 %v1948_v25 }
 0x18b   :  { %1132 = vmatpush1.bf16.msra.mxu1 %v1949_v26  ;;  %1232 = vmatpush1.bf16.msra.mxu0 %v1950_v40 }
 0x18c   :  { %1134 = vmatprep.subr.bf16.mxu1 %v1951_v41 }
 0x18e   :  { %1014 = vmatmul.mubr.f32.vlgmr.msra.gmra.mrb[0].mxu0 %v1709_v28  ;;  %v116_v28 = vrot.slane %v111_v15, %v115_v55 }
 0x18f   :  { %1136 = vmatpush1.bf16.msra.mxu1 %v1953_v50  ;;  %1019 = vmatprep.mubr.f32.mxu0 %v1906_v8 }
 0x192   :  { %612 = vmatmul.mubr.f32.vlgmr.msra.gmra.mrb[0].mxu1 %v1712_v31  ;;  %1021 = vmatmul.mubr.f32.gmra.mrb[2].mxu0 %v1715_v10 }
 0x193   :  { %617 = vmatprep.mubr.f32.mxu1 %v1906_v8 }
 0x196   :  { %620 = vmatmul.mubr.f32.gmra.mrb[2].mxu1 %v1719_v16 }
 0x261   :  { %v1015_v27 = vpop.f32.mrb[0].mxu0 }
 0x262   :  { %v1017_v32 = vpop.f32.mrb[1].mxu0 }
 0x265   :  { %v613_v49 = vpop.f32.mrb[0].mxu1  ;;  %v1022_v31 = vpop.f32.mrb[2].mxu0 }
 0x266   :  { %v1233_v54 = vadd.f32 %v613_v49, %v116_v28  ;;  %v615_v10 = vpop.f32.mrb[1].mxu1  ;;  %v1024_v38 = vpop.f32.mrb[3].mxu0 }
 0x267   :  { %v1235_v8 = vadd.f32 %v615_v10, %v120_v4 }
 0x268   :  { %v1234_v43 = vadd.f32 %v1233_v54, %v1015_v27 }
 0x269   :  { %v1236_v16 = vadd.f32 %v1235_v8, %v1017_v32  ;;  %v621_v51 = vpop.f32.mrb[2].mxu1 }
 0x26a   :  { %v1027_v44 = vmax.f32 %v1234_v43, 0.0  ;;  %v1237_v45 = vadd.f32 %v621_v51, %v116_v28  ;;  %v623_v17 = vpop.f32.mrb[3].mxu1 }
 0x26b   :  { %v1028_v33 = vmax.f32 %v1236_v16, 0.0  ;;  %v1239_v39 = vadd.f32 %v623_v17, %v120_v4 }
 0x26c   :  { %1031 = vst [vmem:[%s1855_s5] sm:$0xff] %v1027_v44  ;;  %v1238_v35 = vadd.f32 %v1237_v45, %v1022_v31 }
 0x26d   :  { %1032 = vst [vmem:[%s1855_s5 + $0x8] sm:$0xff] %v1028_v33  ;;  %v1240_v34 = vadd.f32 %v1239_v39, %v1024_v38 }
 0x26e   :  { %v1029_v23 = vmax.f32 %v1238_v35, 0.0 }
 0x26f   :  { %v1030_v7 = vmax.f32 %v1240_v34, 0.0 }
 0x270   :  { %1033 = vst [vmem:[%s1855_s5 + $0x10] sm:$0xff] %v1029_v23 }
 0x271   :  { %1034 = vst [vmem:[%s1855_s5 + $0x18] sm:$0xff] %v1030_v7 }

// kernel: encoder_block_forward.5
= control target key start
LH: loop header
LB: loop body
LE: loop exit
PB: predicated region body
PF: predicated region fallthrough
CT: control target
= control target key end

     0   :  { %9 = vsyncpa [#allocation3], 0  ;;  %s2507_s15 = smov [#allocation2]   ;;  %s3501_s0 = inlined_call_operand.vmem [shape: f32[16,128], index: 0, kind: input, shape index: {}]   ;;  %s3502_s1 = inlined_call_operand.vmem [shape: f32[1,128], index: 1, kind: input, shape index: {}]   ;;  %s3503_s2 = inlined_call_operand.vmem [shape: f32[1,128], index: 2, kind: input, shape index: {}]   ;;  %s3504_s3 = inlined_call_operand.hbm [shape: f32[128,384], index: 3, kind: input, shape index: {}]   ;;  %s3505_s4 = inlined_call_operand.vmem [shape: f32[16,384], index: 4, kind: output, shape index: {}]  }
   0x1   :  { %s21_s16 = sshll.u32 %s2507_s15, 4  ;;  %s2483_s19 = scalar_lea.hbm %s3504_s3, 6144  ;;  %s22_s16 = int_to_ptr.vmem [resolvable:$true] %s21_s16 }
   0x2   :  { %p2484_p0 = scmp.ne.s32.totalorder %s3504_s3, %s2483_s19  ;;  %p2487_p1 = scmp.lt.u32.totalorder %s2483_s19, %s3504_s3 }
   0x4   :  { %p2489_p2 = pnand %p2487_p1, %p2484_p0 }
   0x6   :  { %2492 = shalt.err (!%p2489_p2)
}
   0x7   :  { %s2493_s24 = scalar_lea.vmem %s22_s16, 6144  ;;  %p2498_p4 = scmp.lt.s32.totalorder %s22_s16, %s22_s16 }
   0x8   :  { %p2494_p3 = scmp.ne.s32.totalorder %s22_s16, %s2493_s24  ;;  %p2499_p5 = scmp.lt.s32.totalorder %s2493_s24, %s2493_s24 }
   0xa   :  { %p2500_p6 = por %p2499_p5, %p2498_p4 }
   0xc   :  { %p2501_p7 = pnand %p2500_p6, %p2494_p3 }
   0xe   :  { %2504 = shalt.err (!%p2501_p7)
}
   0xf   :  { %s2508_s25 = smov 384   ;;  %s2509_s26 = smov 24  }
  0x10   :  { %27 = dma.hbm_to_vmem [thread:$0]  %s3504_s3, 6144, %s22_s16, [#allocation3], %s2508_s25, %s2508_s25, %s2509_s26  }
  0x11   :  { %2505 = dma.done.wait [#allocation3], 6144  }
  0x12   :  { %2506 = vsyncadd [#allocation3], 4294961152  ;;  %v31_v0 = vld [vmem:[%s3501_s0] sm:$0xff]  ;;  %v32_v1 = vld [vmem:[%s3501_s0 + $0x8] sm:$0xff] }
  0x13   :  { %33 = vadd.xlane.f32.xlu0 %v31_v0  ;;  %v91_v10 = vld [vmem:[#allocation2 + $0x8] sm:$0xff]  ;;  %v94_v11 = vld [vmem:[#allocation2 + $0x20] sm:$0xff]  ;;  %v93_v15 = vld [vmem:[#allocation2 + $0x18] sm:$0xff] }
  0x14   :  { %v138_v12 = vand.u32 4294901760, %v91_v10  ;;  %v142_v13 = vand.u32 4294901760, %v94_v11  ;;  %v90_v14 = vld [vmem:[#allocation2] sm:$0xff]  ;;  %v144_v17 = vand.u32 4294901760, %v93_v15  ;;  %v97_v20 = vld [vmem:[#allocation2 + $0x38] sm:$0xff]  ;;  %v100_v21 = vld [vmem:[#allocation2 + $0x50] sm:$0xff] }
  0x15   :  { %v140_v16 = vand.u32 4294901760, %v90_v14  ;;  %v2566_v22 = vld [vmem:[#allocation2 + $0x10] sm:$0xff]  ;;  %v146_v23 = vand.u32 4294901760, %v97_v20  ;;  %v150_v24 = vand.u32 4294901760, %v100_v21  ;;  %v2569_v25 = vld [vmem:[#allocation2 + $0x28] sm:$0xff]  ;;  %v106_v36 = vld [vmem:[#allocation2 + $0x80] sm:$0xff] }
  0x16   :  { %v2562_v18 = vpack.c.bf16 %v142_v13, %v138_v12  ;;  %v3511_v26 = vand.u32 4294901760, %v2566_v22  ;;  %v96_v27 = vld [vmem:[#allocation2 + $0x30] sm:$0xff]  ;;  %v99_v28 = vld [vmem:[#allocation2 + $0x48] sm:$0xff]  ;;  %v3510_v29 = vand.u32 4294901760, %v2569_v25  ;;  %v2584_v37 = vld [vmem:[#allocation2 + $0x40] sm:$0xff]  ;;  %v158_v39 = vand.u32 4294901760, %v106_v36 }
  0x17   :  { %35 = vadd.xlane.f32.xlu0 %v32_v1  ;;  %v2564_v19 = vpack.c.bf16 %v144_v17, %v140_v16  ;;  %v148_v30 = vand.u32 4294901760, %v96_v27  ;;  %v152_v31 = vand.u32 4294901760, %v99_v28  ;;  %v2574_v32 = vpack.c.bf16 %v150_v24, %v146_v23  ;;  %v103_v35 = vld [vmem:[#allocation2 + $0x68] sm:$0xff]  ;;  %v2587_v40 = vld [vmem:[#allocation2 + $0x58] sm:$0xff]  ;;  %v102_v42 = vld [vmem:[#allocation2 + $0x60] sm:$0xff] }
  0x18   :  { %3647 = vst [vmem:[#allocation7_spill] sm:$0xff] %v2562_v18  ;;  %2058 = vmatprep.subr.bf16.mxu0 %v2562_v18  ;;  %v2580_v33 = vpack.c.bf16 %v3510_v29, %v3511_v26  ;;  %v154_v38 = vand.u32 4294901760, %v103_v35  ;;  %v3509_v41 = vand.u32 4294901760, %v2584_v37  ;;  %v105_v43 = vld [vmem:[#allocation2 + $0x78] sm:$0xff]  ;;  %v3508_v44 = vand.u32 4294901760, %v2587_v40  ;;  %v112_v51 = vld [vmem:[#allocation2 + $0xb0] sm:$0xff] }
  0x19   :  { %3648 = vst [vmem:[#allocation8_spill] sm:$0xff] %v2564_v19  ;;  %2060 = vmatpush1.bf16.msra.mxu0 %v2564_v19  ;;  %3649 = vst [vmem:[#allocation9_spill] sm:$0xff] %v2574_v32  ;;  %v2582_v34 = vpack.c.bf16 %v152_v31, %v148_v30  ;;  %v156_v45 = vand.u32 4294901760, %v102_v42  ;;  %v160_v46 = vand.u32 4294901760, %v105_v43  ;;  %v109_v50 = vld [vmem:[#allocation2 + $0x98] sm:$0xff]  ;;  %v2604_v52 = vld [vmem:[#allocation2 + $0x70] sm:$0xff]  ;;  %v2613_v62 = vsub.f32 %v91_v10, %v138_v12 }
  0x1a   :  { %3650 = vst [vmem:[#allocation10_spill] sm:$0xff] %v2580_v33  ;;  %2062 = vmatprep.subr.bf16.mxu0 %v2574_v32  ;;  %2250 = vmatprep.subr.bf16.mxu1 %v2580_v33  ;;  %v2594_v47 = vpack.c.bf16 %v158_v39, %v154_v38  ;;  %v2600_v48 = vpack.c.bf16 %v3508_v44, %v3509_v41  ;;  %v162_v53 = vand.u32 4294901760, %v109_v50  ;;  %v166_v54 = vand.u32 4294901760, %v112_v51  ;;  %v2607_v55 = vld [vmem:[#allocation2 + $0x88] sm:$0xff]  ;;  %v108_v56 = vld [vmem:[#allocation2 + $0x90] sm:$0xff]  ;;  %v130_v44 = vld [vmem:[#allocation2 + $0x140] sm:$0xff] }
  0x1b   :  { %3651 = vst [vmem:[#allocation11_spill] sm:$0xff] %v2582_v34  ;;  %2252 = vmatpush3.bf16.msra.mxu1 %v2580_v33  ;;  %v2602_v49 = vpack.c.bf16 %v160_v46, %v156_v45  ;;  %v111_v57 = vld [vmem:[#allocation2 + $0xa8] sm:$0xff]  ;;  %v3507_v58 = vand.u32 4294901760, %v2604_v52  ;;  %v3506_v59 = vand.u32 4294901760, %v2607_v55  ;;  %v164_v60 = vand.u32 4294901760, %v108_v56  ;;  %3655 = vst [vmem:[#allocation15_spill] sm:$0xff] %v2613_v62 }
  0x1c   :  { %3652 = vst [vmem:[#allocation12_spill] sm:$0xff] %v2594_v47  ;;  %3653 = vst [vmem:[#allocation13_spill] sm:$0xff] %v2600_v48  ;;  %2254 = vmatprep.subr.bf16.mxu1 %v2600_v48  ;;  %v168_v61 = vand.u32 4294901760, %v111_v57  ;;  %v2615_v63 = vsub.f32 %v94_v11, %v142_v13  ;;  %v2630_v10 = vsub.f32 %v103_v35, %v154_v38  ;;  %v2684_v41 = vld [vmem:[#allocation2 + $0x100] sm:$0xff] }
  0x1d   :  { %2064 = vmatpush1.bf16.msra.mxu0 %v2582_v34  ;;  %3654 = vst [vmem:[#allocation14_spill] sm:$0xff] %v2602_v49  ;;  %v2632_v11 = vsub.f32 %v106_v36, %v158_v39  ;;  %v2634_v12 = vsub.f32 %v102_v42, %v156_v45  ;;  %v2636_v13 = vsub.f32 %v105_v43, %v160_v46  ;;  %v2664_v45 = vld [vmem:[#allocation2 + $0xd0] sm:$0xff] }
  0x1e   :  { %2066 = vmatprep.subr.bf16.mxu0 %v2594_v47  ;;  %3656 = vst [vmem:[#allocation16_spill] sm:$0xff] %v2615_v63  ;;  %v2658_v35 = vsub.f32 %v111_v57, %v168_v61  ;;  %v123_v57 = vld [vmem:[#allocation2 + $0x108] sm:$0xff] }
  0x1f   :  { %2256 = vmatpush3.bf16.msra.mxu1 %v2600_v48  ;;  %v2717_v48 = vld [vmem:[#allocation2 + $0x148] sm:$0xff] }
  0x21   :  { %2068 = vmatpush1.bf16.msra.mxu0 %v2602_v49  ;;  %v2715_v49 = vld [vmem:[#allocation2 + $0x130] sm:$0xff] }
  0xa0   :  { %v34_v2 = vpop.xlane.xlu0 %33 }
  0xa1   :  { %v38_v3 = vmul.f32 0.0078125, %v34_v2  ;;  %v2622_v2 = vsub.f32 %v97_v20, %v146_v23  ;;  %v2644_v20 = vsub.f32 %v109_v50, %v162_v53  ;;  %v2652_v23 = vpack.c.bf16 %v3506_v59, %v3507_v58 }
  0xa3   :  { %v2554_v4 = vsub.f32 %v31_v0, %v38_v3  ;;  %v2617_v0 = vsub.f32 %v90_v14, %v140_v16  ;;  %3659 = vst [vmem:[#allocation19_spill] sm:$0xff] %v2622_v2  ;;  %v2624_v3 = vsub.f32 %v100_v21, %v150_v24  ;;  %v2638_v14 = vld [vmem:[#allocation2 + $0xa0] sm:$0xff]  ;;  %v2646_v21 = vsub.f32 %v112_v51, %v166_v54  ;;  %v117_v24 = vld [vmem:[#allocation2 + $0xd8] sm:$0xff] }
  0xa4   :  { %v36_v5 = vpop.xlane.xlu0 %35  ;;  %v114_v16 = vld [vmem:[#allocation2 + $0xc0] sm:$0xff]  ;;  %3662 = vst [vmem:[#allocation22_spill] sm:$0xff] %v2652_v23  ;;  %2258 = vmatprep.subr.bf16.mxu1 %v2652_v23  ;;  %v3515_v39 = vand.u32 4294901760, %v2638_v14  ;;  %v176_v50 = vand.u32 4294901760, %v117_v24 }
  0xa5   :  { %3645 = vst [vmem:[#allocation5_spill] sm:$0xff] %v2554_v4  ;;  %v39_v6 = vmul.f32 0.0078125, %v36_v5  ;;  %v42_v7 = vmul.f32 %v2554_v4, %v2554_v4  ;;  %3657 = vst [vmem:[#allocation17_spill] sm:$0xff] %v2617_v0  ;;  %v2626_v5 = vsub.f32 %v96_v27, %v148_v30  ;;  %v121_v27 = vld [vmem:[#allocation2 + $0xf8] sm:$0xff]  ;;  %v2654_v30 = vpack.c.bf16 %v168_v61, %v164_v60 }
  0xa6   :  { %3660 = vst [vmem:[#allocation20_spill] sm:$0xff] %v2624_v3  ;;  %v172_v43 = vand.u32 4294901760, %v114_v16  ;;  %2260 = vmatpush3.bf16.msra.mxu1 %v2652_v23  ;;  %v178_v51 = vand.u32 4294901760, %v121_v27  ;;  %v2688_v26 = vsub.f32 %v117_v24, %v176_v50  ;;  %v184_v24 = vand.u32 4294901760, %v123_v57  ;;  %v129_v23 = vld [vmem:[#allocation2 + $0x138] sm:$0xff] }
  0xa7   :  { %v2558_v8 = vsub.f32 %v32_v1, %v39_v6  ;;  %44 = vadd.xlane.f32.xlu1 %v42_v7  ;;  %v2619_v1 = vsub.f32 %v93_v15, %v144_v17  ;;  %v2628_v6 = vsub.f32 %v99_v28, %v152_v31  ;;  %v115_v7 = vld [vmem:[#allocation2 + $0xc8] sm:$0xff]  ;;  %v2640_v15 = vld [vmem:[#allocation2 + $0xb8] sm:$0xff]  ;;  %v2642_v17 = vpack.c.bf16 %v166_v54, %v162_v53  ;;  %v124_v28 = vld [vmem:[#allocation2 + $0x110] sm:$0xff] }
  0xa8   :  { %3663 = vst [vmem:[#allocation23_spill] sm:$0xff] %v2654_v30  ;;  %v2656_v31 = vsub.f32 %v108_v56, %v164_v60  ;;  %v170_v36 = vand.u32 4294901760, %v115_v7  ;;  %v3514_v42 = vand.u32 4294901760, %v2640_v15  ;;  %v182_v53 = vand.u32 4294901760, %v124_v28  ;;  %v2670_v54 = vld [vmem:[#allocation2 + $0xe8] sm:$0xff]  ;;  %v120_v56 = vld [vmem:[#allocation2 + $0xf0] sm:$0xff] }
  0xa9   :  { %3646 = vst [vmem:[#allocation6_spill] sm:$0xff] %v2558_v8  ;;  %v43_v9 = vmul.f32 %v2558_v8, %v2558_v8  ;;  %3658 = vst [vmem:[#allocation18_spill] sm:$0xff] %v2619_v1  ;;  %2070 = vmatprep.subr.bf16.mxu0 %v2642_v17  ;;  %v2682_v58 = vsub.f32 %v114_v16, %v172_v43  ;;  %v2686_v29 = vpack.c.bf16 %v176_v50, %v172_v43 }
  0xaa   :  { %3661 = vst [vmem:[#allocation21_spill] sm:$0xff] %v2642_v17  ;;  %2072 = vmatpush1.bf16.msra.mxu0 %v2654_v30  ;;  %v2668_v46 = vsub.f32 %v115_v7, %v170_v36  ;;  %v2680_v59 = vpack.c.bf16 %v3514_v42, %v3515_v39  ;;  %v127_v7 = vld [vmem:[#allocation2 + $0x128] sm:$0xff]  ;;  %v126_v30 = vld [vmem:[#allocation2 + $0x120] sm:$0xff]  ;;  %v2698_v16 = vsub.f32 %v124_v28, %v182_v53  ;;  %v3537_v42 = vand.u32 4294901760, %v2664_v45  ;;  %v136_v17 = vld [vmem:[#allocation2 + $0x170] sm:$0xff] }
  0xab   :  { %46 = vadd.xlane.f32.xlu1 %v43_v9  ;;  %v118_v9 = vld [vmem:[#allocation2 + $0xe0] sm:$0xff]  ;;  %3666 = vst [vmem:[#allocation26_spill] sm:$0xff] %v2686_v29  ;;  %v3536_v43 = vand.u32 4294901760, %v2670_v54  ;;  %v180_v39 = vand.u32 4294901760, %v120_v56  ;;  %v190_v50 = vand.u32 4294901760, %v130_v44  ;;  %v2721_v47 = vsub.f32 %v123_v57, %v184_v24 }
  0xac   :  { %v174_v38 = vand.u32 4294901760, %v118_v9  ;;  %3665 = vst [vmem:[#allocation25_spill] sm:$0xff] %v2680_v59  ;;  %2262 = vmatprep.subr.bf16.mxu1 %v2680_v59  ;;  %v3687_v4 = vand.u32 4294901760, %v2569_v25 }
  0xad   :  { %2264 = vmatpush3.bf16.msra.mxu1 %v2680_v59  ;;  %v2710_v28 = vpack.c.bf16 %v3536_v43, %v3537_v42  ;;  %v188_v59 = vand.u32 4294901760, %v126_v30  ;;  %v132_v43 = vld [vmem:[#allocation2 + $0x150] sm:$0xff]  ;;  %v135_v42 = vld [vmem:[#allocation2 + $0x168] sm:$0xff] }
  0xae   :  { %v2672_v60 = vpack.c.bf16 %v174_v38, %v170_v36  ;;  %v2674_v61 = vsub.f32 %v118_v9, %v174_v38  ;;  %v2690_v36 = vpack.c.bf16 %v182_v53, %v178_v51  ;;  %v2692_v9 = vsub.f32 %v121_v27, %v178_v51  ;;  %v2694_v38 = vld [vmem:[#allocation2 + $0x118] sm:$0xff] }
  0xaf   :  { %v186_v27 = vand.u32 4294901760, %v127_v7  ;;  %3668 = vst [vmem:[#allocation28_spill] sm:$0xff] %v2710_v28  ;;  %v2712_v53 = vsub.f32 %v120_v56, %v180_v39  ;;  %v2719_v51 = vpack.c.bf16 %v184_v24, %v180_v39  ;;  %2266 = vmatprep.subr.bf16.mxu1 %v2710_v28  ;;  %v2728_v56 = vsub.f32 %v130_v44, %v190_v50 }
  0xb0   :  { %3664 = vst [vmem:[#allocation24_spill] sm:$0xff] %v2672_v60  ;;  %3667 = vst [vmem:[#allocation27_spill] sm:$0xff] %v2690_v36  ;;  %2074 = vmatprep.subr.bf16.mxu0 %v2672_v60  ;;  %v133_v60 = vld [vmem:[#allocation2 + $0x158] sm:$0xff]  ;;  %v3672_v33 = vand.u32 4294901760, %v2694_v38  ;;  %v192_v39 = vand.u32 4294901760, %v129_v23  ;;  %v2736_v19 = vsub.f32 %v126_v30, %v188_v59  ;;  %v200_v30 = vand.u32 4294901760, %v135_v42 }
  0xb1   :  { %2076 = vmatpush1.bf16.msra.mxu0 %v2686_v29  ;;  %3669 = vst [vmem:[#allocation29_spill] sm:$0xff] %v2719_v51  ;;  %v2725_v34 = vsub.f32 %v127_v7, %v186_v27  ;;  %v3671_v29 = vand.u32 4294901760, %v2684_v41  ;;  %2268 = vmatpush3.bf16.msra.mxu1 %v2710_v28  ;;  %v194_v57 = vand.u32 4294901760, %v133_v60  ;;  %v198_v7 = vand.u32 4294901760, %v136_v17 }
  0xb2   :  { %2078 = vmatprep.subr.bf16.mxu0 %v2690_v36  ;;  %v2723_v36 = vpack.c.bf16 %v190_v50, %v186_v27  ;;  %v2744_v27 = vpack.c.bf16 %v192_v39, %v188_v59  ;;  %v2748_v50 = vld [vmem:[#allocation2 + $0x160] sm:$0xff]  ;;  %v3676_v44 = vand.u32 4294901760, %v2715_v49  ;;  %v2768_v8 = vsub.f32 %v135_v42, %v200_v30 }
  0xb3   :  { %v2734_v32 = vpack.c.bf16 %v3672_v33, %v3671_v29  ;;  %v2746_v29 = vsub.f32 %v129_v23, %v192_v39  ;;  %v196_v33 = vand.u32 4294901760, %v132_v43  ;;  %v2752_v28 = vpack.c.bf16 %v198_v7, %v194_v57 }
  0xb4   :  { %3670 = vst [vmem:[#allocation30_spill] sm:$0xff] %v2723_v36  ;;  %3674 = vst [vmem:[#allocation32_spill] sm:$0xff] %v2744_v27  ;;  %v2754_v18 = vsub.f32 %v133_v60, %v194_v57  ;;  %v2756_v24 = vsub.f32 %v136_v17, %v198_v7  ;;  %v3557_v60 = vand.u32 4294901760, %v2613_v62  ;;  %v3560_v17 = vand.u32 4294901760, %v2615_v63 }
  0xb5   :  { %3673 = vst [vmem:[#allocation31_spill] sm:$0xff] %v2734_v32  ;;  %2080 = vmatpush1.bf16.msra.mxu0 %v2719_v51  ;;  %2270 = vmatprep.subr.bf16.mxu1 %v2734_v32  ;;  %v2750_v51 = vld [vmem:[#allocation2 + $0x178] sm:$0xff]  ;;  %3675 = vst [vmem:[#allocation33_spill] sm:$0xff] %v2752_v28  ;;  %v2764_v23 = vpack.c.bf16 %v200_v30, %v196_v33  ;;  %v2766_v39 = vsub.f32 %v132_v43, %v196_v33  ;;  %v3563_v57 = vand.u32 4294901760, %v2748_v50  ;;  %v3553_v33 = vmov 0.0  }
  0xb6   :  { %2082 = vmatprep.subr.bf16.mxu0 %v2723_v36  ;;  %v3677_v36 = vand.u32 4294901760, %v2717_v48  ;;  %2272 = vmatpush3.bf16.msra.mxu1 %v2734_v32  ;;  %v260_v30 = vsub.f32 %v2613_v62, %v3557_v60  ;;  %v272_v7 = vsub.f32 %v2615_v63, %v3560_v17  ;;  %v3682_v43 = vand.u32 4294901760, %v2566_v22  ;;  %v3731_v62 = vld [vmem:[#allocation17_spill] sm:$0xff]  ;;  %v3732_v63 = vld [vmem:[#allocation18_spill] sm:$0xff] }
  0xb7   :  { %3679 = vst [vmem:[#allocation35_spill] sm:$0xff] %v2764_v23  ;;  %234 = vmatprep.mubr.f32.mxu0 %v3553_v33  ;;  %v3683_v33 = vand.u32 4294901760, %v2617_v0  ;;  %v3684_v60 = vand.u32 4294901760, %v2619_v1  ;;  %v3685_v17 = vand.u32 4294901760, %v2622_v2 }
  0xb8   :  { %v2762_v59 = vpack.c.bf16 %v3677_v36, %v3676_v44  ;;  %v3680_v36 = vand.u32 4294901760, %v2750_v51  ;;  %v2798_v44 = vsub.f32 %v2566_v22, %v3682_v43  ;;  %v261_v22 = vand.u32 4294901760, %v260_v30 }
  0xb9   :  { %2084 = vmatpush1.bf16.msra.mxu0 %v2744_v27  ;;  %v278_v27 = vsub.f32 %v2619_v1, %v3684_v60  ;;  %v284_v32 = vsub.f32 %v2622_v2, %v3685_v17  ;;  %v273_v43 = vand.u32 4294901760, %v272_v7  ;;  %v2818_v60 = vsub.f32 %v2569_v25, %v3687_v4 }
  0xba   :  { %3678 = vst [vmem:[#allocation34_spill] sm:$0xff] %v2762_v59  ;;  %2086 = vmatprep.subr.bf16.mxu0 %v2752_v28  ;;  %2274 = vmatprep.subr.bf16.mxu1 %v2762_v59  ;;  %v2793_v42 = vpack.c.bf16 %v3680_v36, %v3563_v57  ;;  %v266_v28 = vsub.f32 %v2617_v0, %v3683_v33  ;;  %v3686_v36 = vand.u32 4294901760, %v2624_v3  ;;  %v3581_v33 = vand.u32 4294901760, %v2798_v44 }
  0xbb   :  { %2276 = vmatpush3.bf16.msra.mxu1 %v2762_v59  ;;  %v279_v2 = vand.u32 4294901760, %v278_v27  ;;  %v285_v1 = vand.u32 4294901760, %v284_v32  ;;  %v3579_v7 = vand.u32 4294901760, %v2818_v60  ;;  %v3578_v30 = vand.u32 4294901760, %v2626_v5 }
  0xbc   :  { %3681 = vst [vmem:[#allocation36_spill] sm:$0xff] %v2793_v42  ;;  %v296_v57 = vsub.f32 %v2624_v3, %v3686_v36  ;;  %2278 = vmatprep.subr.bf16.mxu1 %v2793_v42  ;;  %v267_v17 = vand.u32 4294901760, %v266_v28  ;;  %v2089_v36 = vpack.c.bf16 %v273_v43, %v261_v22  ;;  %v3577_v4 = vand.u32 4294901760, %v2628_v6 }
  0xbd   :  { %2088 = vmatpush1.bf16.msra.mxu0 %v2764_v23  ;;  %v1147_v23 = vsub.f32 %v2798_v44, %v3581_v33  ;;  %v3580_v25 = vand.u32 4294901760, %v2630_v10  ;;  %v1154_v28 = vsub.f32 %v2818_v60, %v3579_v7  ;;  %v290_v27 = vsub.f32 %v2626_v5, %v3578_v30 }
  0xbe   :  { %v297_v0 = vand.u32 4294901760, %v296_v57  ;;  %v2826_v59 = vpack.c.bf16 %v279_v2, %v267_v17  ;;  %2090 = vmatprep.subr.bf16.mxu0 %v2089_v36  ;;  %v3587_v2 = vand.u32 4294901760, %v2632_v11  ;;  %v3689_v22 = vand.u32 4294901760, %v2587_v40 }
  0xbf   :  { %2280 = vmatpush3.bf16.msra.mxu1 %v2793_v42  ;;  %v1148_v32 = vand.u32 4294901760, %v1147_v23  ;;  %v3688_v23 = vand.u32 4294901760, %v2584_v37  ;;  %v1155_v17 = vand.u32 4294901760, %v1154_v28  ;;  %v291_v36 = vand.u32 4294901760, %v290_v27 }
  0xc0   :  { %v2828_v3 = vpack.c.bf16 %v297_v0, %v285_v1  ;;  %v302_v0 = vsub.f32 %v2628_v6, %v3577_v4  ;;  %v308_v1 = vsub.f32 %v2630_v10, %v3580_v25  ;;  %v2854_v43 = vsub.f32 %v2587_v40, %v3689_v22 }
  0xc1   :  { %v2849_v57 = vsub.f32 %v2584_v37, %v3688_v23  ;;  %v320_v4 = vsub.f32 %v2632_v11, %v3587_v2  ;;  %v3584_v30 = vand.u32 4294901760, %v2634_v12  ;;  %v2862_v23 = vpack.c.bf16 %v1155_v17, %v1148_v32 }
  0xc2   :  { %v303_v7 = vand.u32 4294901760, %v302_v0  ;;  %v309_v25 = vand.u32 4294901760, %v308_v1  ;;  %v3586_v37 = vand.u32 4294901760, %v2854_v43  ;;  %v3588_v28 = vand.u32 4294901760, %v2636_v13 }
  0xc3   :  { %v3585_v33 = vand.u32 4294901760, %v2849_v57  ;;  %3690 = vst [vmem:[#allocation37_spill] sm:$0xff] %v2862_v23  ;;  %v321_v42 = vand.u32 4294901760, %v320_v4  ;;  %v314_v40 = vsub.f32 %v2634_v12, %v3584_v30  ;;  %v3589_v32 = vand.u32 4294901760, %v2644_v20  ;;  %2282 = vmatprep.subr.bf16.mxu1 %v2862_v23 }
  0xc4   :  { %v2868_v27 = vpack.c.bf16 %v303_v7, %v291_v36  ;;  %v1168_v1 = vsub.f32 %v2854_v43, %v3586_v37  ;;  %v326_v7 = vsub.f32 %v2636_v13, %v3588_v28  ;;  %v3591_v17 = vand.u32 4294901760, %v2646_v21 }
  0xc5   :  { %v1161_v0 = vsub.f32 %v2849_v57, %v3585_v33  ;;  %v2878_v4 = vpack.c.bf16 %v321_v42, %v309_v25  ;;  %v315_v22 = vand.u32 4294901760, %v314_v40  ;;  %v332_v33 = vsub.f32 %v2644_v20, %v3589_v32 }
  0xc6   :  { %3691 = vst [vmem:[#allocation38_spill] sm:$0xff] %v2868_v27  ;;  %v1169_v30 = vand.u32 4294901760, %v1168_v1  ;;  %v3693_v37 = vand.u32 4294901760, %v2604_v52  ;;  %v327_v42 = vand.u32 4294901760, %v326_v7  ;;  %v344_v25 = vsub.f32 %v2646_v21, %v3591_v17 }
  0xc7   :  { %3692 = vst [vmem:[#allocation39_spill] sm:$0xff] %v2878_v4  ;;  %v1162_v36 = vand.u32 4294901760, %v1161_v0  ;;  %v3695_v40 = vand.u32 4294901760, %v2607_v55  ;;  %v3592_v0 = vand.u32 4294901760, %v2656_v31  ;;  %v333_v32 = vand.u32 4294901760, %v332_v33 }
  0xc8   :  { %v2890_v2 = vsub.f32 %v2604_v52, %v3693_v37  ;;  %v3594_v52 = vand.u32 4294901760, %v2658_v35  ;;  %v2905_v37 = vpack.c.bf16 %v327_v42, %v315_v22  ;;  %v345_v7 = vand.u32 4294901760, %v344_v25 }
  0xc9   :  { %v2898_v28 = vsub.f32 %v2607_v55, %v3695_v40  ;;  %v2901_v1 = vpack.c.bf16 %v1169_v30, %v1162_v36  ;;  %v338_v17 = vsub.f32 %v2656_v31, %v3592_v0  ;;  %v3596_v30 = vand.u32 4294901760, %v2668_v46 }
  0xca   :  { %3694 = vst [vmem:[#allocation40_spill] sm:$0xff] %v2890_v2  ;;  %v3593_v4 = vand.u32 4294901760, %v2890_v2  ;;  %3698 = vst [vmem:[#allocation43_spill] sm:$0xff] %v2905_v37  ;;  %v350_v33 = vsub.f32 %v2658_v35, %v3594_v52  ;;  %v3598_v22 = vand.u32 4294901760, %v2674_v61  ;;  %v2919_v36 = vpack.c.bf16 %v345_v7, %v333_v32 }
  0xcb   :  { %3696 = vst [vmem:[#allocation41_spill] sm:$0xff] %v2898_v28  ;;  %3697 = vst [vmem:[#allocation42_spill] sm:$0xff] %v2901_v1  ;;  %v3595_v23 = vand.u32 4294901760, %v2898_v28  ;;  %v339_v25 = vand.u32 4294901760, %v338_v17  ;;  %v3700_v40 = vand.u32 4294901760, %v2638_v14  ;;  %v356_v52 = vsub.f32 %v2668_v46, %v3596_v30 }
  0xcc   :  { %v1175_v55 = vsub.f32 %v2890_v2, %v3593_v4  ;;  %3699 = vst [vmem:[#allocation44_spill] sm:$0xff] %v2919_v36  ;;  %v351_v37 = vand.u32 4294901760, %v350_v33  ;;  %v368_v32 = vsub.f32 %v2674_v61, %v3598_v22  ;;  %v3702_v17 = vand.u32 4294901760, %v2640_v15 }
  0xcd   :  { %v1182_v42 = vsub.f32 %v2898_v28, %v3595_v23  ;;  %v2927_v0 = vsub.f32 %v2638_v14, %v3700_v40  ;;  %v3600_v14 = vand.u32 4294901760, %v2682_v58  ;;  %v357_v33 = vand.u32 4294901760, %v356_v52 }
  0xce   :  { %v1176_v4 = vand.u32 4294901760, %v1175_v55  ;;  %v2939_v23 = vsub.f32 %v2640_v15, %v3702_v17  ;;  %v2942_v55 = vpack.c.bf16 %v351_v37, %v339_v25  ;;  %v369_v40 = vand.u32 4294901760, %v368_v32 }
  0xcf   :  { %3701 = vst [vmem:[#allocation45_spill] sm:$0xff] %v2927_v0  ;;  %v1183_v7 = vand.u32 4294901760, %v1182_v42  ;;  %v3599_v36 = vand.u32 4294901760, %v2927_v0  ;;  %v3601_v30 = vand.u32 4294901760, %v2688_v26  ;;  %v362_v15 = vsub.f32 %v2682_v58, %v3600_v14 }
  0xd0   :  { %3703 = vst [vmem:[#allocation46_spill] sm:$0xff] %v2939_v23  ;;  %3704 = vst [vmem:[#allocation47_spill] sm:$0xff] %v2942_v55  ;;  %v3602_v22 = vand.u32 4294901760, %v2939_v23  ;;  %v2954_v17 = vpack.c.bf16 %v369_v40, %v357_v33  ;;  %v3603_v37 = vand.u32 4294901760, %v2692_v9 }
  0xd1   :  { %v2945_v1 = vpack.c.bf16 %v1183_v7, %v1176_v4  ;;  %v1189_v42 = vsub.f32 %v2927_v0, %v3599_v36  ;;  %v374_v52 = vsub.f32 %v2688_v26, %v3601_v30  ;;  %v3606_v4 = vand.u32 4294901760, %v2698_v16 }
  0xd2   :  { %3706 = vst [vmem:[#allocation49_spill] sm:$0xff] %v2954_v17  ;;  %v1196_v32 = vsub.f32 %v2939_v23, %v3602_v22  ;;  %v363_v7 = vand.u32 4294901760, %v362_v15  ;;  %v3707_v36 = vand.u32 4294901760, %v2664_v45  ;;  %v380_v40 = vsub.f32 %v2692_v9, %v3603_v37 }
  0xd3   :  { %3705 = vst [vmem:[#allocation48_spill] sm:$0xff] %v2945_v1  ;;  %v1190_v25 = vand.u32 4294901760, %v1189_v42  ;;  %v375_v33 = vand.u32 4294901760, %v374_v52  ;;  %v392_v30 = vsub.f32 %v2698_v16, %v3606_v4  ;;  %v3709_v42 = vand.u32 4294901760, %v2670_v54 }
  0xd4   :  { %v2967_v14 = vsub.f32 %v2664_v45, %v3707_v36  ;;  %v1197_v15 = vand.u32 4294901760, %v1196_v32  ;;  %v3607_v45 = vand.u32 4294901760, %v2712_v53  ;;  %v3608_v36 = vand.u32 4294901760, %v2721_v47 }
  0xd5   :  { %v2978_v17 = vsub.f32 %v2670_v54, %v3709_v42  ;;  %v2983_v52 = vpack.c.bf16 %v375_v33, %v363_v7  ;;  %v381_v55 = vand.u32 4294901760, %v380_v40  ;;  %v393_v37 = vand.u32 4294901760, %v392_v30 }
  0xd6   :  { %3708 = vst [vmem:[#allocation50_spill] sm:$0xff] %v2967_v14  ;;  %v3605_v22 = vand.u32 4294901760, %v2967_v14  ;;  %v2986_v27 = vpack.c.bf16 %v1197_v15, %v1190_v25  ;;  %v386_v32 = vsub.f32 %v2712_v53, %v3607_v45  ;;  %v398_v42 = vsub.f32 %v2721_v47, %v3608_v36 }
  0xd7   :  { %3710 = vst [vmem:[#allocation51_spill] sm:$0xff] %v2978_v17  ;;  %3711 = vst [vmem:[#allocation52_spill] sm:$0xff] %v2983_v52  ;;  %v3610_v1 = vand.u32 4294901760, %v2978_v17  ;;  %v2997_v7 = vpack.c.bf16 %v393_v37, %v381_v55  ;;  %v3609_v25 = vand.u32 4294901760, %v2725_v34  ;;  %v3611_v33 = vand.u32 4294901760, %v2728_v56 }
  0xd8   :  { %v1203_v54 = vsub.f32 %v2967_v14, %v3605_v22  ;;  %v387_v15 = vand.u32 4294901760, %v386_v32  ;;  %v399_v22 = vand.u32 4294901760, %v398_v42  ;;  %v3713_v4 = vand.u32 4294901760, %v2684_v41 }
  0xd9   :  { %3712 = vst [vmem:[#allocation53_spill] sm:$0xff] %v2997_v7  ;;  %v1210_v30 = vsub.f32 %v2978_v17, %v3610_v1  ;;  %v404_v55 = vsub.f32 %v2725_v34, %v3609_v25  ;;  %v416_v37 = vsub.f32 %v2728_v56, %v3611_v33  ;;  %v3715_v36 = vand.u32 4294901760, %v2694_v38 }
  0xda   :  { %v1204_v40 = vand.u32 4294901760, %v1203_v54  ;;  %v3007_v45 = vsub.f32 %v2684_v41, %v3713_v4  ;;  %v3020_v32 = vpack.c.bf16 %v399_v22, %v387_v15  ;;  %v3612_v41 = vand.u32 4294901760, %v2736_v19 }
  0xdb   :  { %v1211_v52 = vand.u32 4294901760, %v1210_v30  ;;  %v3018_v54 = vsub.f32 %v2694_v38, %v3715_v36  ;;  %v3614_v4 = vand.u32 4294901760, %v2746_v29  ;;  %v405_v25 = vand.u32 4294901760, %v404_v55 }
  0xdc   :  { %3714 = vst [vmem:[#allocation54_spill] sm:$0xff] %v3007_v45  ;;  %3717 = vst [vmem:[#allocation56_spill] sm:$0xff] %v3020_v32  ;;  %v3613_v42 = vand.u32 4294901760, %v3007_v45  ;;  %v417_v1 = vand.u32 4294901760, %v416_v37  ;;  %v410_v38 = vsub.f32 %v2736_v19, %v3612_v41  ;;  %v3618_v36 = vand.u32 4294901760, %v2754_v18 }
  0xdd   :  { %3716 = vst [vmem:[#allocation55_spill] sm:$0xff] %v3018_v54  ;;  %v3025_v30 = vpack.c.bf16 %v1211_v52, %v1204_v40  ;;  %v3615_v7 = vand.u32 4294901760, %v3018_v54  ;;  %v422_v22 = vsub.f32 %v2746_v29, %v3614_v4  ;;  %v3617_v15 = vand.u32 4294901760, %v2756_v24 }
  0xde   :  { %v1217_v33 = vsub.f32 %v3007_v45, %v3613_v42  ;;  %v3038_v52 = vpack.c.bf16 %v417_v1, %v405_v25  ;;  %v3720_v55 = vand.u32 4294901760, %v2715_v49  ;;  %v411_v42 = vand.u32 4294901760, %v410_v38 }
  0xdf   :  { %3718 = vst [vmem:[#allocation57_spill] sm:$0xff] %v3025_v30  ;;  %v1224_v40 = vsub.f32 %v3018_v54, %v3615_v7  ;;  %v423_v32 = vand.u32 4294901760, %v422_v22  ;;  %v428_v4 = vsub.f32 %v2754_v18, %v3618_v36  ;;  %v440_v25 = vsub.f32 %v2756_v24, %v3617_v15 }
  0xe0   :  { %3719 = vst [vmem:[#allocation58_spill] sm:$0xff] %v3038_v52  ;;  %v3047_v37 = vsub.f32 %v2715_v49, %v3720_v55  ;;  %v1218_v41 = vand.u32 4294901760, %v1217_v33  ;;  %v3722_v52 = vand.u32 4294901760, %v2717_v48  ;;  %v3619_v38 = vand.u32 4294901760, %v2766_v39 }
  0xe1   :  { %v1225_v1 = vand.u32 4294901760, %v1224_v40  ;;  %v3061_v49 = vpack.c.bf16 %v423_v32, %v411_v42  ;;  %v429_v33 = vand.u32 4294901760, %v428_v4  ;;  %v3621_v22 = vand.u32 4294901760, %v2768_v8 }
  0xe2   :  { %3721 = vst [vmem:[#allocation59_spill] sm:$0xff] %v3047_v37  ;;  %v3620_v7 = vand.u32 4294901760, %v3047_v37  ;;  %v3059_v30 = vsub.f32 %v2717_v48, %v3722_v52  ;;  %v441_v40 = vand.u32 4294901760, %v440_v25  ;;  %v434_v48 = vsub.f32 %v2766_v39, %v3619_v38 }
  0xe3   :  { %3724 = vst [vmem:[#allocation61_spill] sm:$0xff] %v3061_v49  ;;  %v3065_v55 = vpack.c.bf16 %v1225_v1, %v1218_v41  ;;  %v446_v32 = vsub.f32 %v2768_v8, %v3621_v22  ;;  %v3726_v41 = vand.u32 4294901760, %v2748_v50  ;;  %v3729_v38 = vand.u32 4294901760, %v2750_v51 }
  0xe4   :  { %3723 = vst [vmem:[#allocation60_spill] sm:$0xff] %v3059_v30  ;;  %v1231_v15 = vsub.f32 %v3047_v37, %v3620_v7  ;;  %v3626_v36 = vand.u32 4294901760, %v3059_v30  ;;  %v3084_v52 = vpack.c.bf16 %v441_v40, %v429_v33  ;;  %v435_v22 = vand.u32 4294901760, %v434_v48  ;;  %v3734_v40 = vld [vmem:[#allocation20_spill] sm:$0xff] }
  0xe5   :  { %3725 = vst [vmem:[#allocation62_spill] sm:$0xff] %v3065_v55  ;;  %v3082_v4 = vsub.f32 %v2748_v50, %v3726_v41  ;;  %v3092_v7 = vsub.f32 %v2750_v51, %v3729_v38  ;;  %v447_v49 = vand.u32 4294901760, %v446_v32  ;;  %v3128_v48 = vpack.c.bf16 %v2898_v28, %v2890_v2  ;;  %v3735_v2 = vld [vmem:[#allocation5_spill] sm:$0xff] }
  0xe6   :  { %3728 = vst [vmem:[#allocation64_spill] sm:$0xff] %v3084_v52  ;;  %v1232_v1 = vand.u32 4294901760, %v1231_v15  ;;  %v1238_v25 = vsub.f32 %v3059_v30, %v3626_v36  ;;  %v3733_v15 = vld [vmem:[#allocation19_spill] sm:$0xff]  ;;  %v3102_v36 = vpack.c.bf16 %v2818_v60, %v2798_v44  ;;  %v3146_v50 = vpack.c.bf16 %v2978_v17, %v2967_v14 }
  0xe7   :  { %3727 = vst [vmem:[#allocation63_spill] sm:$0xff] %v3082_v4  ;;  %3730 = vst [vmem:[#allocation65_spill] sm:$0xff] %v3092_v7  ;;  %v3628_v42 = vand.u32 4294901760, %v3082_v4  ;;  %v3629_v33 = vand.u32 4294901760, %v3092_v7  ;;  %v3104_v55 = vpack.c.bf16 %v447_v49, %v435_v22  ;;  %v3120_v49 = vpack.c.bf16 %v2854_v43, %v2849_v57 }
  0xe8   :  { %v1239_v41 = vand.u32 4294901760, %v1238_v25  ;;  %v3138_v22 = vpack.c.bf16 %v2939_v23, %v2927_v0 }
  0xe9   :  { %v1245_v51 = vsub.f32 %v3082_v4, %v3628_v42  ;;  %v1252_v25 = vsub.f32 %v3092_v7, %v3629_v33  ;;  %v3162_v33 = vpack.c.bf16 %v3059_v30, %v3047_v37 }
  0xea   :  { %v3113_v32 = vpack.c.bf16 %v1239_v41, %v1232_v1 }
  0xeb   :  { %v1246_v42 = vand.u32 4294901760, %v1245_v51  ;;  %v1253_v41 = vand.u32 4294901760, %v1252_v25 }
  0xed   :  { %v3134_v52 = vpack.c.bf16 %v1253_v41, %v1246_v42  ;;  %v3154_v41 = vpack.c.bf16 %v3018_v54, %v3007_v45  ;;  %v3168_v42 = vpack.c.bf16 %v3092_v7, %v3082_v4 }
 0x134   :  { %v45_v1 = vpop.xlane.xlu1 %44 }
 0x135   :  { %v48_v54 = vmul.f32 0.007874016, %v45_v1 }
 0x137   :  { %2475 = vrsqrt.f32 %v48_v54  ;;  %vm52_vm0 = vcmp.eq.f32.partialorder %v48_v54, inf  ;;  %v55_v38 = vand.u32 2147483648, %v48_v54  ;;  %vm54_vm1 = vcmp.eq.f32.partialorder %v48_v54, 0.0 }
 0x138   :  { %v47_v45 = vpop.xlane.xlu1 %46 }
 0x139   :  { %v49_v17 = vmul.f32 0.007874016, %v47_v45 }
 0x13b   :  { %2477 = vrsqrt.f32 %v49_v17  ;;  %vm59_vm2 = vcmp.eq.f32.partialorder %v49_v17, inf  ;;  %v62_v28 = vand.u32 2147483648, %v49_v17  ;;  %vm61_vm3 = vcmp.eq.f32.partialorder %v49_v17, 0.0 }
 0x141   :  { %v2476_v51 = vpop.eup %2475 }
 0x142   :  { %v51_v14 = vmul.f32 %v2476_v51, %v48_v54  ;;  %v1737_v51 = vld [vmem:[%s3502_s1] ss:$0 sm:$0xff] }
 0x144   :  { %v53_v23 = vsel %vm52_vm0, %v48_v54, %v51_v14 }
 0x145   :  { %v2478_v30 = vpop.eup %2477  ;;  %v56_v37 = vsel %vm54_vm1, %v55_v38, %v53_v23  ;;  %v1738_v23 = vld [vmem:[%s3503_s2] ss:$0 sm:$0xff] }
 0x146   :  { %v64_v0 = vadd.f32 1e-06, %v56_v37  ;;  %v58_v25 = vmul.f32 %v2478_v30, %v49_v17 }
 0x148   :  { %2479 = vrcp.f32 %v64_v0  ;;  %v60_v7 = vsel %vm59_vm2, %v49_v17, %v58_v25  ;;  %v3736_v0 = vld [vmem:[#allocation6_spill] sm:$0xff] }
 0x149   :  { %v63_v1 = vsel %vm61_vm3, %v62_v28, %v60_v7 }
 0x14a   :  { %v65_v4 = vadd.f32 1e-06, %v63_v1 }
 0x14c   :  { %2481 = vrcp.f32 %v65_v4 }
 0x152   :  { %v2480_v45 = vpop.eup %2479 }
 0x153   :  { %v71_v14 = vmul.f32 %v2480_v45, %v3735_v2 }
 0x155   :  { %v79_v54 = vmul.f32 %v1737_v51, %v71_v14 }
 0x156   :  { %v2482_v30 = vpop.eup %2481 }
 0x157   :  { %v88_v37 = vadd.f32 %v1738_v23, %v79_v54  ;;  %v72_v38 = vmul.f32 %v2482_v30, %v3736_v0  ;;  %v3739_v0 = vld [vmem:[#allocation37_spill] sm:$0xff] }
 0x159   :  { %v3178_v17 = vand.u32 4294901760, %v88_v37  ;;  %v80_v28 = vmul.f32 %v1737_v51, %v72_v38  ;;  %v3740_v38 = vld [vmem:[#allocation39_spill] sm:$0xff] }
 0x15b   :  { %v3181_v7 = vsub.f32 %v88_v37, %v3178_v17  ;;  %v89_v4 = vadd.f32 %v1738_v23, %v80_v28  ;;  %v3737_v23 = vmov 0.0   ;;  %v3738_v37 = vld [vmem:[#allocation38_spill] sm:$0xff] }
 0x15c   :  { %v3741_v28 = vld [vmem:[#allocation42_spill] sm:$0xff] }
 0x15d   :  { %v3184_v25 = vand.u32 4294901760, %v3181_v7  ;;  %v3186_v2 = vand.u32 4294901760, %v89_v4 }
 0x15f   :  { %v238_v1 = vsub.f32 %v3181_v7, %v3184_v25  ;;  %v3191_v45 = vsub.f32 %v89_v4, %v3186_v2  ;;  %v3744_v4 = vld [vmem:[#allocation48_spill] sm:$0xff] }
 0x161   :  { %v239_v14 = vand.u32 4294901760, %v238_v1  ;;  %v3194_v54 = vand.u32 4294901760, %v3191_v45  ;;  %v3745_v1 = vld [vmem:[#allocation47_spill] sm:$0xff] }
 0x163   :  { %240 = vmatmul.mubr.f32.vlgmr.msra.gmra.mrb[0].mxu0 %v239_v14  ;;  %1879 = vmatprep.mubr.f32.mxu1 %v239_v14  ;;  %v249_v51 = vsub.f32 %v3191_v45, %v3194_v54  ;;  %v3746_v14 = vld [vmem:[#allocation49_spill] sm:$0xff] }
 0x164   :  { %2092 = vmatpush1.bf16.msra.mxu0 %v2826_v59  ;;  %245 = vmatprep.mubr.f32.mxu0 %v3737_v23  ;;  %v3742_v59 = vld [vmem:[#allocation43_spill] sm:$0xff] }
 0x165   :  { %2094 = vmatprep.subr.bf16.mxu0 %v2828_v3  ;;  %v250_v30 = vand.u32 4294901760, %v249_v51  ;;  %v3743_v3 = vld [vmem:[#allocation44_spill] sm:$0xff] }
 0x166   :  { %v3747_v51 = vld [vmem:[#allocation52_spill] sm:$0xff] }
 0x167   :  { %251 = vmatmul.mubr.f32.gmra.mrb[2].mxu0 %v250_v30  ;;  %1880 = vmatmul.mubr.f32.vlgmr.msra.gmra.mrb[0].mxu1 %v250_v30  ;;  %v3748_v30 = vld [vmem:[#allocation53_spill] sm:$0xff] }
 0x168   :  { %2096 = vmatpush1.bf16.msra.mxu0 %v3738_v37  ;;  %2284 = vmatpush3.bf16.msra.mxu1 %v3739_v0  ;;  %v3749_v37 = vld [vmem:[#allocation57_spill] sm:$0xff]  ;;  %v3750_v0 = vld [vmem:[#allocation56_spill] sm:$0xff] }
 0x169   :  { %1914 = vmatprep.mubr.f32.mxu1 %v3178_v17  ;;  %2098 = vmatprep.subr.bf16.mxu0 %v3740_v38  ;;  %v3751_v38 = vld [vmem:[#allocation58_spill] sm:$0xff] }
 0x16a   :  { %2286 = vmatprep.subr.bf16.mxu1 %v3741_v28  ;;  %481 = vmatprep.mubr.f32.mxu0 %v3737_v23 }
 0x16c   :  { %2100 = vmatpush1.bf16.msra.mxu0 %v3742_v59  ;;  %2288 = vmatpush3.bf16.msra.mxu1 %v3741_v28  ;;  %v3752_v28 = vld [vmem:[#allocation62_spill] sm:$0xff]  ;;  %v3753_v59 = vld [vmem:[#allocation61_spill] sm:$0xff] }
 0x16d   :  { %2102 = vmatprep.subr.bf16.mxu0 %v3743_v3  ;;  %2290 = vmatprep.subr.bf16.mxu1 %v3744_v4  ;;  %v3754_v3 = vld [vmem:[#allocation64_spill] sm:$0xff] }
 0x170   :  { %2104 = vmatpush1.bf16.msra.mxu0 %v3745_v1  ;;  %2292 = vmatpush3.bf16.msra.mxu1 %v3744_v4  ;;  %v3756_v4 = vld [vmem:[#allocation15_spill] sm:$0xff] }
 0x171   :  { %2106 = vmatprep.subr.bf16.mxu0 %v3746_v14  ;;  %2294 = vmatprep.subr.bf16.mxu1 %v2986_v27  ;;  %v3758_v14 = vpack.c.bf16 %v3732_v63, %v3731_v62 }
 0x174   :  { %2108 = vmatpush1.bf16.msra.mxu0 %v3747_v51  ;;  %2296 = vmatpush3.bf16.msra.mxu1 %v2986_v27  ;;  %v3755_v27 = vld [vmem:[#allocation16_spill] sm:$0xff]  ;;  %v3762_v51 = vpack.c.bf16 %v2636_v13, %v2634_v12 }
 0x175   :  { %2110 = vmatprep.subr.bf16.mxu0 %v3748_v30  ;;  %2298 = vmatprep.subr.bf16.mxu1 %v3749_v37  ;;  %v3757_v1 = vpack.c.bf16 %v3755_v27, %v3756_v4  ;;  %v3763_v30 = vpack.c.bf16 %v2646_v21, %v2644_v20 }
 0x178   :  { %2112 = vmatpush1.bf16.msra.mxu0 %v3750_v0  ;;  %2300 = vmatpush3.bf16.msra.mxu1 %v3749_v37  ;;  %v3765_v37 = vpack.c.bf16 %v2674_v61, %v2668_v46  ;;  %v3767_v0 = vpack.c.bf16 %v2698_v16, %v2692_v9 }
 0x179   :  { %2114 = vmatprep.subr.bf16.mxu0 %v3751_v38  ;;  %2302 = vmatprep.subr.bf16.mxu1 %v3752_v28  ;;  %v3769_v38 = vpack.c.bf16 %v2728_v56, %v2725_v34 }
 0x17c   :  { %2116 = vmatpush1.bf16.msra.mxu0 %v3753_v59  ;;  %2304 = vmatpush3.bf16.msra.mxu1 %v3752_v28  ;;  %v3771_v28 = vpack.c.bf16 %v2756_v24, %v2754_v18  ;;  %v3773_v59 = vld [vmem:[#allocation7_spill] sm:$0xff] }
 0x17d   :  { %2118 = vmatprep.subr.bf16.mxu0 %v3754_v3  ;;  %2306 = vmatprep.subr.bf16.mxu1 %v3113_v32  ;;  %v3774_v3 = vld [vmem:[#allocation8_spill] sm:$0xff] }
 0x180   :  { %2120 = vmatpush1.bf16.msra.mxu0 %v3104_v55  ;;  %2308 = vmatpush3.bf16.msra.mxu1 %v3113_v32  ;;  %v3759_v55 = vpack.c.bf16 %v3734_v40, %v3733_v15  ;;  %v3760_v32 = vpack.c.bf16 %v2628_v6, %v2626_v5 }
 0x181   :  { %2122 = vmatprep.subr.bf16.mxu0 %v3757_v1  ;;  %2310 = vmatprep.subr.bf16.mxu1 %v3134_v52  ;;  %v3776_v1 = vld [vmem:[#allocation10_spill] sm:$0xff] }
 0x183   :  { %483 = vmatmul.mubr.f32.vlgmr.msra.gmra.mrb[0].mxu0 %v3178_v17 }
 0x184   :  { %2124 = vmatpush1.bf16.msra.mxu0 %v3758_v14  ;;  %2312 = vmatpush3.bf16.msra.mxu1 %v3134_v52  ;;  %v3761_v52 = vpack.c.bf16 %v2632_v11, %v2630_v10  ;;  %v3779_v14 = vld [vmem:[#allocation13_spill] sm:$0xff] }
 0x185   :  { %488 = vmatprep.mubr.f32.mxu0 %v3737_v23  ;;  %2126 = vmatprep.subr.bf16.mxu0 %v3759_v55  ;;  %v3781_v55 = vld [vmem:[#allocation21_spill] sm:$0xff] }
 0x186   :  { %2314 = vmatprep.subr.bf16.mxu1 %v3102_v36 }
 0x187   :  { %490 = vmatmul.mubr.f32.gmra.mrb[2].mxu0 %v3186_v2  ;;  %1915 = vmatmul.mubr.f32.vlgmr.msra.gmra.mrb[0].mxu1 %v3186_v2 }
 0x188   :  { %2128 = vmatpush1.bf16.msra.mxu0 %v3760_v32  ;;  %2316 = vmatpush3.bf16.msra.mxu1 %v3102_v36  ;;  %v3764_v36 = vpack.c.bf16 %v2658_v35, %v2656_v31  ;;  %v3782_v32 = vld [vmem:[#allocation22_spill] sm:$0xff] }
 0x189   :  { %1949 = vmatprep.mubr.f32.mxu1 %v3181_v7  ;;  %2130 = vmatprep.subr.bf16.mxu0 %v3761_v52  ;;  %v3784_v52 = vld [vmem:[#allocation24_spill] sm:$0xff] }
 0x18a   :  { %2318 = vmatprep.subr.bf16.mxu1 %v3120_v49  ;;  %624 = vmatprep.mubr.f32.mxu0 %v3737_v23 }
 0x18c   :  { %2132 = vmatpush1.bf16.msra.mxu0 %v3762_v51  ;;  %2320 = vmatpush3.bf16.msra.mxu1 %v3120_v49  ;;  %v3766_v49 = vpack.c.bf16 %v2688_v26, %v2682_v58  ;;  %v3785_v51 = vld [vmem:[#allocation25_spill] sm:$0xff] }
 0x18d   :  { %2134 = vmatprep.subr.bf16.mxu0 %v3763_v30  ;;  %2322 = vmatprep.subr.bf16.mxu1 %v3128_v48  ;;  %v3786_v30 = vld [vmem:[#allocation26_spill] sm:$0xff] }
 0x190   :  { %2136 = vmatpush1.bf16.msra.mxu0 %v3764_v36  ;;  %2324 = vmatpush3.bf16.msra.mxu1 %v3128_v48  ;;  %v3768_v48 = vpack.c.bf16 %v2721_v47, %v2712_v53  ;;  %v3787_v36 = vld [vmem:[#allocation27_spill] sm:$0xff] }
 0x191   :  { %2138 = vmatprep.subr.bf16.mxu0 %v3765_v37  ;;  %2326 = vmatprep.subr.bf16.mxu1 %v3138_v22  ;;  %v3788_v37 = vld [vmem:[#allocation28_spill] sm:$0xff] }
 0x194   :  { %2140 = vmatpush1.bf16.msra.mxu0 %v3766_v49  ;;  %2328 = vmatpush3.bf16.msra.mxu1 %v3138_v22  ;;  %v3770_v22 = vpack.c.bf16 %v2746_v29, %v2736_v19  ;;  %v3789_v49 = vld [vmem:[#allocation29_spill] sm:$0xff] }
 0x195   :  { %2142 = vmatprep.subr.bf16.mxu0 %v3767_v0  ;;  %2330 = vmatprep.subr.bf16.mxu1 %v3146_v50  ;;  %v3790_v0 = vld [vmem:[#allocation30_spill] sm:$0xff] }
 0x198   :  { %2144 = vmatpush1.bf16.msra.mxu0 %v3768_v48  ;;  %2332 = vmatpush3.bf16.msra.mxu1 %v3146_v50  ;;  %v3772_v50 = vpack.c.bf16 %v2768_v8, %v2766_v39  ;;  %v3791_v48 = vld [vmem:[#allocation31_spill] sm:$0xff] }
 0x199   :  { %2146 = vmatprep.subr.bf16.mxu0 %v3769_v38  ;;  %2334 = vmatprep.subr.bf16.mxu1 %v3154_v41  ;;  %v3792_v38 = vld [vmem:[#allocation32_spill] sm:$0xff] }
 0x19c   :  { %2148 = vmatpush1.bf16.msra.mxu0 %v3770_v22  ;;  %2336 = vmatpush3.bf16.msra.mxu1 %v3154_v41  ;;  %v3775_v41 = vld [vmem:[#allocation9_spill] sm:$0xff] }
 0x19d   :  { %2150 = vmatprep.subr.bf16.mxu0 %v3771_v28  ;;  %2338 = vmatprep.subr.bf16.mxu1 %v3162_v33  ;;  %v3793_v22 = vld [vmem:[#allocation33_spill] sm:$0xff]  ;;  %v3794_v28 = vld [vmem:[#allocation34_spill] sm:$0xff] }
 0x1a0   :  { %2152 = vmatpush1.bf16.msra.mxu0 %v3772_v50  ;;  %2340 = vmatpush3.bf16.msra.mxu1 %v3162_v33  ;;  %v3777_v33 = vld [vmem:[#allocation11_spill] sm:$0xff]  ;;  %v3795_v50 = vand.u32 4294901760, %v3756_v4 }
 0x1a1   :  { %2154 = vmatprep.subr.bf16.mxu0 %v3773_v59  ;;  %2342 = vmatprep.subr.bf16.mxu1 %v3168_v42 }
 0x1a3   :  { %627 = vmatmul.mubr.f32.vlgmr.msra.gmra.mrb[0].mxu0 %v3181_v7  ;;  %v3778_v7 = vld [vmem:[#allocation12_spill] sm:$0xff] }
 0x1a4   :  { %2156 = vmatpush1.bf16.msra.mxu0 %v3774_v3  ;;  %2344 = vmatpush3.bf16.msra.mxu1 %v3168_v42  ;;  %v3780_v42 = vld [vmem:[#allocation14_spill] sm:$0xff] }
 0x1a5   :  { %632 = vmatprep.mubr.f32.mxu0 %v3737_v23  ;;  %2158 = vmatprep.subr.bf16.mxu0 %v3775_v41 }
 0x1a6   :  { %2346 = vmatprep.subr.bf16.mxu1 %v3776_v1 }
 0x1a7   :  { %635 = vmatmul.mubr.f32.gmra.mrb[2].mxu0 %v3191_v45  ;;  %1950 = vmatmul.mubr.f32.vlgmr.msra.gmra.mrb[0].mxu1 %v3191_v45  ;;  %v3783_v45 = vld [vmem:[#allocation23_spill] sm:$0xff] }
 0x1a8   :  { %2160 = vmatpush1.bf16.msra.mxu0 %v3777_v33  ;;  %2348 = vmatpush3.bf16.msra.mxu1 %v3776_v1 }
 0x1a9   :  { %1984 = vmatprep.mubr.f32.mxu1 %v3184_v25  ;;  %2162 = vmatprep.subr.bf16.mxu0 %v3778_v7 }
 0x1aa   :  { %2350 = vmatprep.subr.bf16.mxu1 %v3779_v14  ;;  %737 = vmatprep.mubr.f32.mxu0 %v3737_v23 }
 0x1ac   :  { %2164 = vmatpush1.bf16.msra.mxu0 %v3780_v42  ;;  %2352 = vmatpush3.bf16.msra.mxu1 %v3779_v14 }
 0x1ad   :  { %2166 = vmatprep.subr.bf16.mxu0 %v3781_v55  ;;  %2354 = vmatprep.subr.bf16.mxu1 %v3782_v32 }
 0x1b0   :  { %2168 = vmatpush1.bf16.msra.mxu0 %v3783_v45  ;;  %2356 = vmatpush3.bf16.msra.mxu1 %v3782_v32 }
 0x1b1   :  { %2170 = vmatprep.subr.bf16.mxu0 %v3784_v52  ;;  %2358 = vmatprep.subr.bf16.mxu1 %v3785_v51 }
 0x1b4   :  { %2172 = vmatpush1.bf16.msra.mxu0 %v3786_v30  ;;  %2360 = vmatpush3.bf16.msra.mxu1 %v3785_v51  ;;  %v3802_v51 = vand.u32 4294901760, %v3734_v40 }
 0x1b5   :  { %2174 = vmatprep.subr.bf16.mxu0 %v3787_v36  ;;  %2362 = vmatprep.subr.bf16.mxu1 %v3788_v37  ;;  %v3796_v36 = vand.u32 4294901760, %v3755_v27  ;;  %v3803_v27 = vand.u32 4294901760, %v2798_v44  ;;  %v3808_v44 = vand.u32 4294901760, %v2632_v11  ;;  %v3813_v11 = vand.u32 4294901760, %v2644_v20 }
 0x1b6   :  { %v3821_v20 = vand.u32 4294901760, %v2668_v46  ;;  %v3830_v46 = vand.u32 4294901760, %v2698_v16 }
 0x1b7   :  { %v2185_v30 = vpack.c.bf16 %v3796_v36, %v3795_v50  ;;  %v3804_v36 = vand.u32 4294901760, %v2818_v60  ;;  %v3809_v60 = vand.u32 4294901760, %v2849_v57  ;;  %v3814_v57 = vand.u32 4294901760, %v2646_v21 }
 0x1b8   :  { %2176 = vmatpush1.bf16.msra.mxu0 %v3789_v49  ;;  %2364 = vmatpush3.bf16.msra.mxu1 %v3788_v37  ;;  %v3797_v49 = vld [vmem:[#allocation35_spill] sm:$0xff]  ;;  %v3799_v37 = vand.u32 4294901760, %v3732_v63  ;;  %v3806_v63 = vand.u32 4294901760, %v2628_v6  ;;  %v3812_v6 = vand.u32 4294901760, %v2636_v13  ;;  %v3820_v13 = vand.u32 4294901760, %v2658_v35 }
 0x1b9   :  { %2178 = vmatprep.subr.bf16.mxu0 %v3790_v0  ;;  %2366 = vmatprep.subr.bf16.mxu1 %v3791_v48  ;;  %v3798_v0 = vand.u32 4294901760, %v3731_v62  ;;  %v2377_v50 = vpack.c.bf16 %v3804_v36, %v3803_v27  ;;  %v3805_v62 = vand.u32 4294901760, %v2626_v5  ;;  %v3811_v5 = vand.u32 4294901760, %v2634_v12  ;;  %v3823_v36 = vld [vmem:[#allocation45_spill] sm:$0xff] }
 0x1ba   :  { %v3819_v12 = vand.u32 4294901760, %v2656_v31  ;;  %v3822_v21 = vand.u32 4294901760, %v2674_v61  ;;  %v3828_v31 = vand.u32 4294901760, %v2688_v26 }
 0x1bc   :  { %2180 = vmatpush1.bf16.msra.mxu0 %v3792_v38  ;;  %2368 = vmatpush3.bf16.msra.mxu1 %v3791_v48  ;;  %v2187_v38 = vpack.c.bf16 %v3799_v37, %v3798_v0  ;;  %v3800_v48 = vld [vmem:[#allocation36_spill] sm:$0xff]  ;;  %v2201_v27 = vpack.c.bf16 %v3822_v21, %v3821_v20  ;;  %v3851_v21 = vand.u32 4294901760, %v2766_v39  ;;  %v3858_v39 = vld [vmem:[#allocation26_spill] sm:$0xff] }
 0x1bd   :  { %2182 = vmatprep.subr.bf16.mxu0 %v3793_v22  ;;  %2370 = vmatprep.subr.bf16.mxu1 %v3794_v28  ;;  %v3801_v22 = vand.u32 4294901760, %v3733_v15  ;;  %v3807_v15 = vand.u32 4294901760, %v2630_v10  ;;  %v2195_v10 = vpack.c.bf16 %v3812_v6, %v3811_v5  ;;  %v3815_v37 = vld [vmem:[#allocation40_spill] sm:$0xff]  ;;  %v3835_v6 = vand.u32 4294901760, %v2712_v53 }
 0x1be   :  { %v3816_v0 = vand.u32 4294901760, %v3815_v37  ;;  %v3844_v53 = vand.u32 4294901760, %v2746_v29 }
 0x1bf   :  { %v2189_v4 = vpack.c.bf16 %v3802_v51, %v3801_v22  ;;  %v2193_v40 = vpack.c.bf16 %v3808_v44, %v3807_v15  ;;  %v3827_v15 = vand.u32 4294901760, %v2682_v58  ;;  %v3829_v44 = vand.u32 4294901760, %v2692_v9 }
 0x1c0   :  { %2184 = vmatpush1.bf16.msra.mxu0 %v3797_v49  ;;  %2372 = vmatpush3.bf16.msra.mxu1 %v3794_v28  ;;  %v3836_v58 = vand.u32 4294901760, %v2721_v47  ;;  %v3838_v9 = vand.u32 4294901760, %v2728_v56 }
 0x1c1   :  { %2186 = vmatprep.subr.bf16.mxu0 %v2185_v30  ;;  %2374 = vmatprep.subr.bf16.mxu1 %v3800_v48  ;;  %v2191_v30 = vpack.c.bf16 %v3806_v63, %v3805_v62  ;;  %v3825_v62 = vld [vmem:[#allocation46_spill] sm:$0xff]  ;;  %v2203_v35 = vpack.c.bf16 %v3828_v31, %v3827_v15  ;;  %v2205_v61 = vpack.c.bf16 %v3830_v46, %v3829_v44 }
 0x1c2   :  { %v3826_v63 = vand.u32 4294901760, %v3825_v62  ;;  %v2207_v26 = vpack.c.bf16 %v3836_v58, %v3835_v6 }
 0x1c3   :  { %741 = vmatmul.mubr.f32.vlgmr.msra.gmra.mrb[0].mxu0 %v3184_v25  ;;  %v3810_v25 = vand.u32 4294901760, %v2854_v43  ;;  %v2197_v43 = vpack.c.bf16 %v3814_v57, %v3813_v11  ;;  %v3839_v11 = vld [vmem:[#allocation54_spill] sm:$0xff] }
 0x1c4   :  { %2188 = vmatpush1.bf16.msra.mxu0 %v2187_v38  ;;  %2376 = vmatpush3.bf16.msra.mxu1 %v3800_v48  ;;  %v3817_v38 = vld [vmem:[#allocation41_spill] sm:$0xff]  ;;  %v3840_v57 = vand.u32 4294901760, %v3839_v11 }
 0x1c5   :  { %746 = vmatprep.mubr.f32.mxu0 %v3737_v23  ;;  %2190 = vmatprep.subr.bf16.mxu0 %v2189_v4  ;;  %v2381_v51 = vpack.c.bf16 %v3810_v25, %v3809_v60  ;;  %v3818_v22 = vand.u32 4294901760, %v3817_v38  ;;  %v2199_v4 = vpack.c.bf16 %v3820_v13, %v3819_v12  ;;  %v3833_v25 = vld [vmem:[#allocation51_spill] sm:$0xff]  ;;  %v3843_v38 = vand.u32 4294901760, %v2736_v19  ;;  %v3849_v13 = vld [vmem:[#allocation60_spill] sm:$0xff] }
 0x1c6   :  { %2378 = vmatprep.subr.bf16.mxu1 %v2377_v50  ;;  %v3852_v19 = vand.u32 4294901760, %v2768_v8  ;;  %v3857_v8 = vld [vmem:[#allocation25_spill] sm:$0xff] }
 0x1c7   :  { %750 = vmatmul.mubr.f32.gmra.mrb[2].mxu0 %v3194_v54  ;;  %1985 = vmatmul.mubr.f32.vlgmr.msra.gmra.mrb[0].mxu1 %v3194_v54  ;;  %v2385_v54 = vpack.c.bf16 %v3818_v22, %v3816_v0  ;;  %v2211_v47 = vpack.c.bf16 %v3844_v53, %v3843_v38  ;;  %v3845_v22 = vand.u32 4294901760, %v2754_v18  ;;  %v3855_v18 = vld [vmem:[#allocation65_spill] sm:$0xff] }
 0x1c8   :  { %2192 = vmatpush1.bf16.msra.mxu0 %v2191_v30  ;;  %2380 = vmatpush3.bf16.msra.mxu1 %v2377_v50  ;;  %v3824_v50 = vand.u32 4294901760, %v3823_v36  ;;  %v2215_v29 = vpack.c.bf16 %v3852_v19, %v3851_v21 }
 0x1c9   :  { %2019 = vmatprep.mubr.f32.mxu1 %v3178_v17  ;;  %2194 = vmatprep.subr.bf16.mxu0 %v2193_v40  ;;  %v3831_v40 = vld [vmem:[#allocation50_spill] sm:$0xff] }
 0x1ca   :  { %2382 = vmatprep.subr.bf16.mxu1 %v2381_v51  ;;  %916 = vmatprep.mubr.f32.mxu0 %v3737_v23  ;;  %v2389_v30 = vpack.c.bf16 %v3826_v63, %v3824_v50  ;;  %v3832_v60 = vand.u32 4294901760, %v3831_v40  ;;  %v3856_v50 = vand.u32 4294901760, %v3855_v18 }
 0x1cc   :  { %2196 = vmatpush1.bf16.msra.mxu0 %v2195_v10  ;;  %2384 = vmatpush3.bf16.msra.mxu1 %v2381_v51  ;;  %v3834_v51 = vand.u32 4294901760, %v3833_v25  ;;  %v3837_v10 = vand.u32 4294901760, %v2725_v34  ;;  %v3846_v34 = vand.u32 4294901760, %v2756_v24 }
 0x1cd   :  { %2198 = vmatprep.subr.bf16.mxu0 %v2197_v43  ;;  %2386 = vmatprep.subr.bf16.mxu1 %v2385_v54  ;;  %v3841_v43 = vld [vmem:[#allocation55_spill] sm:$0xff] }
 0x1ce   :  { %v2393_v5 = vpack.c.bf16 %v3834_v51, %v3832_v60  ;;  %v2209_v16 = vpack.c.bf16 %v3838_v9, %v3837_v10  ;;  %v3842_v37 = vand.u32 4294901760, %v3841_v43  ;;  %v2213_v56 = vpack.c.bf16 %v3846_v34, %v3845_v22 }
 0x1d0   :  { %2200 = vmatpush1.bf16.msra.mxu0 %v2199_v4  ;;  %2388 = vmatpush3.bf16.msra.mxu1 %v2385_v54  ;;  %v2397_v0 = vpack.c.bf16 %v3842_v37, %v3840_v57  ;;  %v3847_v54 = vld [vmem:[#allocation59_spill] sm:$0xff]  ;;  %v3850_v4 = vand.u32 4294901760, %v3849_v13 }
 0x1d1   :  { %2202 = vmatprep.subr.bf16.mxu0 %v2201_v27  ;;  %2390 = vmatprep.subr.bf16.mxu1 %v2389_v30  ;;  %v3848_v12 = vand.u32 4294901760, %v3847_v54  ;;  %v3853_v27 = vld [vmem:[#allocation63_spill] sm:$0xff] }
 0x1d2   :  { %v3854_v36 = vand.u32 4294901760, %v3853_v27 }
 0x1d3   :  { %v2401_v20 = vpack.c.bf16 %v3850_v4, %v3848_v12 }
 0x1d4   :  { %2204 = vmatpush1.bf16.msra.mxu0 %v2203_v35  ;;  %2392 = vmatpush3.bf16.msra.mxu1 %v2389_v30  ;;  %v2405_v24 = vpack.c.bf16 %v3856_v50, %v3854_v36 }
 0x1d5   :  { %2206 = vmatprep.subr.bf16.mxu0 %v2205_v61  ;;  %2394 = vmatprep.subr.bf16.mxu1 %v2393_v5 }
 0x1d8   :  { %2208 = vmatpush1.bf16.msra.mxu0 %v2207_v26  ;;  %2396 = vmatpush3.bf16.msra.mxu1 %v2393_v5 }
 0x1d9   :  { %2210 = vmatprep.subr.bf16.mxu0 %v2209_v16  ;;  %2398 = vmatprep.subr.bf16.mxu1 %v2397_v0 }
 0x1dc   :  { %2212 = vmatpush1.bf16.msra.mxu0 %v2211_v47  ;;  %2400 = vmatpush3.bf16.msra.mxu1 %v2397_v0 }
 0x1dd   :  { %2214 = vmatprep.subr.bf16.mxu0 %v2213_v56  ;;  %2402 = vmatprep.subr.bf16.mxu1 %v2401_v20 }
 0x1e0   :  { %2216 = vmatpush1.bf16.msra.mxu0 %v2215_v29  ;;  %2404 = vmatpush3.bf16.msra.mxu1 %v2401_v20 }
 0x1e1   :  { %2218 = vmatprep.subr.bf16.mxu0 %v3773_v59  ;;  %2406 = vmatprep.subr.bf16.mxu1 %v2405_v24  ;;  %v3859_v59 = vld [vmem:[#allocation27_spill] sm:$0xff] }
 0x1e3   :  { %918 = vmatmul.mubr.f32.vlgmr.msra.gmra.mrb[0].mxu0 %v3178_v17 }
 0x1e4   :  { %2220 = vmatpush1.bf16.msra.mxu0 %v3774_v3  ;;  %2408 = vmatpush3.bf16.msra.mxu1 %v2405_v24  ;;  %v3860_v3 = vld [vmem:[#allocation28_spill] sm:$0xff] }
 0x1e5   :  { %923 = vmatprep.mubr.f32.mxu0 %v3737_v23  ;;  %2222 = vmatprep.subr.bf16.mxu0 %v3775_v41  ;;  %v3861_v41 = vld [vmem:[#allocation29_spill] sm:$0xff] }
 0x1e6   :  { %2410 = vmatprep.subr.bf16.mxu1 %v3776_v1 }
 0x1e7   :  { %925 = vmatmul.mubr.f32.gmra.mrb[2].mxu0 %v3186_v2  ;;  %2020 = vmatmul.mubr.f32.vlgmr.msra.gmra.mrb[0].mxu1 %v3186_v2 }
 0x1e8   :  { %2224 = vmatpush1.bf16.msra.mxu0 %v3777_v33  ;;  %2412 = vmatpush3.bf16.msra.mxu1 %v3776_v1  ;;  %v3862_v1 = vld [vmem:[#allocation30_spill] sm:$0xff]  ;;  %v3863_v33 = vld [vmem:[#allocation31_spill] sm:$0xff] }
 0x1e9   :  { %2054 = vmatprep.mubr.f32.mxu1 %v3178_v17  ;;  %2226 = vmatprep.subr.bf16.mxu0 %v3778_v7  ;;  %v3864_v7 = vld [vmem:[#allocation32_spill] sm:$0xff] }
 0x1ea   :  { %2414 = vmatprep.subr.bf16.mxu1 %v3779_v14  ;;  %1027 = vmatprep.mubr.f32.mxu0 %v3737_v23 }
 0x1ec   :  { %2228 = vmatpush1.bf16.msra.mxu0 %v3780_v42  ;;  %2416 = vmatpush3.bf16.msra.mxu1 %v3779_v14  ;;  %v3865_v14 = vld [vmem:[#allocation33_spill] sm:$0xff] }
 0x1ed   :  { %2230 = vmatprep.subr.bf16.mxu0 %v3781_v55  ;;  %2418 = vmatprep.subr.bf16.mxu1 %v3782_v32 }
 0x1f0   :  { %2232 = vmatpush1.bf16.msra.mxu0 %v3783_v45  ;;  %2420 = vmatpush3.bf16.msra.mxu1 %v3782_v32 }
 0x1f1   :  { %2234 = vmatprep.subr.bf16.mxu0 %v3784_v52  ;;  %2422 = vmatprep.subr.bf16.mxu1 %v3857_v8 }
 0x1f4   :  { %2236 = vmatpush1.bf16.msra.mxu0 %v3858_v39  ;;  %2424 = vmatpush3.bf16.msra.mxu1 %v3857_v8 }
 0x1f5   :  { %2238 = vmatprep.subr.bf16.mxu0 %v3859_v59  ;;  %2426 = vmatprep.subr.bf16.mxu1 %v3860_v3 }
 0x1f8   :  { %2240 = vmatpush1.bf16.msra.mxu0 %v3861_v41  ;;  %2428 = vmatpush3.bf16.msra.mxu1 %v3860_v3 }
 0x1f9   :  { %2242 = vmatprep.subr.bf16.mxu0 %v3862_v1  ;;  %2430 = vmatprep.subr.bf16.mxu1 %v3863_v33 }
 0x1fc   :  { %2244 = vmatpush1.bf16.msra.mxu0 %v3864_v7  ;;  %2432 = vmatpush3.bf16.msra.mxu1 %v3863_v33 }
 0x1fd   :  { %2246 = vmatprep.subr.bf16.mxu0 %v3865_v14  ;;  %2434 = vmatprep.subr.bf16.mxu1 %v3794_v28 }
 0x200   :  { %2248 = vmatpush1.bf16.msra.mxu0 %v3797_v49  ;;  %2436 = vmatpush3.bf16.msra.mxu1 %v3794_v28 }
 0x201   :  { %2438 = vmatprep.subr.bf16.mxu1 %v3800_v48 }
 0x203   :  { %1029 = vmatmul.mubr.f32.vlgmr.msra.gmra.mrb[0].mxu0 %v3178_v17 }
 0x204   :  { %2440 = vmatpush3.bf16.msra.mxu1 %v3800_v48  ;;  %1034 = vmatprep.mubr.f32.mxu0 %v3737_v23 }
 0x207   :  { %1036 = vmatmul.mubr.f32.gmra.mrb[2].mxu0 %v3186_v2  ;;  %2055 = vmatmul.mubr.f32.vlgmr.msra.gmra.mrb[0].mxu1 %v3186_v2 }
 0x2d6   :  { %v1030_v42 = vpop.f32.mrb[0].mxu0 }
 0x2d7   :  { %1726 = vst [vmem:[%s3505_s4] sm:$0xff] %v1030_v42  ;;  %v1032_v55 = vpop.f32.mrb[1].mxu0 }
 0x2d8   :  { %1727 = vst [vmem:[%s3505_s4 + $0x8] sm:$0xff] %v1032_v55 }
 0x2da   :  { %v1037_v32 = vpop.f32.mrb[2].mxu0  ;;  %v2056_v17 = vpop.f32.mrb[0].mxu1 }
 0x2db   :  { %1729 = vst [vmem:[%s3505_s4 + $0x18] sm:$0xff] %v1037_v32  ;;  %1731 = vst [vmem:[%s3505_s4 + $0x28] sm:$0xff] %v2056_v17  ;;  %v1039_v2 = vpop.f32.mrb[3].mxu0  ;;  %v1716_v23 = vpop.f32.mrb[1].mxu1 }
 0x2dc   :  { %1730 = vst [vmem:[%s3505_s4 + $0x20] sm:$0xff] %v1039_v2  ;;  %1728 = vst [vmem:[%s3505_s4 + $0x10] sm:$0xff] %v1716_v23 }
 0x2dd   :  { %1736 = vsyncpa [#allocation3], 1 }

// kernel: encoder_block_forward.9
= control target key start
LH: loop header
LB: loop body
LE: loop exit
PB: predicated region body
PF: predicated region fallthrough
CT: control target
= control target key end

     0   :  { %s2046_s0 = inlined_call_operand.vmem [shape: f32[16,256], index: 0, kind: input, shape index: {}]   ;;  %s2047_s1 = inlined_call_operand.vmem [shape: f32[256,128], index: 1, kind: input, shape index: {}]   ;;  %s2048_s2 = inlined_call_operand.vmem [shape: f32[1,128], index: 2, kind: input, shape index: {}]   ;;  %s2049_s3 = inlined_call_operand.vmem [shape: f32[16,128], index: 3, kind: input, shape index: {}]   ;;  %s2050_s4 = inlined_call_operand.hbm [shape: f32[16,128], index: 4, kind: output, shape index: {}]  }
   0x1   :  { %v38_v0 = vld [vmem:[%s2047_s1 + $0x80] sm:$0xff]  ;;  %v39_v1 = vld [vmem:[%s2047_s1 + $0x88] sm:$0xff]  ;;  %v40_v7 = vld [vmem:[%s2047_s1 + $0x90] sm:$0xff] }
   0x2   :  { %v22_v2 = vld [vmem:[%s2047_s1] sm:$0xff]  ;;  %v110_v3 = vand.u32 4294901760, %v38_v0  ;;  %v113_v4 = vand.u32 4294901760, %v39_v1  ;;  %v23_v5 = vld [vmem:[%s2047_s1 + $0x8] sm:$0xff]  ;;  %v41_v8 = vld [vmem:[%s2047_s1 + $0x98] sm:$0xff]  ;;  %v116_v10 = vand.u32 4294901760, %v40_v7 }
   0x3   :  { %v62_v6 = vand.u32 4294901760, %v22_v2  ;;  %v65_v9 = vand.u32 4294901760, %v23_v5  ;;  %v119_v11 = vand.u32 4294901760, %v41_v8  ;;  %v24_v12 = vld [vmem:[%s2047_s1 + $0x10] sm:$0xff]  ;;  %v25_v13 = vld [vmem:[%s2047_s1 + $0x18] sm:$0xff]  ;;  %v42_v18 = vld [vmem:[%s2047_s1 + $0xa0] sm:$0xff] }
   0x4   :  { %v1501_v14 = vpack.c.bf16 %v113_v4, %v110_v3  ;;  %v68_v16 = vand.u32 4294901760, %v24_v12  ;;  %v71_v17 = vand.u32 4294901760, %v25_v13  ;;  %v43_v19 = vld [vmem:[%s2047_s1 + $0xa8] sm:$0xff]  ;;  %v26_v23 = vld [vmem:[%s2047_s1 + $0x20] sm:$0xff]  ;;  %v1524_v25 = vsub.f32 %v40_v7, %v116_v10  ;;  %v44_v37 = vld [vmem:[%s2047_s1 + $0xb0] sm:$0xff] }
   0x5   :  { %v1503_v15 = vsub.f32 %v22_v2, %v62_v6  ;;  %v1511_v20 = vpack.c.bf16 %v65_v9, %v62_v6  ;;  %v1513_v21 = vsub.f32 %v23_v5, %v65_v9  ;;  %v1515_v22 = vpack.c.bf16 %v119_v11, %v116_v10  ;;  %v27_v24 = vld [vmem:[%s2047_s1 + $0x28] sm:$0xff]  ;;  %v45_v42 = vld [vmem:[%s2047_s1 + $0xb8] sm:$0xff]  ;;  %v28_v55 = vld [vmem:[%s2047_s1 + $0x30] sm:$0xff] }
   0x6   :  { %1231 = vmatprep.subr.bf16.mxu0 %v1501_v14  ;;  %v1526_v26 = vsub.f32 %v41_v8, %v119_v11  ;;  %v1528_v27 = vpack.c.bf16 %v71_v17, %v68_v16  ;;  %v1530_v28 = vsub.f32 %v24_v12, %v68_v16  ;;  %v122_v29 = vand.u32 4294901760, %v42_v18  ;;  %v29_v56 = vld [vmem:[%s2047_s1 + $0x38] sm:$0xff] }
   0x7   :  { %1233 = vmatpush3.bf16.msra.mxu0 %v1511_v20  ;;  %v125_v30 = vand.u32 4294901760, %v43_v19  ;;  %v1533_v31 = vsub.f32 %v38_v0, %v110_v3  ;;  %v1535_v32 = vsub.f32 %v39_v1, %v113_v4  ;;  %v74_v33 = vand.u32 4294901760, %v26_v23 }
   0x8   :  { %1235 = vmatprep.subr.bf16.mxu0 %v1515_v22  ;;  %v77_v34 = vand.u32 4294901760, %v27_v24  ;;  %v2067_v35 = vand.u32 4294901760, %v1503_v15  ;;  %v2066_v36 = vand.u32 4294901760, %v1513_v21  ;;  %v1543_v38 = vsub.f32 %v25_v13, %v71_v17 }
   0x9   :  { %v1545_v39 = vpack.c.bf16 %v125_v30, %v122_v29  ;;  %v1547_v40 = vsub.f32 %v42_v18, %v122_v29  ;;  %v2072_v41 = vand.u32 4294901760, %v1533_v31  ;;  %v1553_v43 = vsub.f32 %v43_v19, %v125_v30 }
   0xa   :  { %v2069_v44 = vand.u32 4294901760, %v1535_v32  ;;  %v1556_v45 = vpack.c.bf16 %v77_v34, %v74_v33  ;;  %v1558_v46 = vsub.f32 %v26_v23, %v74_v33  ;;  %v192_v48 = vsub.f32 %v1503_v15, %v2067_v35 }
   0xb   :  { %1237 = vmatpush3.bf16.msra.mxu0 %v1528_v27  ;;  %v304_v47 = vsub.f32 %v1533_v31, %v2072_v41  ;;  %v199_v49 = vsub.f32 %v1513_v21, %v2066_v36  ;;  %v128_v50 = vand.u32 4294901760, %v44_v37  ;;  %v131_v52 = vand.u32 4294901760, %v45_v42 }
   0xc   :  { %1239 = vmatprep.subr.bf16.mxu0 %v1545_v39  ;;  %v311_v51 = vsub.f32 %v1535_v32, %v2069_v44  ;;  %v2064_v53 = vand.u32 4294901760, %v1524_v25  ;;  %v2063_v54 = vand.u32 4294901760, %v1526_v26  ;;  %v1582_v58 = vsub.f32 %v27_v24, %v77_v34 }
   0xd   :  { %v305_v57 = vand.u32 4294901760, %v304_v47  ;;  %v193_v59 = vand.u32 4294901760, %v192_v48  ;;  %v200_v60 = vand.u32 4294901760, %v199_v49 }
   0xe   :  { %9 = vsyncpa [#allocation3], 0  ;;  %v312_v61 = vand.u32 4294901760, %v311_v51  ;;  %v1584_v62 = vpack.c.bf16 %v131_v52, %v128_v50  ;;  %v1586_v63 = vsub.f32 %v44_v37, %v128_v50  ;;  %v318_v0 = vsub.f32 %v1524_v25, %v2064_v53  ;;  %v46_v5 = vld [vmem:[%s2047_s1 + $0xc0] sm:$0xff]  ;;  %v47_v6 = vld [vmem:[%s2047_s1 + $0xc8] sm:$0xff]  ;;  %s1449_s10 = smov [#allocation2]  }
   0xf   :  { %1241 = vmatpush3.bf16.msra.mxu0 %v1556_v45  ;;  %v1264_v1 = vpack.c.bf16 %v200_v60, %v193_v59  ;;  %v325_v2 = vsub.f32 %v1526_v26, %v2063_v54  ;;  %v80_v3 = vand.u32 4294901760, %v28_v55  ;;  %v83_v4 = vand.u32 4294901760, %v29_v56  ;;  %v30_v11 = vld [vmem:[%s2047_s1 + $0x40] sm:$0xff]  ;;  %v31_v29 = vld [vmem:[%s2047_s1 + $0x48] sm:$0xff]  ;;  %s990_s11 = sshll.u32 %s1449_s10, 4  ;;  %s991_s11 = int_to_ptr.vmem [resolvable:$true] %s990_s11 }
  0x10   :  { %v1262_v7 = vpack.c.bf16 %v312_v61, %v305_v57  ;;  %1243 = vmatprep.subr.bf16.mxu0 %v1584_v62  ;;  %v319_v8 = vand.u32 4294901760, %v318_v0  ;;  %v2062_v9 = vand.u32 4294901760, %v1530_v28  ;;  %v2059_v10 = vand.u32 4294901760, %v1543_v38  ;;  %v49_v57 = vld [vmem:[%s2047_s1 + $0xd8] sm:$0xff]  ;;  %s1425_s14 = scalar_lea.vmem %s991_s11, 256  ;;  %p1430_p1 = scmp.lt.s32.totalorder %s991_s11, %s991_s11 }
  0x11   :  { %v1607_v12 = vsub.f32 %v45_v42, %v131_v52  ;;  %v326_v13 = vand.u32 4294901760, %v325_v2  ;;  %v1609_v16 = vpack.c.bf16 %v83_v4, %v80_v3  ;;  %v1611_v17 = vsub.f32 %v28_v55, %v80_v3  ;;  %p1426_p0 = scmp.ne.s32.totalorder %s991_s11, %s1425_s14  ;;  %p1431_p2 = scmp.lt.s32.totalorder %s1425_s14, %s1425_s14 }
  0x12   :  { %1263 = vmatprep.subr.bf16.mxu1 %v1262_v7  ;;  %v206_v18 = vsub.f32 %v1530_v28, %v2062_v9  ;;  %v213_v19 = vsub.f32 %v1543_v38, %v2059_v10  ;;  %v134_v23 = vand.u32 4294901760, %v46_v5  ;;  %v137_v24 = vand.u32 4294901760, %v47_v6 }
  0x13   :  { %1265 = vmatpush3.bf16.msra.mxu1 %v1264_v1  ;;  %v1266_v30 = vpack.c.bf16 %v326_v13, %v319_v8  ;;  %1245 = vmatpush3.bf16.msra.mxu0 %v1609_v16  ;;  %v2057_v33 = vand.u32 4294901760, %v1547_v40  ;;  %v2056_v34 = vand.u32 4294901760, %v1553_v43  ;;  %v86_v37 = vand.u32 4294901760, %v30_v11  ;;  %v32_v1 = vld [vmem:[%s2047_s1 + $0x50] sm:$0xff]  ;;  %p1432_p3 = por %p1431_p2, %p1430_p1 }
  0x14   :  { %v1625_v42 = vsub.f32 %v29_v56, %v83_v4  ;;  %v207_v47 = vand.u32 4294901760, %v206_v18  ;;  %v214_v48 = vand.u32 4294901760, %v213_v19  ;;  %v1627_v49 = vpack.c.bf16 %v137_v24, %v134_v23  ;;  %v48_v56 = vld [vmem:[%s2047_s1 + $0xd0] sm:$0xff]  ;;  %v33_v18 = vld [vmem:[%s2047_s1 + $0x58] sm:$0xff] }
  0x15   :  { %1267 = vmatprep.subr.bf16.mxu1 %v1266_v30  ;;  %v1629_v50 = vsub.f32 %v46_v5, %v134_v23  ;;  %v332_v51 = vsub.f32 %v1547_v40, %v2057_v33  ;;  %v339_v52 = vsub.f32 %v1553_v43, %v2056_v34  ;;  %v89_v55 = vand.u32 4294901760, %v31_v29  ;;  %p1433_p4 = pnand %p1432_p3, %p1426_p0 }
  0x16   :  { %v1268_v59 = vpack.c.bf16 %v214_v48, %v207_v47  ;;  %1247 = vmatprep.subr.bf16.mxu0 %v1627_v49  ;;  %v1644_v60 = vsub.f32 %v47_v6, %v137_v24  ;;  %v2054_v61 = vand.u32 4294901760, %v1558_v46  ;;  %v2053_v0 = vand.u32 4294901760, %v1582_v58 }
  0x17   :  { %v333_v2 = vand.u32 4294901760, %v332_v51  ;;  %v340_v3 = vand.u32 4294901760, %v339_v52  ;;  %v1651_v4 = vpack.c.bf16 %v89_v55, %v86_v37  ;;  %v1653_v5 = vsub.f32 %v30_v11, %v86_v37 }
  0x18   :  { %1269 = vmatpush3.bf16.msra.mxu1 %v1268_v59  ;;  %v220_v6 = vsub.f32 %v1558_v46, %v2054_v61  ;;  %v227_v7 = vsub.f32 %v1582_v58, %v2053_v0  ;;  %v140_v8 = vand.u32 4294901760, %v48_v56  ;;  %v143_v13 = vand.u32 4294901760, %v49_v57 }
  0x19   :  { %v1270_v19 = vpack.c.bf16 %v340_v3, %v333_v2  ;;  %1249 = vmatpush3.bf16.msra.mxu0 %v1651_v4  ;;  %v2052_v11 = vand.u32 4294901760, %v1586_v63  ;;  %v2051_v23 = vand.u32 4294901760, %v1607_v12  ;;  %v92_v24 = vand.u32 4294901760, %v32_v1 }
  0x1a   :  { %v1667_v30 = vsub.f32 %v31_v29, %v89_v55  ;;  %v221_v37 = vand.u32 4294901760, %v220_v6  ;;  %v228_v47 = vand.u32 4294901760, %v227_v7  ;;  %v1669_v48 = vpack.c.bf16 %v143_v13, %v140_v8  ;;  %v50_v29 = vld [vmem:[%s2047_s1 + $0xe0] sm:$0xff]  ;;  %v51_v55 = vld [vmem:[%s2047_s1 + $0xe8] sm:$0xff] }
  0x1b   :  { %1271 = vmatprep.subr.bf16.mxu1 %v1270_v19  ;;  %v1671_v51 = vsub.f32 %v48_v56, %v140_v8  ;;  %v346_v52 = vsub.f32 %v1586_v63, %v2052_v11  ;;  %v353_v59 = vsub.f32 %v1607_v12, %v2051_v23  ;;  %v95_v2 = vand.u32 4294901760, %v33_v18  ;;  %v34_v8 = vld [vmem:[%s2047_s1 + $0x60] sm:$0xff] }
  0x1c   :  { %2101 = vst [vmem:[#allocation5_spill] sm:$0xff] %v1669_v48  ;;  %v1272_v3 = vpack.c.bf16 %v228_v47, %v221_v37  ;;  %1251 = vmatprep.subr.bf16.mxu0 %v1669_v48  ;;  %v1686_v56 = vsub.f32 %v49_v57, %v143_v13  ;;  %v2055_v6 = vand.u32 4294901760, %v1611_v17  ;;  %v2058_v7 = vand.u32 4294901760, %v1625_v42 }
  0x1d   :  { %v347_v19 = vand.u32 4294901760, %v346_v52  ;;  %v354_v23 = vand.u32 4294901760, %v353_v59  ;;  %v1693_v11 = vpack.c.bf16 %v95_v2, %v92_v24  ;;  %v1695_v0 = vsub.f32 %v32_v1, %v92_v24  ;;  %v35_v52 = vld [vmem:[%s2047_s1 + $0x68] sm:$0xff] }
  0x1e   :  { %1273 = vmatpush3.bf16.msra.mxu1 %v1272_v3  ;;  %v234_v57 = vsub.f32 %v1611_v17, %v2055_v6  ;;  %v241_v13 = vsub.f32 %v1625_v42, %v2058_v7  ;;  %v146_v37 = vand.u32 4294901760, %v50_v29  ;;  %v149_v47 = vand.u32 4294901760, %v51_v55 }
  0x1f   :  { %2102 = vst [vmem:[#allocation6_spill] sm:$0xff] %v1693_v11  ;;  %v1274_v59 = vpack.c.bf16 %v354_v23, %v347_v19  ;;  %1253 = vmatpush3.bf16.msra.mxu0 %v1693_v11  ;;  %v2061_v1 = vand.u32 4294901760, %v1629_v50  ;;  %v2060_v24 = vand.u32 4294901760, %v1644_v60  ;;  %v98_v3 = vand.u32 4294901760, %v34_v8 }
  0x20   :  { %v1709_v61 = vsub.f32 %v33_v18, %v95_v2  ;;  %v235_v6 = vand.u32 4294901760, %v234_v57  ;;  %v242_v34 = vand.u32 4294901760, %v241_v13  ;;  %v1711_v33 = vpack.c.bf16 %v149_v47, %v146_v37  ;;  %v52_v18 = vld [vmem:[%s2047_s1 + $0xf0] sm:$0xff]  ;;  %v53_v2 = vld [vmem:[%s2047_s1 + $0xf8] sm:$0xff] }
  0x21   :  { %1275 = vmatprep.subr.bf16.mxu1 %v1274_v59  ;;  %v1713_v7 = vsub.f32 %v50_v29, %v146_v37  ;;  %v360_v23 = vsub.f32 %v1629_v50, %v2061_v1  ;;  %v367_v19 = vsub.f32 %v1644_v60, %v2060_v24  ;;  %v101_v10 = vand.u32 4294901760, %v35_v52  ;;  %v36_v59 = vld [vmem:[%s2047_s1 + $0x70] sm:$0xff] }
  0x22   :  { %2103 = vst [vmem:[#allocation7_spill] sm:$0xff] %v1711_v33  ;;  %v1276_v57 = vpack.c.bf16 %v242_v34, %v235_v6  ;;  %1255 = vmatprep.subr.bf16.mxu0 %v1711_v33  ;;  %v1728_v29 = vsub.f32 %v51_v55, %v149_v47  ;;  %v2065_v13 = vand.u32 4294901760, %v1653_v5  ;;  %v2068_v37 = vand.u32 4294901760, %v1667_v30 }
  0x23   :  { %v361_v24 = vand.u32 4294901760, %v360_v23  ;;  %v368_v1 = vand.u32 4294901760, %v367_v19  ;;  %v1735_v9 = vpack.c.bf16 %v101_v10, %v98_v3  ;;  %v1737_v54 = vsub.f32 %v34_v8, %v98_v3  ;;  %v37_v23 = vld [vmem:[%s2047_s1 + $0x78] sm:$0xff] }
  0x24   :  { %1277 = vmatpush3.bf16.msra.mxu1 %v1276_v57  ;;  %v248_v34 = vsub.f32 %v1653_v5, %v2065_v13  ;;  %v255_v55 = vsub.f32 %v1667_v30, %v2068_v37  ;;  %v152_v6 = vand.u32 4294901760, %v52_v18  ;;  %v155_v47 = vand.u32 4294901760, %v53_v2 }
  0x25   :  { %2104 = vst [vmem:[#allocation8_spill] sm:$0xff] %v1735_v9  ;;  %v1278_v19 = vpack.c.bf16 %v368_v1, %v361_v24  ;;  %1257 = vmatpush3.bf16.msra.mxu0 %v1735_v9  ;;  %v2071_v8 = vand.u32 4294901760, %v1671_v51  ;;  %v2070_v3 = vand.u32 4294901760, %v1686_v56  ;;  %v104_v57 = vand.u32 4294901760, %v36_v59 }
  0x26   :  { %v1751_v53 = vsub.f32 %v35_v52, %v101_v10  ;;  %v249_v13 = vand.u32 4294901760, %v248_v34  ;;  %v256_v36 = vand.u32 4294901760, %v255_v55  ;;  %v1753_v35 = vpack.c.bf16 %v155_v47, %v152_v6  ;;  %v19_v10 = vld [vmem:[%s2046_s0 + $0x8] sm:$0xff] }
  0x27   :  { %1279 = vmatprep.subr.bf16.mxu1 %v1278_v19  ;;  %v1755_v37 = vsub.f32 %v52_v18, %v152_v6  ;;  %v374_v1 = vsub.f32 %v1671_v51, %v2071_v8  ;;  %v381_v24 = vsub.f32 %v1686_v56, %v2070_v3  ;;  %v107_v44 = vand.u32 4294901760, %v37_v23  ;;  %v18_v6 = vld [vmem:[%s2046_s0] sm:$0xff] }
  0x28   :  { %2105 = vst [vmem:[#allocation9_spill] sm:$0xff] %v1753_v35  ;;  %v1280_v52 = vpack.c.bf16 %v256_v36, %v249_v13  ;;  %1259 = vmatprep.subr.bf16.mxu0 %v1753_v35  ;;  %v1767_v34 = vsub.f32 %v53_v2, %v155_v47  ;;  %v2075_v18 = vand.u32 4294901760, %v1695_v0  ;;  %v2076_v55 = vand.u32 4294901760, %v1709_v61 }
  0x29   :  { %v375_v19 = vand.u32 4294901760, %v374_v1  ;;  %v382_v3 = vand.u32 4294901760, %v381_v24  ;;  %v1774_v8 = vpack.c.bf16 %v107_v44, %v104_v57  ;;  %v1776_v41 = vsub.f32 %v36_v59, %v104_v57 }
  0x2a   :  { %1281 = vmatpush3.bf16.msra.mxu1 %v1280_v52  ;;  %v262_v36 = vsub.f32 %v1695_v0, %v2075_v18  ;;  %v269_v2 = vsub.f32 %v1709_v61, %v2076_v55  ;;  %v1784_v13 = vand.u32 4294901760, %v19_v10  ;;  %v2079_v47 = vand.u32 4294901760, %v1713_v7 }
  0x2b   :  { %2106 = vst [vmem:[#allocation10_spill] sm:$0xff] %v1774_v8  ;;  %v1282_v35 = vpack.c.bf16 %v382_v3, %v375_v19  ;;  %1261 = vmatpush3.bf16.msra.mxu0 %v1774_v8  ;;  %v2085_v1 = vand.u32 4294901760, %v1728_v29  ;;  %v1294_v59 = vpack.c.bf16 %v1535_v32, %v1533_v31  ;;  %v1791_v57 = vand.u32 4294901760, %v18_v6 }
  0x2c   :  { %2107 = vst [vmem:[#allocation11_spill] sm:$0xff] %v1784_v13  ;;  %v263_v24 = vand.u32 4294901760, %v262_v36  ;;  %v270_v52 = vand.u32 4294901760, %v269_v2  ;;  %v1794_v18 = vsub.f32 %v19_v10, %v1784_v13  ;;  %v388_v55 = vsub.f32 %v1713_v7, %v2079_v47  ;;  %413 = vmatprep.mubr.f32.mxu1 %v1784_v13 }
  0x2d   :  { %1283 = vmatprep.subr.bf16.mxu1 %v1282_v35  ;;  %v395_v3 = vsub.f32 %v1728_v29, %v2085_v1  ;;  %1295 = vmatprep.subr.bf16.mxu0 %v1294_v59  ;;  %v1804_v19 = vsub.f32 %v18_v6, %v1791_v57  ;;  %v2084_v36 = vand.u32 4294901760, %v1737_v54  ;;  %v2086_v10 = vand.u32 4294901760, %v1751_v53 }
  0x2e   :  { %v1808_v2 = vsub.f32 %v37_v23, %v107_v44  ;;  %v1284_v8 = vpack.c.bf16 %v270_v52, %v263_v24  ;;  %v2087_v47 = vand.u32 4294901760, %v1794_v18  ;;  %v389_v9 = vand.u32 4294901760, %v388_v55 }
  0x2f   :  { %2108 = vst [vmem:[#allocation12_spill] sm:$0xff] %v1804_v19  ;;  %v396_v13 = vand.u32 4294901760, %v395_v3  ;;  %v2090_v35 = vand.u32 4294901760, %v1804_v19  ;;  %v276_v59 = vsub.f32 %v1737_v54, %v2084_v36  ;;  %v283_v6 = vsub.f32 %v1751_v53, %v2086_v10 }
  0x30   :  { %1285 = vmatpush3.bf16.msra.mxu1 %v1284_v8  ;;  %v160_v44 = vsub.f32 %v1794_v18, %v2087_v47  ;;  %v1296_v23 = vpack.c.bf16 %v1513_v21, %v1503_v15  ;;  %v2091_v55 = vand.u32 4294901760, %v1755_v37  ;;  %v2092_v24 = vand.u32 4294901760, %v1767_v34 }
  0x31   :  { %v1286_v52 = vpack.c.bf16 %v396_v13, %v389_v9  ;;  %v166_v3 = vsub.f32 %v1804_v19, %v2090_v35  ;;  %v277_v36 = vand.u32 4294901760, %v276_v59  ;;  %v284_v1 = vand.u32 4294901760, %v283_v6  ;;  %v21_v9 = vld [vmem:[%s2046_s0 + $0x18] sm:$0xff] }
  0x32   :  { %v161_v10 = vand.u32 4294901760, %v160_v44  ;;  %v402_v8 = vsub.f32 %v1755_v37, %v2091_v55  ;;  %v409_v47 = vsub.f32 %v1767_v34, %v2092_v24  ;;  %v2094_v33 = vand.u32 4294901760, %v1776_v41 }
  0x33   :  { %1287 = vmatprep.subr.bf16.mxu1 %v1286_v52  ;;  %v167_v13 = vand.u32 4294901760, %v166_v3  ;;  %v1288_v35 = vpack.c.bf16 %v284_v1, %v277_v36  ;;  %v1298_v59 = vpack.c.bf16 %v1526_v26, %v1524_v25  ;;  %v2093_v6 = vand.u32 4294901760, %v1808_v2  ;;  %v20_v1 = vld [vmem:[%s2046_s0 + $0x10] sm:$0xff] }
  0x34   :  { %162 = vmatprep.mubr.f32.mxu0 %v161_v10  ;;  %v403_v44 = vand.u32 4294901760, %v402_v8  ;;  %v410_v55 = vand.u32 4294901760, %v409_v47  ;;  %v290_v24 = vsub.f32 %v1776_v41, %v2094_v33  ;;  %v1847_v3 = vand.u32 4294901760, %v21_v9 }
  0x35   :  { %168 = vmatmul.mubr.f32.vlgmr.msra.gmra.mrb[0].mxu0 %v167_v13  ;;  %1289 = vmatpush3.bf16.msra.mxu1 %v1288_v35  ;;  %v297_v52 = vsub.f32 %v1808_v2, %v2093_v6  ;;  %v1300_v47 = vpack.c.bf16 %v1543_v38, %v1530_v28  ;;  %v1302_v35 = vpack.c.bf16 %v1553_v43, %v1547_v40  ;;  %v1859_v6 = vand.u32 4294901760, %v20_v1 }
  0x36   :  { %1297 = vmatpush3.bf16.msra.mxu0 %v1296_v23  ;;  %v1290_v36 = vpack.c.bf16 %v410_v55, %v403_v44  ;;  %v291_v10 = vand.u32 4294901760, %v290_v24  ;;  %v1857_v13 = vsub.f32 %v21_v9, %v1847_v3  ;;  %v1304_v23 = vpack.c.bf16 %v1582_v58, %v1558_v46 }
  0x37   :  { %1299 = vmatprep.subr.bf16.mxu0 %v1298_v59  ;;  %v298_v8 = vand.u32 4294901760, %v297_v52  ;;  %v1306_v55 = vpack.c.bf16 %v1607_v12, %v1586_v63  ;;  %v2109_v24 = vand.u32 4294901760, %v1533_v31  ;;  %v2110_v59 = vand.u32 4294901760, %v1535_v32 }
  0x38   :  { %1291 = vmatprep.subr.bf16.mxu1 %v1290_v36  ;;  %v174_v52 = vand.u32 4294901760, %v1857_v13  ;;  %v1871_v9 = vsub.f32 %v20_v1, %v1859_v6  ;;  %v2111_v36 = vand.u32 4294901760, %v1503_v15  ;;  %v2113_v19 = vand.u32 4294901760, %v1524_v25 }
  0x39   :  { %v1292_v33 = vpack.c.bf16 %v298_v8, %v291_v10  ;;  %v1358_v44 = vpack.c.bf16 %v2110_v59, %v2109_v24  ;;  %v2112_v10 = vand.u32 4294901760, %v1513_v21  ;;  %v2114_v11 = vand.u32 4294901760, %v1526_v26 }
  0x3a   :  { %1301 = vmatpush3.bf16.msra.mxu0 %v1300_v47  ;;  %v2115_v31 = vand.u32 4294901760, %v1530_v28  ;;  %v2116_v32 = vand.u32 4294901760, %v1543_v38  ;;  %v2117_v1 = vand.u32 4294901760, %v1547_v40  ;;  %v2118_v24 = vand.u32 4294901760, %v1553_v43 }
  0x3b   :  { %v1360_v8 = vpack.c.bf16 %v2112_v10, %v2111_v36  ;;  %v1362_v48 = vpack.c.bf16 %v2114_v11, %v2113_v19  ;;  %1293 = vmatpush3.bf16.msra.mxu1 %v1292_v33  ;;  %1303 = vmatprep.subr.bf16.mxu0 %v1302_v35  ;;  %v2119_v21 = vand.u32 4294901760, %v1558_v46  ;;  %v2120_v59 = vand.u32 4294901760, %v1582_v58 }
  0x3c   :  { %v1364_v47 = vpack.c.bf16 %v2116_v32, %v2115_v31  ;;  %v1366_v15 = vpack.c.bf16 %v2118_v24, %v2117_v1  ;;  %1327 = vmatprep.subr.bf16.mxu1 %v1501_v14  ;;  %v175_v26 = vsub.f32 %v1857_v13, %v174_v52  ;;  %v180_v28 = vand.u32 4294901760, %v1871_v9 }
  0x3d   :  { %v1893_v25 = vpack.c.bf16 %v2120_v59, %v2119_v21  ;;  %v2121_v38 = vand.u32 4294901760, %v1586_v63  ;;  %v2122_v40 = vand.u32 4294901760, %v1607_v12  ;;  %v2123_v33 = vand.u32 4294901760, %v1611_v17  ;;  %v2131_v21 = vld [vmem:[#allocation6_spill] sm:$0xff]  ;;  %v2132_v59 = vld [vmem:[#allocation7_spill] sm:$0xff] }
  0x3e   :  { %v2124_v46 = vand.u32 4294901760, %v1625_v42  ;;  %v2125_v11 = vand.u32 4294901760, %v1629_v50  ;;  %v2126_v19 = vand.u32 4294901760, %v1644_v60  ;;  %v2127_v36 = vand.u32 4294901760, %v1653_v5  ;;  %415 = vmatmul.mubr.f32.vlgmr.msra.gmra.mrb[0].mxu1 %v1791_v57  ;;  %1305 = vmatpush3.bf16.msra.mxu0 %v1304_v23 }
  0x3f   :  { %v1370_v43 = vpack.c.bf16 %v2122_v40, %v2121_v38  ;;  %v2128_v10 = vand.u32 4294901760, %v1667_v30  ;;  %v1308_v12 = vpack.c.bf16 %v1625_v42, %v1611_v17  ;;  %v176_v31 = vand.u32 4294901760, %v175_v26  ;;  %1329 = vmatpush3.bf16.msra.mxu1 %v1511_v20  ;;  %1307 = vmatprep.subr.bf16.mxu0 %v1306_v55  ;;  %v2130_v55 = vld [vmem:[#allocation5_spill] sm:$0xff]  ;;  %v2133_v26 = vld [vmem:[#allocation12_spill] sm:$0xff] }
  0x40   :  { %v1908_v58 = vpack.c.bf16 %v2124_v46, %v2123_v33  ;;  %v1914_v35 = vpack.c.bf16 %v2126_v19, %v2125_v11  ;;  %v181_v32 = vsub.f32 %v1871_v9, %v180_v28  ;;  %v1310_v1 = vpack.c.bf16 %v1644_v60, %v1629_v50  ;;  %1331 = vmatprep.subr.bf16.mxu1 %v1515_v22  ;;  %v2134_v38 = vld [vmem:[#allocation8_spill] sm:$0xff]  ;;  %v2135_v40 = vld [vmem:[#allocation9_spill] sm:$0xff]  ;;  %v2136_v33 = vld [vmem:[#allocation11_spill] sm:$0xff] }
  0x41   :  { %v1920_v63 = vpack.c.bf16 %v2128_v10, %v2127_v36  ;;  %177 = vmatprep.mubr.f32.mxu0 %v176_v31  ;;  %420 = vmatprep.mubr.f32.mxu1 %v1847_v3  ;;  %v1312_v17 = vpack.c.bf16 %v1667_v30, %v1653_v5  ;;  %v1314_v42 = vpack.c.bf16 %v1686_v56, %v1671_v51  ;;  %v2129_v50 = vand.u32 4294901760, %v1794_v18  ;;  %v2137_v46 = vld [vmem:[#allocation10_spill] sm:$0xff] }
  0x42   :  { %v182_v24 = vand.u32 4294901760, %v181_v32  ;;  %1309 = vmatpush3.bf16.msra.mxu0 %v1308_v12  ;;  %422 = vmatmul.mubr.f32.gmra.mrb[2].mxu1 %v1859_v6  ;;  %v1316_v60 = vpack.c.bf16 %v1709_v61, %v1695_v0  ;;  %v1318_v5 = vpack.c.bf16 %v1728_v29, %v1713_v7  ;;  %v1320_v30 = vpack.c.bf16 %v1751_v53, %v1737_v54 }
  0x43   :  { %1333 = vmatpush3.bf16.msra.mxu1 %v1528_v27  ;;  %1311 = vmatprep.subr.bf16.mxu0 %v1310_v1  ;;  %v1324_v23 = vpack.c.bf16 %v1808_v2, %v1776_v41 }
  0x44   :  { %1335 = vmatprep.subr.bf16.mxu1 %v1545_v39  ;;  %183 = vmatmul.mubr.f32.gmra.mrb[2].mxu0 %v182_v24 }
  0x45   :  { %557 = vmatprep.mubr.f32.mxu0 %v1794_v18  ;;  %673 = vmatprep.mubr.f32.mxu1 %v2129_v50  ;;  %v1322_v18 = vpack.c.bf16 %v1767_v34, %v1755_v37 }
  0x46   :  { %1313 = vmatpush3.bf16.msra.mxu0 %v1312_v17 }
  0x47   :  { %1337 = vmatpush3.bf16.msra.mxu1 %v1556_v45  ;;  %1315 = vmatprep.subr.bf16.mxu0 %v1314_v42 }
  0x48   :  { %1339 = vmatprep.subr.bf16.mxu1 %v1584_v62 }
  0x4a   :  { %1317 = vmatpush3.bf16.msra.mxu0 %v1316_v60 }
  0x4b   :  { %1341 = vmatpush3.bf16.msra.mxu1 %v1609_v16  ;;  %1319 = vmatprep.subr.bf16.mxu0 %v1318_v5 }
  0x4c   :  { %1343 = vmatprep.subr.bf16.mxu1 %v1627_v49 }
  0x4e   :  { %1321 = vmatpush3.bf16.msra.mxu0 %v1320_v30 }
  0x4f   :  { %1345 = vmatpush3.bf16.msra.mxu1 %v1651_v4  ;;  %1323 = vmatprep.subr.bf16.mxu0 %v1322_v18 }
  0x50   :  { %1347 = vmatprep.subr.bf16.mxu1 %v2130_v55 }
  0x52   :  { %1325 = vmatpush3.bf16.msra.mxu0 %v1324_v23 }
  0x53   :  { %1349 = vmatpush3.bf16.msra.mxu1 %v2131_v21  ;;  %1359 = vmatprep.subr.bf16.mxu0 %v1358_v44  ;;  %v2138_v44 = vand.u32 4294901760, %v2133_v26 }
  0x54   :  { %1351 = vmatprep.subr.bf16.mxu1 %v2132_v59 }
  0x55   :  { %560 = vmatmul.mubr.f32.vlgmr.msra.gmra.mrb[4].mxu0 %v2133_v26 }
  0x56   :  { %1361 = vmatpush3.bf16.msra.mxu0 %v1360_v8  ;;  %566 = vmatprep.mubr.f32.mxu0 %v1857_v13  ;;  %v2142_v13 = vand.u32 4294901760, %v1709_v61  ;;  %v2147_v61 = vand.u32 4294901760, %v1755_v37 }
  0x57   :  { %1353 = vmatpush3.bf16.msra.mxu1 %v2134_v38  ;;  %1363 = vmatprep.subr.bf16.mxu0 %v1362_v48  ;;  %v2140_v48 = vand.u32 4294901760, %v1686_v56 }
  0x58   :  { %1355 = vmatprep.subr.bf16.mxu1 %v2135_v40 }
  0x59   :  { %569 = vmatmul.mubr.f32.gmra.mrb[6].mxu0 %v1871_v9  ;;  %v2146_v9 = vand.u32 4294901760, %v1751_v53 }
  0x5a   :  { %1365 = vmatpush3.bf16.msra.mxu0 %v1364_v47  ;;  %854 = vmatprep.mubr.f32.mxu0 %v2136_v33 }
  0x5b   :  { %1357 = vmatpush3.bf16.msra.mxu1 %v2137_v46  ;;  %1367 = vmatprep.subr.bf16.mxu0 %v1366_v15 }
  0x5c   :  { %1391 = vmatprep.subr.bf16.mxu1 %v1501_v14  ;;  %v2139_v14 = vand.u32 4294901760, %v1671_v51  ;;  %v2144_v51 = vand.u32 4294901760, %v1728_v29 }
  0x5e   :  { %677 = vmatmul.mubr.f32.vlgmr.msra.gmra.mrb[4].mxu1 %v2138_v44  ;;  %1369 = vmatpush3.bf16.msra.mxu0 %v1893_v25 }
  0x5f   :  { %1393 = vmatpush3.bf16.msra.mxu1 %v1511_v20  ;;  %684 = vmatprep.mubr.f32.mxu1 %v174_v52  ;;  %v1378_v20 = vpack.c.bf16 %v2140_v48, %v2139_v14 }
  0x60   :  { %1371 = vmatprep.subr.bf16.mxu0 %v1370_v43  ;;  %1395 = vmatprep.subr.bf16.mxu1 %v1515_v22  ;;  %v2141_v22 = vand.u32 4294901760, %v1695_v0 }
  0x62   :  { %688 = vmatmul.mubr.f32.gmra.mrb[6].mxu1 %v180_v28  ;;  %1373 = vmatpush3.bf16.msra.mxu0 %v1908_v58  ;;  %v1380_v52 = vpack.c.bf16 %v2142_v13, %v2141_v22  ;;  %v980_v13 = vld [vmem:[%s2049_s3 + $0x8] sm:$0xff] }
  0x63   :  { %1397 = vmatpush3.bf16.msra.mxu1 %v1528_v27  ;;  %1375 = vmatprep.subr.bf16.mxu0 %v1914_v35  ;;  %v2143_v27 = vand.u32 4294901760, %v1713_v7  ;;  %v2149_v7 = vand.u32 4294901760, %v1776_v41 }
  0x64   :  { %1399 = vmatprep.subr.bf16.mxu1 %v1545_v39  ;;  %965 = vmatprep.mubr.f32.mxu1 %v2136_v33  ;;  %v2145_v39 = vand.u32 4294901760, %v1737_v54 }
  0x65   :  { %v1382_v56 = vpack.c.bf16 %v2144_v51, %v2143_v27 }
  0x66   :  { %1377 = vmatpush3.bf16.msra.mxu0 %v1920_v63  ;;  %v1384_v8 = vpack.c.bf16 %v2146_v9, %v2145_v39 }
  0x67   :  { %1401 = vmatpush3.bf16.msra.mxu1 %v1556_v45  ;;  %1379 = vmatprep.subr.bf16.mxu0 %v1378_v20  ;;  %v2148_v45 = vand.u32 4294901760, %v1767_v34 }
  0x68   :  { %1403 = vmatprep.subr.bf16.mxu1 %v1584_v62  ;;  %v2150_v62 = vand.u32 4294901760, %v1808_v2 }
  0x69   :  { %v1386_v0 = vpack.c.bf16 %v2148_v45, %v2147_v61 }
  0x6a   :  { %1381 = vmatpush3.bf16.msra.mxu0 %v1380_v52  ;;  %v1388_v29 = vpack.c.bf16 %v2150_v62, %v2149_v7 }
  0x6b   :  { %1405 = vmatpush3.bf16.msra.mxu1 %v1609_v16  ;;  %1383 = vmatprep.subr.bf16.mxu0 %v1382_v56  ;;  %v1001_v16 = vld [vmem:[%s2048_s2] ss:$0 sm:$0xff] }
  0x6c   :  { %1407 = vmatprep.subr.bf16.mxu1 %v1627_v49 }
  0x6e   :  { %1385 = vmatpush3.bf16.msra.mxu0 %v1384_v8 }
  0x6f   :  { %1409 = vmatpush3.bf16.msra.mxu1 %v1651_v4  ;;  %1387 = vmatprep.subr.bf16.mxu0 %v1386_v0 }
  0x70   :  { %1411 = vmatprep.subr.bf16.mxu1 %v2130_v55 }
  0x72   :  { %1389 = vmatpush3.bf16.msra.mxu0 %v1388_v29 }
  0x73   :  { %1413 = vmatpush3.bf16.msra.mxu1 %v2131_v21 }
  0x74   :  { %1415 = vmatprep.subr.bf16.mxu1 %v2132_v59 }
  0x75   :  { %856 = vmatmul.mubr.f32.vlgmr.msra.gmra.mrb[8].mxu0 %v1791_v57 }
  0x76   :  { %861 = vmatprep.mubr.f32.mxu0 %v1847_v3 }
  0x77   :  { %1417 = vmatpush3.bf16.msra.mxu1 %v2134_v38 }
  0x78   :  { %1419 = vmatprep.subr.bf16.mxu1 %v2135_v40 }
  0x79   :  { %863 = vmatmul.mubr.f32.gmra.mrb[10].mxu0 %v1859_v6 }
  0x7b   :  { %1421 = vmatpush3.bf16.msra.mxu1 %v2137_v46  ;;  %v979_v46 = vld [vmem:[%s2049_s3] sm:$0xff] }
  0x7e   :  { %967 = vmatmul.mubr.f32.vlgmr.msra.gmra.mrb[8].mxu1 %v1791_v57 }
  0x7f   :  { %972 = vmatprep.mubr.f32.mxu1 %v1847_v3 }
  0x82   :  { %974 = vmatmul.mubr.f32.gmra.mrb[10].mxu1 %v1859_v6 }
 0x108   :  { %v1034_v41 = vpop.f32.mrb[0].mxu0 }
 0x109   :  { %v1035_v53 = vpop.f32.mrb[1].mxu0 }
 0x10a   :  { %v1036_v54 = vadd.f32 %v1035_v53, %v1034_v41 }
 0x10c   :  { %v170_v49 = vadd.f32 %v1036_v54, %v1001_v16 }
 0x111   :  { %v1072_v4 = vpop.f32.mrb[0].mxu1 }
 0x112   :  { %v1073_v37 = vpop.f32.mrb[1].mxu1 }
 0x113   :  { %v1074_v34 = vadd.f32 %v1073_v37, %v1072_v4 }
 0x115   :  { %v417_v2 = vadd.f32 %v1074_v34, %v170_v49  ;;  %v1075_v47 = vpop.f32.mrb[2].mxu1 }
 0x116   :  { %v1076_v15 = vpop.f32.mrb[3].mxu1 }
 0x117   :  { %v1037_v25 = vpop.f32.mrb[2].mxu0  ;;  %v1077_v57 = vadd.f32 %v1076_v15, %v1075_v47 }
 0x118   :  { %v1038_v28 = vpop.f32.mrb[3].mxu0 }
 0x119   :  { %v1039_v3 = vadd.f32 %v1038_v28, %v1037_v25 }
 0x11b   :  { %v185_v43 = vadd.f32 %v1039_v3, %v1001_v16 }
 0x11d   :  { %v424_v6 = vadd.f32 %v1077_v57, %v185_v43 }
 0x128   :  { %v1110_v58 = vpop.f32.mrb[4].mxu0 }
 0x129   :  { %v1111_v11 = vpop.f32.mrb[5].mxu0 }
 0x12a   :  { %v1112_v19 = vadd.f32 %v1111_v11, %v1110_v58 }
 0x12c   :  { %v562_v35 = vadd.f32 %v1112_v19, %v417_v2  ;;  %v1113_v36 = vpop.f32.mrb[6].mxu0 }
 0x12d   :  { %v1114_v10 = vpop.f32.mrb[7].mxu0 }
 0x12e   :  { %v1115_v63 = vadd.f32 %v1114_v10, %v1113_v36 }
 0x130   :  { %v571_v12 = vadd.f32 %v1115_v63, %v424_v6 }
 0x131   :  { %v1148_v31 = vpop.f32.mrb[4].mxu1 }
 0x132   :  { %v1149_v32 = vpop.f32.mrb[5].mxu1 }
 0x133   :  { %v1150_v1 = vadd.f32 %v1149_v32, %v1148_v31 }
 0x135   :  { %v679_v24 = vadd.f32 %v1150_v1, %v562_v35  ;;  %v1151_v17 = vpop.f32.mrb[6].mxu1 }
 0x136   :  { %v1152_v42 = vpop.f32.mrb[7].mxu1 }
 0x137   :  { %v1153_v50 = vadd.f32 %v1152_v42, %v1151_v17 }
 0x139   :  { %v690_v60 = vadd.f32 %v1153_v50, %v571_v12 }
 0x148   :  { %v1186_v5 = vpop.f32.mrb[8].mxu0 }
 0x149   :  { %v1187_v30 = vpop.f32.mrb[9].mxu0 }
 0x14a   :  { %v1188_v18 = vadd.f32 %v1187_v30, %v1186_v5 }
 0x14c   :  { %v858_v23 = vadd.f32 %v1188_v18, %v679_v24  ;;  %v1189_v55 = vpop.f32.mrb[10].mxu0 }
 0x14d   :  { %v1190_v21 = vpop.f32.mrb[11].mxu0 }
 0x14e   :  { %v1191_v59 = vadd.f32 %v1190_v21, %v1189_v55 }
 0x150   :  { %v865_v26 = vadd.f32 %v1191_v59, %v690_v60 }
 0x151   :  { %v1224_v38 = vpop.f32.mrb[8].mxu1 }
 0x152   :  { %v1225_v40 = vpop.f32.mrb[9].mxu1 }
 0x153   :  { %v1226_v33 = vadd.f32 %v1225_v40, %v1224_v38 }
 0x155   :  { %v969_v44 = vadd.f32 %v1226_v33, %v858_v23  ;;  %v1227_v14 = vpop.f32.mrb[10].mxu1 }
 0x156   :  { %v1228_v48 = vpop.f32.mrb[11].mxu1 }
 0x157   :  { %v981_v20 = vadd.f32 %v979_v46, %v969_v44  ;;  %v1229_v22 = vadd.f32 %v1228_v48, %v1227_v14 }
 0x159   :  { %983 = vst [vmem:[#allocation2] sm:$0xff] %v981_v20  ;;  %v976_v52 = vadd.f32 %v1229_v22, %v865_v26 }
 0x15b   :  { %v982_v27 = vadd.f32 %v980_v13, %v976_v52 }
 0x15d   :  { %984 = vst [vmem:[#allocation2 + $0x8] sm:$0xff] %v982_v27 }
 0x15e   :  { %1436 = shalt.err (!%p1433_p4)
}
 0x15f   :  { %s1437_s17 = scalar_lea.hbm %s2050_s4, 256 }
 0x160   :  { %p1438_p5 = scmp.ne.s32.totalorder %s2050_s4, %s1437_s17  ;;  %p1441_p6 = scmp.lt.u32.totalorder %s1437_s17, %s2050_s4 }
 0x162   :  { %p1443_p7 = pnand %p1441_p6, %p1438_p5 }
 0x164   :  { %1446 = shalt.err (!%p1443_p7)
}
 0x165   :  { %s1450_s21 = smov 128   ;;  %s1451_s22 = smov 8  }
 0x166   :  { %996 = dma.vmem_to_hbm [thread:$0]  %s991_s11, 256, %s2050_s4, [#allocation3], %s1450_s21, %s1450_s21, %s1451_s22  }
 0x167   :  { %1447 = dma.done.wait [#allocation3], 256  }
 0x168   :  { %1448 = vsyncadd [#allocation3], 4294967040 }
 0x169   :  { %1000 = vsyncpa [#allocation3], 1 }

// kernel: encoder_block_forward.6
= control target key start
LH: loop header
LB: loop body
LE: loop exit
PB: predicated region body
PF: predicated region fallthrough
CT: control target
= control target key end

     0   :  { %s4402_s9 = smov 0   ;;  %s4649_s0 = inlined_call_operand.vmem [shape: f32[16,384], index: 0, kind: input, shape index: {}]   ;;  %s4650_s1 = inlined_call_operand.vmem [shape: f32[2,1,8,8], index: 1, kind: input, shape index: {}]   ;;  %s4651_s2 = inlined_call_operand.vmem [shape: f32[16,128], index: 2, kind: output, shape index: {}]  }
   0x1 LB: > { %s3918_s10 = sadd.s32 4294967295, %s4380_s9   ;;  %p3922_p0 = scmp.ge.s32.totalorder %s4380_s9, 1  ;;  %s4380_s9 = sphi %s4402_s9, %s12_s9  }
   0x2   : > { %p121_p1 = scmp.lt.s32.totalorder %s4380_s9, 3 }
   0x4   : > { %p122_p2 = pnand %p3922_p0, %p121_p1 }
   0x5   : > { %p146_p3 = scmp.lt.s32.totalorder (!%p122_p2), %s3918_s10, 1  ;;  %v4382_v0 = vmov (!%p122_p2), 0.0   ;;  %vm4383_vm0 = vmmov (!%p122_p2), 0   ;;  %vm164_vm1 = vcmask (!%p122_p2), 261120   ;;  %vm619_vm3 = vcmask (!%p122_p2), 64512   ;;  %s4384_s19 = smov (!%p122_p2), 96  }
   0x6   : > { %125 = sbr.rel (%p122_p2) target bundleno = 1762 (0x6e2), region = 28  ;;  %4024 = vmatprep.subr.mxu0 (!%p122_p2), %v4382_v0  ;;  %4026 = vmatprep.mubr.msk.f32.mxu0 (!%p122_p2), %vm4383_vm0, %v4382_v0  ;;  %s4385_s20 = smov (!%p122_p2), 64   ;;  %vm3848_vm4 = vcmask (!%p122_p2), 523264   ;;  %vm3850_vm5 = vcmask (!%p122_p2), 785408  }
   0x7   : > { %4054 = vmatprep.subr.mxu1 (!%p122_p2), %v4382_v0  ;;  %4056 = vmatprep.mubr.msk.f32.mxu1 (!%p122_p2), %vm4383_vm0, %v4382_v0  ;;  %s4386_s21 = smov (!%p122_p2), 32  }
   0xd   : > { %s4653_s10 = smov (!%p146_p3, %s3918_s10), 1 }
   0xe   : > { %s4344_s11 = smul.u32 24, %s4653_s10  ;;  %s3924_s15 = sshll.u32 %s4653_s10, 3 }
   0xf   : > { %s154_s18 = scalar_lea.vmem %s4650_s1, %s3924_s15  ;;  %s158_s24 = scalar_lea.vmem %s4651_s2, %s3924_s15 }
  0x10   : > { %s4422_s14 = scalar_lea.vmem %s4649_s0, %s4344_s11  ;;  %v4458_v16 = vld [vmem:[%s154_s18] sm:$0xff] }
  0x11   : > { %v159_v1 = vld [vmem:[%s4422_s14] sm:$0xff]  ;;  %v4426_v2 = vld [vmem:[%s4422_s14 + $0x8] sm:$0xff]  ;;  %vm617_vm2 = vcmp.eq.f32.partialorder %v4458_v16, 0.0  ;;  %v4474_v26 = vld [vmem:[%s4422_s14 + $0x10] sm:$0xff] }
  0x12   : > { %v4428_v3 = vmul.f32 0.17677669, %v159_v1  ;;  %v169_v4 = vsel %vm164_vm1, %v4426_v2, 0  ;;  %v635_v27 = vand.u32 4294901760, %v4474_v26 }
  0x13   : > { %v172_v5 = vand.u32 4294901760, %v169_v4 }
  0x14   : > { %v166_v6 = vsel %vm164_vm1, %v4428_v3, 0  ;;  %1080 = vrot.lane.b32.xlu1 %v4428_v3, %s4384_s19  ;;  %4055 = vmatpush3.msra.mxu1 %v635_v27  ;;  %v712_v29 = vsub.f32 %v4474_v26, %v635_v27 }
  0x15   : > { %4025 = vmatpush3.xpose.msra.mxu0 %v172_v5  ;;  %v249_v7 = vsub.f32 %v169_v4, %v172_v5  ;;  %v237_v8 = vand.u32 4294901760, %v166_v6  ;;  %4059 = vmatprep.subr.mxu1 %v4382_v0 }
  0x16   : > { %4029 = vmatprep.subr.mxu0 %v4382_v0  ;;  %v713_v33 = vand.u32 4294901760, %v712_v29 }
  0x17   : > { %v238_v9 = vsub.f32 %v166_v6, %v237_v8  ;;  %v250_v10 = vand.u32 4294901760, %v249_v7 }
  0x18   : > { %1082 = vrot.lane.b32.xlu1 %v4426_v2, %s4384_s19  ;;  %v714_v36 = vsub.f32 %v712_v29, %v713_v33 }
  0x19   : > { %v239_v11 = vand.u32 4294901760, %v238_v9  ;;  %v251_v12 = vsub.f32 %v249_v7, %v250_v10 }
  0x1a   : > { %v715_v39 = vand.u32 4294901760, %v714_v36 }
  0x1b   : > { %v240_v13 = vsub.f32 %v238_v9, %v239_v11  ;;  %v252_v14 = vand.u32 4294901760, %v251_v12 }
  0x1c   : > { %2001 = vrot.lane.b32.xlu1 %v4426_v2, %s4385_s20 }
  0x1d   : > { %v241_v15 = vand.u32 4294901760, %v240_v13 }
  0x1f   : > { %4027 = vmatmul.mubr.f32.vlgmr.msra.gmra.mrb[0].mxu0 %v241_v15 }
  0x20   : > { %4030 = vmatpush3.xpose.msra.mxu0 %v252_v14  ;;  %4031 = vmatprep.mubr.msk.f32.mxu0 %vm4383_vm0, %v4382_v0 }
  0x21   : > { %4034 = vmatprep.subr.mxu0 %v4382_v0  ;;  %2917 = vrot.lane.b32.xlu1 %v4428_v3, %s4386_s21 }
  0x25   : > { %2919 = vrot.lane.b32.xlu1 %v4426_v2, %s4386_s21 }
  0x27   : > { %4032 = vmatmul.mubr.f32.vlgmr.msra.gmra.mrb[0].mxu0 %v237_v8 }
  0x28   : > { %4035 = vmatpush3.xpose.msra.mxu0 %v249_v7  ;;  %4036 = vmatprep.mubr.msk.f32.mxu0 %vm4383_vm0, %v4382_v0 }
  0x29   : > { %4039 = vmatprep.subr.mxu0 %v4382_v0 }
  0x2f   : > { %4037 = vmatmul.mubr.f32.vlgmr.msra.gmra.mrb[0].mxu0 %v238_v9 }
  0x30   : > { %4040 = vmatpush3.xpose.msra.mxu0 %v172_v5  ;;  %4041 = vmatprep.mubr.msk.f32.mxu0 %vm4383_vm0, %v4382_v0 }
  0x31   : > { %4044 = vmatprep.subr.mxu0 %v4382_v0 }
  0x37   : > { %4042 = vmatmul.mubr.f32.vlgmr.msra.gmra.mrb[0].mxu0 %v239_v11 }
  0x38   : > { %4045 = vmatpush3.xpose.msra.mxu0 %v250_v10  ;;  %4046 = vmatprep.mubr.msk.f32.mxu0 %vm4383_vm0, %v4382_v0 }
  0x39   : > { %4049 = vmatprep.subr.mxu0 %v4382_v0 }
  0x3f   : > { %4047 = vmatmul.mubr.f32.vlgmr.msra.gmra.mrb[0].mxu0 %v237_v8 }
  0x40   : > { %4050 = vmatpush3.xpose.msra.mxu0 %v172_v5  ;;  %4051 = vmatprep.mubr.msk.f32.mxu0 %vm4383_vm0, %v4382_v0 }
  0x41   : > { %4114 = vmatprep.subr.mxu0 %v4382_v0 }
  0x47   : > { %4052 = vmatmul.mubr.f32.vlgmr.msra.gmra.mrb[0].mxu0 %v237_v8 }
  0x48   : > { %4116 = vmatprep.mubr.msk.f32.mxu0 %vm4383_vm0, %v4382_v0 }
  0x86   : > { %v1081_v41 = vpop.permute.xlu1 %1080 }
  0x87   : > { %v1084_v44 = vsel %vm164_vm1, %v1081_v41, 0 }
  0x88   : > { %v1154_v46 = vand.u32 4294901760, %v1084_v44 }
  0x8a   : > { %v1083_v42 = vpop.permute.xlu1 %1082  ;;  %v1155_v48 = vsub.f32 %v1084_v44, %v1154_v46 }
  0x8b   : > { %v1086_v43 = vsel %vm164_vm1, %v1083_v42, 0 }
  0x8c   : > { %v1089_v45 = vand.u32 4294901760, %v1086_v43  ;;  %v1156_v50 = vand.u32 4294901760, %v1155_v48 }
  0x8e   : > { %v1166_v47 = vsub.f32 %v1086_v43, %v1089_v45  ;;  %v1157_v52 = vsub.f32 %v1155_v48, %v1156_v50  ;;  %v2002_v56 = vpop.permute.xlu1 %2001 }
  0x8f   : > { %v2005_v58 = vsel %vm164_vm1, %v2002_v56, 0 }
  0x90   : > { %v1167_v49 = vand.u32 4294901760, %v1166_v47  ;;  %v1158_v54 = vand.u32 4294901760, %v1157_v52  ;;  %v2008_v60 = vand.u32 4294901760, %v2005_v58 }
  0x92   : > { %v1168_v51 = vsub.f32 %v1166_v47, %v1167_v49  ;;  %v2085_v62 = vsub.f32 %v2005_v58, %v2008_v60 }
  0x93   : > { %v2918_v6 = vpop.permute.xlu1 %2917 }
  0x94   : > { %v1169_v53 = vand.u32 4294901760, %v1168_v51  ;;  %v2086_v1 = vand.u32 4294901760, %v2085_v62  ;;  %v2921_v8 = vsel %vm164_vm1, %v2918_v6, 0 }
  0x95   : > { %v2991_v10 = vand.u32 4294901760, %v2921_v8 }
  0x97   : > { %v2920_v7 = vpop.permute.xlu1 %2919  ;;  %v2992_v12 = vsub.f32 %v2921_v8, %v2991_v10 }
  0x98   : > { %v2923_v9 = vsel %vm164_vm1, %v2920_v7, 0 }
  0x99   : > { %v2926_v11 = vand.u32 4294901760, %v2923_v9  ;;  %v2993_v14 = vand.u32 4294901760, %v2992_v12 }
  0x9b   : > { %v3003_v13 = vsub.f32 %v2923_v9, %v2926_v11 }
  0x9d   : > { %v3004_v15 = vand.u32 4294901760, %v3003_v13 }
 0x11a   : > { %v613_v17 = vpop.f32.mrb[0].mxu0 }
 0x11b   : > { %v618_v18 = vsel %vm617_vm2, -1e+09, %v613_v17  ;;  %v4053_v19 = vpop.f32.mrb[1].mxu0  ;;  %v2994_v17 = vsub.f32 %v2992_v12, %v2993_v14 }
 0x11c   : > { %v620_v20 = vsel %vm619_vm3, %v618_v18, -inf }
 0x11d   : > { %621 = vmax.xlane.f32.xlu0 %v620_v20  ;;  %v2995_v19 = vand.u32 4294901760, %v2994_v17 }
 0x1aa   : > { %v622_v21 = vpop.xlane.xlu0 %621 }
 0x1ab   : > { %v623_v22 = vsub.f32 %v618_v18, %v622_v21  ;;  %v3005_v18 = vsub.f32 %v3003_v13, %v3004_v15 }
 0x1ad   : > { %v624_v23 = vmul.f32 1.442695, %v623_v22  ;;  %v3006_v20 = vand.u32 4294901760, %v3005_v18 }
 0x1af   : > { %4358 = vpow2.f32 %v624_v23 }
 0x1b9   : > { %v4359_v24 = vpop.eup %4358 }
 0x1ba   : > { %v626_v25 = vsel %vm619_vm3, %v4359_v24, 0.0 }
 0x1bb   : > { %627 = vadd.xlane.f32.xlu0 %v626_v25 }
 0x1d1   : > { %1999 = vrot.lane.b32.xlu0 %v4428_v3, %s4385_s20  ;;  %v2087_v3 = vsub.f32 %v2085_v62, %v2086_v1 }
 0x1d3   : > { %v2088_v5 = vand.u32 4294901760, %v2087_v3 }
 0x248   : > { %v628_v28 = vpop.xlane.xlu0 %627 }
 0x249   : > { %4360 = vrcp.f32 %v628_v28 }
 0x24c   : > { %v2000_v55 = vpop.permute.xlu0 %1999 }
 0x24d   : > { %v2003_v57 = vsel %vm164_vm1, %v2000_v55, 0 }
 0x24e   : > { %v2073_v59 = vand.u32 4294901760, %v2003_v57 }
 0x250   : > { %v2074_v61 = vsub.f32 %v2003_v57, %v2073_v59 }
 0x252   : > { %v2075_v63 = vand.u32 4294901760, %v2074_v61 }
 0x253   : > { %v4361_v30 = vpop.eup %4360 }
 0x254   : > { %v630_v31 = vmul.f32 %v4361_v30, %v4359_v24  ;;  %v2076_v2 = vsub.f32 %v2074_v61, %v2075_v63 }
 0x256   : > { %v632_v32 = vsel %vm619_vm3, %v630_v31, 0  ;;  %v2077_v4 = vand.u32 4294901760, %v2076_v2 }
 0x257   : > { %v700_v34 = vand.u32 4294901760, %v632_v32 }
 0x259   : > { %v701_v35 = vsub.f32 %v632_v32, %v700_v34 }
 0x25b   : > { %v702_v37 = vand.u32 4294901760, %v701_v35 }
 0x25d   : > { %v703_v38 = vsub.f32 %v701_v35, %v702_v37 }
 0x25f   : > { %v704_v40 = vand.u32 4294901760, %v703_v38 }
 0x261   : > { %4057 = vmatmul.mubr.f32.vlgmr.msra.gmra.mrb[0].mxu1 %v704_v40 }
 0x262   : > { %4060 = vmatpush3.msra.mxu1 %v715_v39  ;;  %4061 = vmatprep.mubr.msk.f32.mxu1 %vm4383_vm0, %v4382_v0 }
 0x263   : > { %4064 = vmatprep.subr.mxu1 %v4382_v0 }
 0x269   : > { %4062 = vmatmul.mubr.f32.vlgmr.msra.gmra.mrb[0].mxu1 %v700_v34 }
 0x26a   : > { %4065 = vmatpush3.msra.mxu1 %v712_v29  ;;  %4066 = vmatprep.mubr.msk.f32.mxu1 %vm4383_vm0, %v4382_v0 }
 0x26b   : > { %4069 = vmatprep.subr.mxu1 %v4382_v0 }
 0x271   : > { %4067 = vmatmul.mubr.f32.vlgmr.msra.gmra.mrb[0].mxu1 %v701_v35 }
 0x272   : > { %4070 = vmatpush3.msra.mxu1 %v635_v27  ;;  %4071 = vmatprep.mubr.msk.f32.mxu1 %vm4383_vm0, %v4382_v0 }
 0x273   : > { %4074 = vmatprep.subr.mxu1 %v4382_v0 }
 0x279   : > { %4072 = vmatmul.mubr.f32.vlgmr.msra.gmra.mrb[0].mxu1 %v702_v37 }
 0x27a   : > { %4075 = vmatpush3.msra.mxu1 %v713_v33  ;;  %4076 = vmatprep.mubr.msk.f32.mxu1 %vm4383_vm0, %v4382_v0 }
 0x27b   : > { %4079 = vmatprep.subr.mxu1 %v4382_v0 }
 0x281   : > { %4077 = vmatmul.mubr.f32.vlgmr.msra.gmra.mrb[0].mxu1 %v700_v34 }
 0x282   : > { %4080 = vmatpush3.msra.mxu1 %v635_v27  ;;  %4081 = vmatprep.mubr.msk.f32.mxu1 %vm4383_vm0, %v4382_v0 }
 0x283   : > { %4084 = vmatprep.subr.mxu1 %v4382_v0 }
 0x289   : > { %4082 = vmatmul.mubr.f32.vlgmr.msra.gmra.mrb[0].mxu1 %v700_v34 }
 0x28a   : > { %4085 = vmatpush3.xpose.msra.mxu1 %v1089_v45  ;;  %4086 = vmatprep.mubr.msk.f32.mxu1 %vm4383_vm0, %v4382_v0 }
 0x28b   : > { %4089 = vmatprep.subr.mxu1 %v4382_v0 }
 0x28d   : > { %4087 = vmatmul.mubr.f32.vlgmr.msra.gmra.mrb[2].mxu1 %v1158_v54 }
 0x28e   : > { %4090 = vmatpush3.xpose.msra.mxu1 %v1169_v53  ;;  %4091 = vmatprep.mubr.msk.f32.mxu1 %vm4383_vm0, %v4382_v0 }
 0x28f   : > { %4094 = vmatprep.subr.mxu1 %v4382_v0 }
 0x295   : > { %4092 = vmatmul.mubr.f32.vlgmr.msra.gmra.mrb[2].mxu1 %v1154_v46 }
 0x296   : > { %4095 = vmatpush3.xpose.msra.mxu1 %v1166_v47  ;;  %4096 = vmatprep.mubr.msk.f32.mxu1 %vm4383_vm0, %v4382_v0 }
 0x297   : > { %4099 = vmatprep.subr.mxu1 %v4382_v0 }
 0x29d   : > { %4097 = vmatmul.mubr.f32.vlgmr.msra.gmra.mrb[2].mxu1 %v1155_v48 }
 0x29e   : > { %4100 = vmatpush3.xpose.msra.mxu1 %v1089_v45  ;;  %4101 = vmatprep.mubr.msk.f32.mxu1 %vm4383_vm0, %v4382_v0 }
 0x29f   : > { %4104 = vmatprep.subr.mxu1 %v4382_v0 }
 0x2a5   : > { %4102 = vmatmul.mubr.f32.vlgmr.msra.gmra.mrb[2].mxu1 %v1156_v50 }
 0x2a6   : > { %4105 = vmatpush3.xpose.msra.mxu1 %v1167_v49  ;;  %4106 = vmatprep.mubr.msk.f32.mxu1 %vm4383_vm0, %v4382_v0 }
 0x2a7   : > { %4109 = vmatprep.subr.mxu1 %v4382_v0 }
 0x2ad   : > { %4107 = vmatmul.mubr.f32.vlgmr.msra.gmra.mrb[2].mxu1 %v1154_v46 }
 0x2ae   : > { %4110 = vmatpush3.xpose.msra.mxu1 %v1089_v45  ;;  %4111 = vmatprep.mubr.msk.f32.mxu1 %vm4383_vm0, %v4382_v0 }
 0x2af   : > { %4144 = vmatprep.subr.mxu1 %v4382_v0 }
 0x2b5   : > { %4112 = vmatmul.mubr.f32.vlgmr.msra.gmra.mrb[2].mxu1 %v1154_v46 }
 0x2b6   : > { %4145 = vmatpush3.xpose.msra.mxu1 %v2008_v60  ;;  %4146 = vmatprep.mubr.msk.f32.mxu1 %vm4383_vm0, %v4382_v0 }
 0x2b7   : > { %4149 = vmatprep.subr.mxu1 %v4382_v0 }
 0x2b9   : > { %4147 = vmatmul.mubr.f32.vlgmr.msra.gmra.mrb[4].mxu1 %v2077_v4 }
 0x2ba   : > { %4150 = vmatpush3.xpose.msra.mxu1 %v2088_v5  ;;  %4151 = vmatprep.mubr.msk.f32.mxu1 %vm4383_vm0, %v4382_v0 }
 0x2bb   : > { %4154 = vmatprep.subr.mxu1 %v4382_v0 }
 0x2c1   : > { %4152 = vmatmul.mubr.f32.vlgmr.msra.gmra.mrb[4].mxu1 %v2073_v59 }
 0x2c2   : > { %4155 = vmatpush3.xpose.msra.mxu1 %v2085_v62  ;;  %4156 = vmatprep.mubr.msk.f32.mxu1 %vm4383_vm0, %v4382_v0 }
 0x2c3   : > { %4159 = vmatprep.subr.mxu1 %v4382_v0 }
 0x2c9   : > { %4157 = vmatmul.mubr.f32.vlgmr.msra.gmra.mrb[4].mxu1 %v2074_v61 }
 0x2ca   : > { %4160 = vmatpush3.xpose.msra.mxu1 %v2008_v60  ;;  %4161 = vmatprep.mubr.msk.f32.mxu1 %vm4383_vm0, %v4382_v0 }
 0x2cb   : > { %4164 = vmatprep.subr.mxu1 %v4382_v0 }
 0x2d1   : > { %4162 = vmatmul.mubr.f32.vlgmr.msra.gmra.mrb[4].mxu1 %v2075_v63 }
 0x2d2   : > { %4165 = vmatpush3.xpose.msra.mxu1 %v2086_v1  ;;  %4166 = vmatprep.mubr.msk.f32.mxu1 %vm4383_vm0, %v4382_v0 }
 0x2d3   : > { %4169 = vmatprep.subr.mxu1 %v4382_v0 }
 0x2d9   : > { %4167 = vmatmul.mubr.f32.vlgmr.msra.gmra.mrb[4].mxu1 %v2073_v59 }
 0x2da   : > { %4170 = vmatpush3.xpose.msra.mxu1 %v2008_v60  ;;  %4171 = vmatprep.mubr.msk.f32.mxu1 %vm4383_vm0, %v4382_v0 }
 0x2db   : > { %4204 = vmatprep.subr.mxu1 %v4382_v0 }
 0x2e1   : > { %4172 = vmatmul.mubr.f32.vlgmr.msra.gmra.mrb[4].mxu1 %v2073_v59 }
 0x2e2   : > { %4205 = vmatpush3.xpose.msra.mxu1 %v2926_v11  ;;  %4206 = vmatprep.mubr.msk.f32.mxu1 %vm4383_vm0, %v4382_v0 }
 0x2e3   : > { %4209 = vmatprep.subr.mxu1 %v4382_v0 }
 0x2e5   : > { %4207 = vmatmul.mubr.f32.vlgmr.msra.gmra.mrb[6].mxu1 %v2995_v19 }
 0x2e6   : > { %4210 = vmatpush3.xpose.msra.mxu1 %v3006_v20  ;;  %4211 = vmatprep.mubr.msk.f32.mxu1 %vm4383_vm0, %v4382_v0 }
 0x2e7   : > { %4214 = vmatprep.subr.mxu1 %v4382_v0 }
 0x2ed   : > { %4212 = vmatmul.mubr.f32.vlgmr.msra.gmra.mrb[6].mxu1 %v2991_v10 }
 0x2ee   : > { %4215 = vmatpush3.xpose.msra.mxu1 %v3003_v13  ;;  %4216 = vmatprep.mubr.msk.f32.mxu1 %vm4383_vm0, %v4382_v0 }
 0x2ef   : > { %4219 = vmatprep.subr.mxu1 %v4382_v0 }
 0x2f5   : > { %4217 = vmatmul.mubr.f32.vlgmr.msra.gmra.mrb[6].mxu1 %v2992_v12 }
 0x2f6   : > { %4220 = vmatpush3.xpose.msra.mxu1 %v2926_v11  ;;  %4221 = vmatprep.mubr.msk.f32.mxu1 %vm4383_vm0, %v4382_v0 }
 0x2f7   : > { %4224 = vmatprep.subr.mxu1 %v4382_v0 }
 0x2fd   : > { %4222 = vmatmul.mubr.f32.vlgmr.msra.gmra.mrb[6].mxu1 %v2993_v14 }
 0x2fe   : > { %4225 = vmatpush3.xpose.msra.mxu1 %v3004_v15  ;;  %4226 = vmatprep.mubr.msk.f32.mxu1 %vm4383_vm0, %v4382_v0 }
 0x2ff   : > { %4229 = vmatprep.subr.mxu1 %v4382_v0 }
 0x305   : > { %4227 = vmatmul.mubr.f32.vlgmr.msra.gmra.mrb[6].mxu1 %v2991_v10 }
 0x306   : > { %4230 = vmatpush3.xpose.msra.mxu1 %v2926_v11  ;;  %4231 = vmatprep.mubr.msk.f32.mxu1 %vm4383_vm0, %v4382_v0 }
 0x30d   : > { %4232 = vmatmul.mubr.f32.vlgmr.msra.gmra.mrb[6].mxu1 %v2991_v10 }
 0x35c   : > { %v4558_v21 = vpop.f32.mrb[0].mxu1 }
 0x35d   : > { %v4083_v22 = vpop.f32.mrb[1].mxu1 }
 0x388   : > { %v1530_v23 = vpop.f32.mrb[2].mxu1 }
 0x389   : > { %v1534_v24 = vsel %vm617_vm2, -1e+09, %v1530_v23  ;;  %v4113_v25 = vpop.f32.mrb[3].mxu1 }
 0x38a   : > { %v1535_v27 = vsel %vm619_vm3, %v1534_v24, -inf }
 0x38b   : > { %1536 = vmax.xlane.f32.xlu1 %v1535_v27 }
 0x3b4   : > { %v2449_v28 = vpop.f32.mrb[4].mxu1 }
 0x3b5   : > { %v2453_v29 = vsel %vm617_vm2, -1e+09, %v2449_v28  ;;  %v4173_v30 = vpop.f32.mrb[5].mxu1 }
 0x3b6   : > { %v2454_v31 = vsel %vm619_vm3, %v2453_v29, -inf }
 0x3b7   : > { %2455 = vmax.xlane.f32.xlu0 %v2454_v31 }
 0x3cd   : > { %1547 = vrot.lane.b32.xlu0 %v4474_v26, %s4384_s19 }
 0x3e0   : > { %v3367_v32 = vpop.f32.mrb[6].mxu1 }
 0x3e1   : > { %v4233_v33 = vpop.f32.mrb[7].mxu1  ;;  %v3371_v39 = vsel %vm617_vm2, -1e+09, %v3367_v32 }
 0x3e2   : > { %v3372_v40 = vsel %vm619_vm3, %v3371_v39, -inf }
 0x418   : > { %v1537_v34 = vpop.xlane.xlu1 %1536 }
 0x419   : > { %v1538_v35 = vsub.f32 %v1534_v24, %v1537_v34 }
 0x41b   : > { %v1539_v36 = vmul.f32 1.442695, %v1538_v35 }
 0x41d   : > { %4362 = vpow2.f32 %v1539_v36 }
 0x427   : > { %v4363_v37 = vpop.eup %4362 }
 0x428   : > { %v1541_v38 = vsel %vm619_vm3, %v4363_v37, 0.0 }
 0x429   : > { %1542 = vadd.xlane.f32.xlu1 %v1541_v38 }
 0x42d   : > { %3373 = vmax.xlane.f32.xlu1 %v3372_v40 }
 0x444   : > { %v2456_v41 = vpop.xlane.xlu0 %2455 }
 0x445   : > { %v2457_v42 = vsub.f32 %v2453_v29, %v2456_v41 }
 0x447   : > { %v2458_v43 = vmul.f32 1.442695, %v2457_v42 }
 0x448   : > { %v1548_v44 = vpop.permute.xlu0 %1547 }
 0x449   : > { %4364 = vpow2.f32 %v2458_v43  ;;  %v1554_v45 = vand.u32 4294901760, %v1548_v44 }
 0x44b   : > { %4115 = vmatpush3.msra.mxu0 %v1554_v45  ;;  %v1631_v51 = vsub.f32 %v1548_v44, %v1554_v45 }
 0x44c   : > { %4119 = vmatprep.subr.mxu0 %v4382_v0 }
 0x44d   : > { %v1632_v54 = vand.u32 4294901760, %v1631_v51 }
 0x44f   : > { %v1633_v58 = vsub.f32 %v1631_v51, %v1632_v54 }
 0x451   : > { %v1634_v62 = vand.u32 4294901760, %v1633_v58 }
 0x453   : > { %v4365_v46 = vpop.eup %4364 }
 0x454   : > { %v2460_v47 = vsel %vm619_vm3, %v4365_v46, 0.0 }
 0x455   : > { %2461 = vadd.xlane.f32.xlu1 %v2460_v47 }
 0x466   : > { %2465 = vrot.lane.b32.xlu1 %v4474_v26, %s4385_s20 }
 0x46a   : > { %3383 = vrot.lane.b32.xlu1 %v4474_v26, %s4386_s21 }
 0x4b6   : > { %v1543_v16 = vpop.xlane.xlu1 %1542 }
 0x4b7   : > { %4366 = vrcp.f32 %v1543_v16 }
 0x4ba   : > { %v3374_v48 = vpop.xlane.xlu1 %3373 }
 0x4bb   : > { %v3375_v49 = vsub.f32 %v3371_v39, %v3374_v48 }
 0x4bd   : > { %v3376_v50 = vmul.f32 1.442695, %v3375_v49 }
 0x4bf   : > { %4368 = vpow2.f32 %v3376_v50 }
 0x4c1   : > { %v4367_v52 = vpop.eup %4366 }
 0x4c2   : > { %v1545_v53 = vmul.f32 %v4367_v52, %v4363_v37 }
 0x4c4   : > { %v1551_v55 = vsel %vm619_vm3, %v1545_v53, 0 }
 0x4c5   : > { %v1619_v56 = vand.u32 4294901760, %v1551_v55 }
 0x4c7   : > { %v1620_v57 = vsub.f32 %v1551_v55, %v1619_v56 }
 0x4c9   : > { %v4579_v59 = vpop.eup %4368  ;;  %v1621_v60 = vand.u32 4294901760, %v1620_v57 }
 0x4ca   : > { %v3378_v26 = vsel %vm619_vm3, %v4579_v59, 0.0 }
 0x4cb   : > { %3379 = vadd.xlane.f32.xlu0 %v3378_v26  ;;  %v1622_v61 = vsub.f32 %v1620_v57, %v1621_v60 }
 0x4cd   : > { %v1623_v63 = vand.u32 4294901760, %v1622_v61 }
 0x4cf   : > { %4117 = vmatmul.mubr.f32.vlgmr.msra.gmra.mrb[2].mxu0 %v1623_v63 }
 0x4d0   : > { %4120 = vmatpush3.msra.mxu0 %v1634_v62  ;;  %4121 = vmatprep.mubr.msk.f32.mxu0 %vm4383_vm0, %v4382_v0 }
 0x4d1   : > { %4124 = vmatprep.subr.mxu0 %v4382_v0 }
 0x4d7   : > { %4122 = vmatmul.mubr.f32.vlgmr.msra.gmra.mrb[2].mxu0 %v1619_v56 }
 0x4d8   : > { %4125 = vmatpush3.msra.mxu0 %v1631_v51  ;;  %4126 = vmatprep.mubr.msk.f32.mxu0 %vm4383_vm0, %v4382_v0 }
 0x4d9   : > { %4129 = vmatprep.subr.mxu0 %v4382_v0 }
 0x4df   : > { %4127 = vmatmul.mubr.f32.vlgmr.msra.gmra.mrb[2].mxu0 %v1620_v57 }
 0x4e0   : > { %4130 = vmatpush3.msra.mxu0 %v1554_v45  ;;  %4131 = vmatprep.mubr.msk.f32.mxu0 %vm4383_vm0, %v4382_v0 }
 0x4e1   : > { %4134 = vmatprep.subr.mxu0 %v4382_v0 }
 0x4e2   : > { %v2462_v1 = vpop.xlane.xlu1 %2461 }
 0x4e3   : > { %4370 = vrcp.f32 %v2462_v1 }
 0x4e6   : > { %v2466_v2 = vpop.permute.xlu1 %2465 }
 0x4e7   : > { %4132 = vmatmul.mubr.f32.vlgmr.msra.gmra.mrb[2].mxu0 %v1621_v60  ;;  %v2472_v3 = vand.u32 4294901760, %v2466_v2 }
 0x4e8   : > { %4135 = vmatpush3.msra.mxu0 %v1632_v54  ;;  %4136 = vmatprep.mubr.msk.f32.mxu0 %vm4383_vm0, %v4382_v0 }
 0x4e9   : > { %4139 = vmatprep.subr.mxu0 %v4382_v0  ;;  %v2549_v4 = vsub.f32 %v2466_v2, %v2472_v3 }
 0x4ea   : > { %v3384_v17 = vpop.permute.xlu1 %3383 }
 0x4eb   : > { %v2550_v7 = vand.u32 4294901760, %v2549_v4  ;;  %v3390_v18 = vand.u32 4294901760, %v3384_v17 }
 0x4ed   : > { %v4371_v5 = vpop.eup %4370  ;;  %v2551_v11 = vsub.f32 %v2549_v4, %v2550_v7  ;;  %v3467_v20 = vsub.f32 %v3384_v17, %v3390_v18 }
 0x4ee   : > { %v2464_v6 = vmul.f32 %v4371_v5, %v4365_v46 }
 0x4ef   : > { %4137 = vmatmul.mubr.f32.vlgmr.msra.gmra.mrb[2].mxu0 %v1619_v56  ;;  %v2552_v14 = vand.u32 4294901760, %v2551_v11  ;;  %v3468_v25 = vand.u32 4294901760, %v3467_v20 }
 0x4f0   : > { %4140 = vmatpush3.msra.mxu0 %v1554_v45  ;;  %4141 = vmatprep.mubr.msk.f32.mxu0 %vm4383_vm0, %v4382_v0  ;;  %v2469_v8 = vsel %vm619_vm3, %v2464_v6, 0 }
 0x4f1   : > { %4174 = vmatprep.subr.mxu0 %v4382_v0  ;;  %v2537_v9 = vand.u32 4294901760, %v2469_v8  ;;  %v3469_v29 = vsub.f32 %v3467_v20, %v3468_v25 }
 0x4f3   : > { %v2538_v10 = vsub.f32 %v2469_v8, %v2537_v9  ;;  %v3470_v32 = vand.u32 4294901760, %v3469_v29 }
 0x4f5   : > { %v2539_v12 = vand.u32 4294901760, %v2538_v10 }
 0x4f7   : > { %4142 = vmatmul.mubr.f32.vlgmr.msra.gmra.mrb[2].mxu0 %v1619_v56  ;;  %v2540_v13 = vsub.f32 %v2538_v10, %v2539_v12 }
 0x4f8   : > { %4175 = vmatpush3.msra.mxu0 %v2472_v3  ;;  %4176 = vmatprep.mubr.msk.f32.mxu0 %vm4383_vm0, %v4382_v0 }
 0x4f9   : > { %v2541_v15 = vand.u32 4294901760, %v2540_v13  ;;  %4179 = vmatprep.subr.mxu0 %v4382_v0 }
 0x4fb   : > { %4177 = vmatmul.mubr.f32.vlgmr.msra.gmra.mrb[4].mxu0 %v2541_v15 }
 0x4fc   : > { %4180 = vmatpush3.msra.mxu0 %v2552_v14  ;;  %4181 = vmatprep.mubr.msk.f32.mxu0 %vm4383_vm0, %v4382_v0 }
 0x4fd   : > { %4184 = vmatprep.subr.mxu0 %v4382_v0 }
 0x503   : > { %4182 = vmatmul.mubr.f32.vlgmr.msra.gmra.mrb[4].mxu0 %v2537_v9 }
 0x504   : > { %4185 = vmatpush3.msra.mxu0 %v2549_v4  ;;  %4186 = vmatprep.mubr.msk.f32.mxu0 %vm4383_vm0, %v4382_v0 }
 0x505   : > { %4189 = vmatprep.subr.mxu0 %v4382_v0 }
 0x50b   : > { %4187 = vmatmul.mubr.f32.vlgmr.msra.gmra.mrb[4].mxu0 %v2538_v10 }
 0x50c   : > { %4190 = vmatpush3.msra.mxu0 %v2472_v3  ;;  %4191 = vmatprep.mubr.msk.f32.mxu0 %vm4383_vm0, %v4382_v0 }
 0x50d   : > { %4194 = vmatprep.subr.mxu0 %v4382_v0 }
 0x513   : > { %4192 = vmatmul.mubr.f32.vlgmr.msra.gmra.mrb[4].mxu0 %v2539_v12 }
 0x514   : > { %4195 = vmatpush3.msra.mxu0 %v2550_v7  ;;  %4196 = vmatprep.mubr.msk.f32.mxu0 %vm4383_vm0, %v4382_v0 }
 0x515   : > { %4199 = vmatprep.subr.mxu0 %v4382_v0 }
 0x51b   : > { %4197 = vmatmul.mubr.f32.vlgmr.msra.gmra.mrb[4].mxu0 %v2537_v9 }
 0x51c   : > { %4200 = vmatpush3.msra.mxu0 %v2472_v3  ;;  %4201 = vmatprep.mubr.msk.f32.mxu0 %vm4383_vm0, %v4382_v0 }
 0x51d   : > { %4234 = vmatprep.subr.mxu0 %v4382_v0 }
 0x523   : > { %4202 = vmatmul.mubr.f32.vlgmr.msra.gmra.mrb[4].mxu0 %v2537_v9 }
 0x524   : > { %4235 = vmatpush3.msra.mxu0 %v3390_v18  ;;  %4236 = vmatprep.mubr.msk.f32.mxu0 %vm4383_vm0, %v4382_v0 }
 0x525   : > { %4239 = vmatprep.subr.mxu0 %v4382_v0 }
 0x558   : > { %v3380_v19 = vpop.xlane.xlu0 %3379 }
 0x559   : > { %4372 = vrcp.f32 %v3380_v19 }
 0x563   : > { %v4373_v22 = vpop.eup %4372 }
 0x564   : > { %v3382_v23 = vmul.f32 %v4373_v22, %v4579_v59 }
 0x566   : > { %v3387_v24 = vsel %vm619_vm3, %v3382_v23, 0 }
 0x567   : > { %v3455_v27 = vand.u32 4294901760, %v3387_v24 }
 0x569   : > { %v3456_v28 = vsub.f32 %v3387_v24, %v3455_v27 }
 0x56b   : > { %v3457_v30 = vand.u32 4294901760, %v3456_v28 }
 0x56d   : > { %v3458_v31 = vsub.f32 %v3456_v28, %v3457_v30 }
 0x56f   : > { %v3459_v33 = vand.u32 4294901760, %v3458_v31 }
 0x571   : > { %4237 = vmatmul.mubr.f32.vlgmr.msra.gmra.mrb[6].mxu0 %v3459_v33 }
 0x572   : > { %4240 = vmatpush3.msra.mxu0 %v3470_v32  ;;  %4241 = vmatprep.mubr.msk.f32.mxu0 %vm4383_vm0, %v4382_v0 }
 0x573   : > { %4244 = vmatprep.subr.mxu0 %v4382_v0 }
 0x579   : > { %4242 = vmatmul.mubr.f32.vlgmr.msra.gmra.mrb[6].mxu0 %v3455_v27 }
 0x57a   : > { %4245 = vmatpush3.msra.mxu0 %v3467_v20  ;;  %4246 = vmatprep.mubr.msk.f32.mxu0 %vm4383_vm0, %v4382_v0 }
 0x57b   : > { %4249 = vmatprep.subr.mxu0 %v4382_v0 }
 0x581   : > { %4247 = vmatmul.mubr.f32.vlgmr.msra.gmra.mrb[6].mxu0 %v3456_v28 }
 0x582   : > { %4250 = vmatpush3.msra.mxu0 %v3390_v18  ;;  %4251 = vmatprep.mubr.msk.f32.mxu0 %vm4383_vm0, %v4382_v0 }
 0x583   : > { %4254 = vmatprep.subr.mxu0 %v4382_v0 }
 0x589   : > { %4252 = vmatmul.mubr.f32.vlgmr.msra.gmra.mrb[6].mxu0 %v3457_v30 }
 0x58a   : > { %4255 = vmatpush3.msra.mxu0 %v3468_v25  ;;  %4256 = vmatprep.mubr.msk.f32.mxu0 %vm4383_vm0, %v4382_v0 }
 0x58b   : > { %4259 = vmatprep.subr.mxu0 %v4382_v0 }
 0x591   : > { %4257 = vmatmul.mubr.f32.vlgmr.msra.gmra.mrb[6].mxu0 %v3455_v27 }
 0x592   : > { %4260 = vmatpush3.msra.mxu0 %v3390_v18  ;;  %4261 = vmatprep.mubr.msk.f32.mxu0 %vm4383_vm0, %v4382_v0 }
 0x599   : > { %4262 = vmatmul.mubr.f32.vlgmr.msra.gmra.mrb[6].mxu0 %v3455_v27 }
 0x5ca   : > { %v1995_v34 = vpop.f32.mrb[2].mxu0 }
 0x5cb   : > { %3836 = vrot.lane.b32.xlu1 %v1995_v34, %s4386_s21  ;;  %v4143_v35 = vpop.f32.mrb[3].mxu0 }
 0x5f6   : > { %v2913_v36 = vpop.f32.mrb[4].mxu0 }
 0x5f7   : > { %3840 = vrot.lane.b32.xlu1 %v2913_v36, %s4385_s20  ;;  %v4203_v37 = vpop.f32.mrb[5].mxu0 }
 0x63d   : > { %v3837_v40 = vpop.permute.xlu1 %3836 }
 0x63e   : > { %v3847_v0 = vsel %vm164_vm1, %v4558_v21, %v3837_v40 }
 0x669   : > { %v3841_v41 = vpop.permute.xlu1 %3840 }
 0x66a   : > { %v3849_v42 = vsel %vm3848_vm4, %v3847_v0, %v3841_v41 }
 0x66c   : > { %v3831_v38 = vpop.f32.mrb[6].mxu0 }
 0x66d   : > { %3844 = vrot.lane.b32.xlu1 %v3831_v38, %s4384_s19  ;;  %v4263_v39 = vpop.f32.mrb[7].mxu0 }
 0x6df   : > { %v3845_v43 = vpop.permute.xlu1 %3844 }
 0x6e0   : > { %v3851_v44 = vsel %vm3850_vm5, %v3849_v42, %v3845_v43 }
 0x6e1   : > { %3852 = vst [vmem:[%s158_s24] sm:$0xff] %v3851_v44 }
 0x6e2 PF: > { %s12_s9 = sadd.s32 1, %s4380_s9  }
 0x6e3   : > { %p9_p4 = scmp.ge.s32.totalorder %s12_s9, 4  }
 0x6e5   :  { %11 = sbr.rel (!%p9_p4) target bundleno = 1 (0x1), region = 61 }

</bundles_post_ra>
